<compile_context>
chip_gen: v7x
topology: tpu7x:2x2x1
jax: 0.10.0
libtpu: 0.0.40
codegen_flags: <defaults>
</compile_context>

<pallas_src>
import functools

import jax
import jax.numpy as jnp
import numpy as np
from jax.experimental import pallas as pl
from jax.experimental.pallas import tpu as pltpu

VGG_types = {
    "VGG11": [64, "M", 128, "M", 256, 256, "M", 512, 512, "M", 512, 512, "M"],
    "VGG13": [64, 64, "M", 128, 128, "M", 256, 256, "M", 512, 512, "M", 512, 512, "M"],
    "VGG16": [64, 64, "M", 128, 128, "M", 256, 256, 256, "M", 512, 512, 512, "M",
              512, 512, 512, "M"],
    "VGG19": [64, 64, "M", 128, 128, "M", 256, 256, 256, 256, "M",
              512, 512, 512, 512, "M", 512, 512, 512, 512, "M"],
}

_VMEM_LIMIT_BYTES = 48 * 1024 * 1024   # leaves headroom below v7x's 64 MiB


def _largest_tile(n, cap):
    t = min(n, cap)
    while n % t:
        t -= 1
    return t


def _pick_row_block(h):
    """Largest even row-block size <= 32 that divides h."""
    t = min(h, 32)
    while h % t or t % 2:
        t -= 1
        if t == 0:
            return h
    return t


def _conv_tco_cap():
    """Output-channel tile cap: 128 on v5e's 128-wide MXU, 256 on v6e/v7x."""
    try:
        kind = jax.devices()[0].device_kind.lower()
    except Exception:
        return 256
    return 128 if "v5" in kind else 256


# ---------------------------------------------------------------------------
# Shared conv epilogue: + folded BN shift, ReLU, optional fused MaxPool2x2.
# ---------------------------------------------------------------------------
def _conv_epilogue(y, shift, o_ref, pool):
    th, w_out, tco = y.shape
    y = jnp.maximum(y + shift, 0.0)
    if pool:
        y = y.reshape(th // 2, 2, w_out // 2, 2, tco)
        y = jnp.maximum(jnp.maximum(y[:, 0, :, 0], y[:, 0, :, 1]),
                        jnp.maximum(y[:, 1, :, 0], y[:, 1, :, 1]))
    o_ref[0] = y.astype(o_ref.dtype)


# ---------------------------------------------------------------------------
# Generic Conv3x3 (stride 1, pad 1) + folded BN + ReLU (+ fused MaxPool2x2).
# One 9-tap patch build + a single MXU matmul with K = 9*Cin per grid step.
# ---------------------------------------------------------------------------
def _conv3x3_kernel(xm_ref, xh_ref, w_ref, shift_ref, o_ref, *, pool):
    # xm_ref:    (1, th, W+2, Cin)   main padded row slab for this block
    # xh_ref:    (1, 2,  W+2, Cin)   2-row halo slab directly below it
    # w_ref:     (9*Cin, tco)        (dy, dx, cin)-ordered, BN scale pre-folded
    # shift_ref: (1, tco)            folded BN shift (+ conv bias), f32
    # o_ref:     (1, th[/2], W[/2], tco)
    th = xm_ref.shape[1]
    wp, cin = xm_ref.shape[2], xm_ref.shape[3]
    w_out = wp - 2

    rows = jnp.concatenate([xm_ref[0], xh_ref[0]], axis=0)          # (th+2, W+2, Cin)
    # Build the full 9-tap patch once (no per-dy rebuild, no accumulator RMW).
    patch = jnp.concatenate(
        [rows[dy:dy + th, dx:dx + w_out, :] for dy in range(3) for dx in range(3)],
        axis=-1)                                                    # (th, W, 9*Cin)
    y = jnp.dot(patch.reshape(th * w_out, 9 * cin), w_ref[...],
                preferred_element_type=jnp.float32)
    _conv_epilogue(y.reshape(th, w_out, -1), shift_ref[0], o_ref, pool)


def conv3x3_bn_relu_pool(x_nhwc, w, shift, *, pool):
    n, h, w_in, cin = x_nhwc.shape
    cout = w.shape[-1]
    assert w.shape == (9 * cin, cout)
    assert h % 2 == 0 and w_in % 2 == 0, "VGG conv layers require even H, W"

    # TODO(synk): replace this XLA-side pad with an element-offset halo
    #             BlockSpec / manual DMA on the unpadded tensor to save the
    #             extra HBM round-trip on the large-spatial layers.
    xp = jnp.pad(x_nhwc, ((0, 0), (1, 1), (1, 1), (0, 0)))
    wp = w_in + 2

    tco = min(cout, _conv_tco_cap())
    assert cout % tco == 0
    th = _pick_row_block(h)
    nrb = h // th
    if pool:
        ho, wo, tho = h // 2, w_in // 2, th // 2
    else:
        ho, wo, tho = h, w_in, th
    halo_base = th // 2                # halo row offset in units of 2-row blocks

    # cout-tile axis outermost: the weight block index is constant across the
    # inner (batch, row-block) loop, so the weight tile stays resident.
    grid = (cout // tco, n, nrb)

    return pl.pallas_call(
        functools.partial(_conv3x3_kernel, pool=pool),
        out_shape=jax.ShapeDtypeStruct((n, ho, wo, cout), jnp.bfloat16),
        grid_spec=pltpu.PrefetchScalarGridSpec(
            num_scalar_prefetch=0,
            grid=grid,
            in_specs=[
                # main th-row slab of the padded image
                pl.BlockSpec((1, th, wp, cin), lambda c, b, r: (b, r, 0, 0)),
                # 2-row halo slab just below it (same padded array, 2-row blocks)
                pl.BlockSpec((1, 2, wp, cin),
                             lambda c, b, r: (b, (r + 1) * halo_base, 0, 0)),
                pl.BlockSpec((9 * cin, tco), lambda c, b, r: (0, c)),
                pl.BlockSpec((1, tco), lambda c, b, r: (0, c)),
            ],
            out_specs=pl.BlockSpec((1, tho, wo, tco), lambda c, b, r: (b, r, 0, c)),
        ),
        compiler_params=pltpu.CompilerParams(
            dimension_semantics=("parallel", "parallel", "parallel"),
            vmem_limit_bytes=_VMEM_LIMIT_BYTES),
    )(xp, xp, w, shift)


# ---------------------------------------------------------------------------
# First-layer (Cin=3) path: wrapper-side im2col to K=27 patches, then a plain
# matmul kernel (+ BN shift + ReLU + optional fused pool).
# ---------------------------------------------------------------------------
def _conv_im2col_kernel(x_ref, w_ref, shift_ref, o_ref, *, pool):
    # x_ref: (1, th, W, K)   pre-gathered 3x3 patches (K = 9*Cin)
    th, w_out, k = x_ref.shape[1], x_ref.shape[2], x_ref.shape[3]
    y = jnp.dot(x_ref[0].reshape(th * w_out, k), w_ref[...],
                preferred_element_type=jnp.float32)
    _conv_epilogue(y.reshape(th, w_out, -1), shift_ref[0], o_ref, pool)


def _im2col_patches(x_nhwc):
    n, h, w, c = x_nhwc.shape
    xp = jnp.pad(x_nhwc, ((0, 0), (1, 1), (1, 1), (0, 0)))
    # (dy, dx, cin) tap order — matches the (3,3,cin,cout)->(9*cin,cout) reshape.
    return jnp.concatenate(
        [xp[:, dy:dy + h, dx:dx + w, :] for dy in range(3) for dx in range(3)],
        axis=-1)                                                    # (n, h, w, 9c)


def conv_im2col_bn_relu_pool(patches, w, shift, *, pool):
    n, h, w_in, k = patches.shape
    cout = w.shape[-1]
    assert w.shape == (k, cout)
    assert h % 2 == 0 and w_in % 2 == 0

    tco = min(cout, _conv_tco_cap())
    assert cout % tco == 0
    th = _pick_row_block(h)
    nrb = h // th
    if pool:
        ho, wo, tho = h // 2, w_in // 2, th // 2
    else:
        ho, wo, tho = h, w_in, th

    grid = (cout // tco, n, nrb)

    return pl.pallas_call(
        functools.partial(_conv_im2col_kernel, pool=pool),
        out_shape=jax.ShapeDtypeStruct((n, ho, wo, cout), jnp.bfloat16),
        grid_spec=pltpu.PrefetchScalarGridSpec(
            num_scalar_prefetch=0,
            grid=grid,
            in_specs=[
                pl.BlockSpec((1, th, w_in, k), lambda c, b, r: (b, r, 0, 0)),
                pl.BlockSpec((k, tco), lambda c, b, r: (0, c)),
                pl.BlockSpec((1, tco), lambda c, b, r: (0, c)),
            ],
            out_specs=pl.BlockSpec((1, tho, wo, tco), lambda c, b, r: (b, r, 0, c)),
        ),
        compiler_params=pltpu.CompilerParams(
            dimension_semantics=("parallel", "parallel", "parallel"),
            vmem_limit_bytes=_VMEM_LIMIT_BYTES),
    )(patches, w, shift)


# ---------------------------------------------------------------------------
# Standalone MaxPool2d(2, 2) — only used if an 'M' is not preceded by a conv
# (never happens for the standard VGG configs; the pool is normally fused).
# ---------------------------------------------------------------------------
def _maxpool_kernel(x_ref, o_ref):
    _, h, w, c = x_ref.shape
    y = x_ref[0].reshape(h // 2, 2, w // 2, 2, c)
    o_ref[0] = jnp.maximum(jnp.maximum(y[:, 0, :, 0], y[:, 0, :, 1]),
                           jnp.maximum(y[:, 1, :, 0], y[:, 1, :, 1]))


def maxpool2x2(x_nhwc):
    n, h, w, c = x_nhwc.shape
    return pl.pallas_call(
        _maxpool_kernel,
        out_shape=jax.ShapeDtypeStruct((n, h // 2, w // 2, c), x_nhwc.dtype),
        grid=(n,),
        in_specs=[pl.BlockSpec((1, h, w, c), lambda b: (b, 0, 0, 0))],
        out_specs=pl.BlockSpec((1, h // 2, w // 2, c), lambda b: (b, 0, 0, 0)),
        compiler_params=pltpu.CompilerParams(dimension_semantics=("parallel",)),
    )(x_nhwc)


# ---------------------------------------------------------------------------
# Linear (+ bias, optional ReLU) as a K-reduction tiled matmul (bf16 weights).
# ---------------------------------------------------------------------------
def _linear_kernel(x_ref, w_ref, b_ref, o_ref, acc_ref, *, apply_relu):
    k = pl.program_id(1)

    @pl.when(k == 0)
    def _():
        acc_ref[...] = jnp.zeros_like(acc_ref)

    acc_ref[...] += jnp.dot(x_ref[...], w_ref[...],
                            preferred_element_type=jnp.float32)

    @pl.when(k == pl.num_programs(1) - 1)
    def _():
        y = acc_ref[...] + b_ref[...]
        if apply_relu:
            y = jnp.maximum(y, 0.0)
        o_ref[...] = y.astype(o_ref.dtype)


def linear(x, w, b, *, relu, out_dtype):
    m, k_dim = x.shape
    _, n_out = w.shape
    tk = _largest_tile(k_dim, 4096)
    tn = _largest_tile(n_out, 2048)
    grid = (n_out // tn, k_dim // tk)

    # 3-deep weight-stream buffering only when it stays comfortably inside the
    # per-call VMEM budget on every generation (incl. v7x's 64 MiB).
    w_tile_bytes = tk * tn * 2
    if hasattr(pl, "Buffered") and 3 * w_tile_bytes <= 27 * 1024 * 1024:
        w_spec = pl.BlockSpec((tk, tn), lambda j, k: (k, j),
                              pipeline_mode=pl.Buffered(3))
    else:
        w_spec = pl.BlockSpec((tk, tn), lambda j, k: (k, j))

    return pl.pallas_call(
        functools.partial(_linear_kernel, apply_relu=relu),
        out_shape=jax.ShapeDtypeStruct((m, n_out), out_dtype),
        grid_spec=pltpu.PrefetchScalarGridSpec(
            num_scalar_prefetch=0,
            grid=grid,
            in_specs=[
                pl.BlockSpec((m, tk), lambda j, k: (0, k)),
                w_spec,
                pl.BlockSpec((1, tn), lambda j, k: (0, j)),
            ],
            out_specs=pl.BlockSpec((m, tn), lambda j, k: (0, j)),
            scratch_shapes=[pltpu.VMEM((m, tn), jnp.float32)],
        ),
        compiler_params=pltpu.CompilerParams(
            dimension_semantics=("parallel", "arbitrary"),
            vmem_limit_bytes=_VMEM_LIMIT_BYTES),
    )(x, w, b)


# ---------------------------------------------------------------------------
# Parameter construction (deterministic, synthetic) and full forward pass.
# ---------------------------------------------------------------------------
def init_vgg_params(key, in_channels, height, width, num_classes, architecture):
    cfg = VGG_types[architecture]
    pool_count = cfg.count("M")
    factor = 2 ** pool_count
    if height % factor + width % factor != 0:
        raise ValueError(f"height/width must be multiples of {factor}")

    eps = 1e-5
    params = {"conv": [], "fc": []}
    cin, h, w = in_channels, height, width
    first_conv = True
    for item in cfg:
        if item == "M":
            params["conv"].append("M")
            h //= 2
            w //= 2
            continue
        cout = item
        key, k1, k2 = jax.random.split(key, 3)
        fan_in = cin * 9
        w_conv = jax.random.normal(k1, (3, 3, cin, cout), jnp.float32) / np.sqrt(fan_in)
        b_conv = jax.random.normal(k2, (cout,), jnp.float32) * 0.01
        # BatchNorm2d defaults: gamma=1, beta=0, running_mean=0, running_var=1.
        gamma = jnp.ones((cout,), jnp.float32)
        beta = jnp.zeros((cout,), jnp.float32)
        rmean = jnp.zeros((cout,), jnp.float32)
        rvar = jnp.ones((cout,), jnp.float32)
        scale = gamma / jnp.sqrt(rvar + eps)
        shift = beta + (b_conv - rmean) * scale
        # Fold BN scale into the conv weights; (3,3,Cin,Cout)->(9*Cin,Cout) in
        # (dy, dx, cin) order, matching both the in-kernel 9-tap patch build
        # and the wrapper-side im2col for the first layer.
        w_folded = (w_conv * scale[None, None, None, :]).reshape(9 * cin, cout)
        params["conv"].append({
            "w": w_folded.astype(jnp.bfloat16),
            "shift": shift.reshape(1, cout).astype(jnp.float32),
            "im2col": first_conv,          # Cin=3 first layer uses the im2col path
        })
        first_conv = False
        cin = cout

    flat_dim = cin * h * w
    dims = [flat_dim, 4096, 4096, num_classes]
    # nn.Flatten on NCHW vs. our NHWC flatten: fold the permutation into FC1 rows.
    idx = np.arange(flat_dim).reshape(cin, h, w)      # NCHW flat index at (c, y, x)
    perm = idx.transpose(1, 2, 0).reshape(-1)         # NHWC order -> NCHW row index
    for i in range(3):
        key, k1, k2 = jax.random.split(key, 3)
        w_fc = jax.random.normal(k1, (dims[i], dims[i + 1]), jnp.float32) / np.sqrt(dims[i])
        b_fc = jax.random.normal(k2, (1, dims[i + 1]), jnp.float32) * 0.01
        if i == 0:
            w_fc = w_fc[perm, :]     # consume NHWC-flattened features directly
        params["fc"].append({"w": w_fc.astype(jnp.bfloat16), "b": b_fc})
    return params


def vgg_forward(x_nchw, params):
    # Convert to NHWC + bf16 for the TPU kernels.
    h = jnp.transpose(x_nchw, (0, 2, 3, 1)).astype(jnp.bfloat16)
    conv_cfg = params["conv"]
    i = 0
    while i < len(conv_cfg):
        layer = conv_cfg[i]
        if layer == "M":
            h = maxpool2x2(h)      # fallback; pools are normally fused below
            i += 1
            continue
        fuse_pool = (i + 1 < len(conv_cfg)) and conv_cfg[i + 1] == "M"
        if layer["im2col"]:
            patches = _im2col_patches(h)
            h = conv_im2col_bn_relu_pool(patches, layer["w"], layer["shift"],
                                         pool=fuse_pool)
        else:
            h = conv3x3_bn_relu_pool(h, layer["w"], layer["shift"], pool=fuse_pool)
        i += 2 if fuse_pool else 1

    n = h.shape[0]
    h = h.reshape(n, -1)           # NHWC flatten; FC1 rows pre-permuted to match NCHW
    fc = params["fc"]
    h = linear(h, fc[0]["w"], fc[0]["b"], relu=True, out_dtype=jnp.bfloat16)   # +Dropout=id
    h = linear(h, fc[1]["w"], fc[1]["b"], relu=True, out_dtype=jnp.bfloat16)   # +Dropout=id
    h = linear(h, fc[2]["w"], fc[2]["b"], relu=False, out_dtype=jnp.float32)   # final Linear
    return h


if __name__ == "__main__":
    key = jax.random.PRNGKey(0)
    kx, kp = jax.random.split(key)

    # Small but architecture-consistent shapes: VGG11 needs H, W multiples of 32.
    N, C, H, W = 2, 3, 32, 32
    NUM_CLASSES = 10

    x = jax.random.normal(kx, (N, C, H, W), jnp.float32)
    params = init_vgg_params(kp, in_channels=C, height=H, width=W,
                             num_classes=NUM_CLASSES, architecture="VGG11")

    out = vgg_forward(x, params)
    out = jax.block_until_ready(out)

    assert out.shape == (N, NUM_CLASSES), out.shape
    assert bool(jnp.all(jnp.isfinite(out)))
    print("KERNEL_OK")
</pallas_src>

<mosaic_0001>
module attributes {stable_mosaic.version = 11 : i64} {
  func.func @_conv_im2col_kernel(%arg0: i32, %arg1: i32, %arg2: i32, %arg3: memref<1x32x32x27xbf16, #tpu.memory_space<vmem>>, %arg4: memref<27x64xbf16, #tpu.memory_space<vmem>>, %arg5: memref<1x64xf32, #tpu.memory_space<vmem>>, %arg6: memref<1x16x16x64xbf16, #tpu.memory_space<vmem>>) attributes {dimension_semantics = [#tpu.dimension_semantics<parallel>, #tpu.dimension_semantics<parallel>, #tpu.dimension_semantics<parallel>], iteration_bounds = array<i64: 1, 2, 1>, scalar_prefetch = 0 : i64, scratch_operands = 0 : i64, tpu.core_type = #tpu.core_type<tc>, window_params = [{transform_indices = @transform_0, window_bounds = array<i64: 1, 32, 32, 27>}, {transform_indices = @transform_1, window_bounds = array<i64: 27, 64>}, {transform_indices = @transform_2, window_bounds = array<i64: 1, 64>}, {transform_indices = @transform_3, window_bounds = array<i64: 1, 16, 16, 64>}]} {
    %c0 = arith.constant 0 : index
    %c0_0 = arith.constant 0 : index
    %c0_1 = arith.constant 0 : index
    %c0_2 = arith.constant 0 : index
    %0 = vector.load %arg3[%c0, %c0_0, %c0_1, %c0_2] : memref<1x32x32x27xbf16, #tpu.memory_space<vmem>>, vector<1x32x32x27xbf16>
    %1 = vector.shape_cast %0 : vector<1x32x32x27xbf16> to vector<32x32x27xbf16>
    %2 = vector.shape_cast %1 : vector<32x32x27xbf16> to vector<1024x27xbf16>
    %c0_3 = arith.constant 0 : index
    %c0_4 = arith.constant 0 : index
    %3 = vector.load %arg4[%c0_3, %c0_4] : memref<27x64xbf16, #tpu.memory_space<vmem>>, vector<27x64xbf16>
    %cst = arith.constant dense<0.000000e+00> : vector<1024x64xf32>
    %4 = tpu.matmul %2, %3, %cst {dimension_numbers = #tpu.dot_dimension_numbers<[1], [0], [0], [1], [0, 0, 1, 1], [], []>} : vector<1024x27xbf16>, vector<27x64xbf16>, vector<1024x64xf32> -> vector<1024x64xf32>
    %5 = vector.shape_cast %4 : vector<1024x64xf32> to vector<32x32x64xf32>
    %c0_5 = arith.constant 0 : index
    %c0_6 = arith.constant 0 : index
    %6 = vector.load %arg5[%c0_5, %c0_6] : memref<1x64xf32, #tpu.memory_space<vmem>>, vector<1x64xf32>
    %7 = vector.shape_cast %6 : vector<1x64xf32> to vector<64xf32>
    %8 = vector.shape_cast %7 : vector<64xf32> to vector<1x1x64xf32>
    %9 = vector.broadcast %8 : vector<1x1x64xf32> to vector<32x32x64xf32>
    %10 = arith.addf %5, %9 : vector<32x32x64xf32>
    %cst_7 = arith.constant 0.000000e+00 : f32
    %11 = vector.broadcast %cst_7 : f32 to vector<32x32x64xf32>
    %12 = arith.maximumf %10, %11 : vector<32x32x64xf32>
    %13 = vector.shape_cast %12 : vector<32x32x64xf32> to vector<16x2x16x2x64xf32>
    %14 = vector.extract_strided_slice %13 {offsets = [0, 0, 0, 0, 0], sizes = [16, 1, 16, 1, 64], strides = [1, 1, 1, 1, 1]} : vector<16x2x16x2x64xf32> to vector<16x1x16x1x64xf32>
    %15 = vector.shape_cast %14 : vector<16x1x16x1x64xf32> to vector<16x16x64xf32>
    %16 = vector.extract_strided_slice %13 {offsets = [0, 0, 0, 1, 0], sizes = [16, 1, 16, 1, 64], strides = [1, 1, 1, 1, 1]} : vector<16x2x16x2x64xf32> to vector<16x1x16x1x64xf32>
    %17 = vector.shape_cast %16 : vector<16x1x16x1x64xf32> to vector<16x16x64xf32>
    %18 = arith.maximumf %15, %17 : vector<16x16x64xf32>
    %19 = vector.extract_strided_slice %13 {offsets = [0, 1, 0, 0, 0], sizes = [16, 1, 16, 1, 64], strides = [1, 1, 1, 1, 1]} : vector<16x2x16x2x64xf32> to vector<16x1x16x1x64xf32>
    %20 = vector.shape_cast %19 : vector<16x1x16x1x64xf32> to vector<16x16x64xf32>
    %21 = vector.extract_strided_slice %13 {offsets = [0, 1, 0, 1, 0], sizes = [16, 1, 16, 1, 64], strides = [1, 1, 1, 1, 1]} : vector<16x2x16x2x64xf32> to vector<16x1x16x1x64xf32>
    %22 = vector.shape_cast %21 : vector<16x1x16x1x64xf32> to vector<16x16x64xf32>
    %23 = arith.maximumf %20, %22 : vector<16x16x64xf32>
    %24 = arith.maximumf %18, %23 : vector<16x16x64xf32>
    %25 = arith.truncf %24 : vector<16x16x64xf32> to vector<16x16x64xbf16>
    %c0_8 = arith.constant 0 : index
    %c0_9 = arith.constant 0 : index
    %c0_10 = arith.constant 0 : index
    %c0_11 = arith.constant 0 : index
    %26 = vector.load %arg6[%c0_8, %c0_9, %c0_10, %c0_11] : memref<1x16x16x64xbf16, #tpu.memory_space<vmem>>, vector<1x16x16x64xbf16>
    %27 = vector.shape_cast %26 : vector<1x16x16x64xbf16> to vector<16x16x64xbf16>
    %28 = vector.shape_cast %25 : vector<16x16x64xbf16> to vector<1x16x16x64xbf16>
    tpu.vector_store %arg6[%c0_8, %c0_9, %c0_10, %c0_11], %28 {strides = array<i32>} : memref<1x16x16x64xbf16, #tpu.memory_space<vmem>>, vector<1x16x16x64xbf16>,
    return
  }
  func.func @transform_0(%arg0: i32, %arg1: i32, %arg2: i32) -> (i32, i32, i32, i32) {
    %c0_i32 = arith.constant 0 : i32
    %c0_i32_0 = arith.constant 0 : i32
    %c0_i32_1 = arith.constant 0 : i32
    return %arg1, %arg2, %c0_i32, %c0_i32_0 : i32, i32, i32, i32
  }
  func.func @transform_1(%arg0: i32, %arg1: i32, %arg2: i32) -> (i32, i32) {
    %c0_i32 = arith.constant 0 : i32
    %c0_i32_0 = arith.constant 0 : i32
    return %c0_i32, %arg0 : i32, i32
  }
  func.func @transform_2(%arg0: i32, %arg1: i32, %arg2: i32) -> (i32, i32) {
    %c0_i32 = arith.constant 0 : i32
    %c0_i32_0 = arith.constant 0 : i32
    return %c0_i32, %arg0 : i32, i32
  }
  func.func @transform_3(%arg0: i32, %arg1: i32, %arg2: i32) -> (i32, i32, i32, i32) {
    %c0_i32 = arith.constant 0 : i32
    %c0_i32_0 = arith.constant 0 : i32
    return %arg1, %arg2, %c0_i32, %arg0 : i32, i32, i32, i32
  }
}

</mosaic_0001>

<bundles_post_ra>
// kernel: tpu_custom_call.1
= control target key start
LH: loop header
LB: loop body
LE: loop exit
PB: predicated region body
PF: predicated region fallthrough
CT: control target
= control target key end

     0   :  { %8 = vsyncpa [#allocation3], 0  ;;  %s12820_s0 = inlined_call_operand.vmem [shape: bf16[2,32,32,27], index: 0, kind: input, shape index: {}]   ;;  %s12821_s1 = inlined_call_operand.vmem [shape: bf16[27,64], index: 1, kind: input, shape index: {}]   ;;  %s12822_s2 = inlined_call_operand.vmem [shape: f32[1,64], index: 2, kind: input, shape index: {}]   ;;  %s12823_s3 = inlined_call_operand.hbm [shape: bf16[2,16,16,64], index: 3, kind: output, shape index: {}]  }
   0x1   :  { %10 = vsyncpa [#allocation3 + $0x1], 0  ;;  %s10408_s12 = smov 0   ;;  %s10410_s13 = smov 0  }
   0x2   :  { %s10412_s14 = smov 0   ;;  %s10414_s15 = smov 0  }
   0x3   :  { %s10416_s16 = smov 0   ;;  %s10418_s17 = smov 0  }
   0x4 LB: > { %s8798_s18 = sadd.s32 4294967295, %s10381_s17   ;;  %s8799_s19 = sadd.s32 4294967294, %s10381_s17   ;;  %s10381_s17 = sphi %s10418_s17, %s16_s17   ;;  %s10377_s16 = sphi %s10416_s16, %s13023_s16   ;;  %s10373_s15 = sphi %s10414_s15, %s13022_s15   ;;  %s10369_s14 = sphi %s10412_s14, %s13021_s14   ;;  %s10365_s13 = sphi %s10410_s13, %s13020_s13   ;;  %s10361_s12 = sphi %s10408_s12, %s13019_s12  }
   0x5   : > { %s31_s20 = sadd.s32 1, %s10377_s16  ;;  %s126_s21 = sadd.s32 1, %s10369_s14 }
   0x6   : > { %p33_p0 = scmp.ge.s32.totalorder %s31_s20, 2  ;;  %p136_p1 = scmp.ne.s32.totalorder %s10369_s14, %s10365_s13 }
   0x7   : > { %p137_p2 = scmp.eq.s32.totalorder %s8798_s18, 1  ;;  %p142_p3 = scmp.ne.s32.totalorder %s10365_s13, %s10361_s12 }
   0x8   : > { %s13025_s20 = smov (%p33_p0, %s31_s20), 0  ;;  %p143_p5 = scmp.eq.s32.totalorder %s8799_s19, 1 }
   0x9   : > { %p10448_p4 = por %p137_p2, %p136_p1  ;;  %s119_s23 = ssub.s32 %s10377_s16, %s13025_s20 }
   0xa   : > { %p8804_p6 = scmp.ge.s32.totalorder %s10381_s17, 1  ;;  %p124_p7 = scmp.eq.s32.totalorder %s119_s23, 0 }
   0xb   : > { %p10455_p8 = por %p143_p5, %p142_p3  ;;  %p188_p9 = scmp.lt.s32.totalorder %s10381_s17, 3 }
   0xc   : > { %s10461_s25 = scalar_select %p124_p7, %s10369_s14, %s126_s21  }
   0xd   : > { %p189_p10 = pnand %p8804_p6, %p188_p9 }
   0xf   : > { %192 = sbr.rel (%p189_p10) target bundleno = 1061 (0x425), region = 32 }
  0x16   : > { %v10231_v0 = vld [vmem:[%s12821_s1] sm:$0xff]   ;;  %vm900_vm0 = vcmask 1044480   ;;  %v10232_v1 = vld [vmem:[%s12821_s1 + $0x8] sm:$0x3f]   ;;  %vm901_vm1 = vcmask 1045504   ;;  %p225_p11 = scmp.lt.s32.totalorder %s10373_s15, 1 }
  0x17   : > { %10036 = vmatprep.subr.bf16.mxu0 %v10231_v0  ;;  %10168 = vmatprep.subr.bf16.mxu1 %v10231_v0  ;;  %v10383_v2 = vmov 65535   ;;  %vm707_vm2 = vcmask 220160   ;;  %vm8116_vm3 = vcmask 1041409   ;;  %vm8119_vm4 = vcmask 1042434   ;;  %s221_s10 = sand.u32 1, %s10365_s13   ;;  %s9969_s8 = sshll.u32 %s10373_s15, 11 }
  0x18   : > { %10037 = vmatpush3.bf16.msra.mxu0 %v10231_v0  ;;  %10170 = vmatpush3.bf16.msra.mxu1 %v10231_v0  ;;  %v902_v3 = vsel %vm900_vm0, 4294967295, %v10383_v2  ;;  %s226_s30 = scalar_select %p225_p11, %s10373_s15, 1  ;;  %vm8122_vm5 = vcmask 1043459   ;;  %vm8125_vm6 = vcmask 1044484   ;;  %vm8128_vm7 = vcmask 1045509  }
  0x19   : > { %v903_v4 = vsel %vm901_vm1, %v902_v3, 0  ;;  %vm8131_vm8 = vcmask 1046534   ;;  %vm8134_vm9 = vcmask 1047559   ;;  %vm8634_vm10 = vcmask 519168   ;;  %s8805_s11 = sshll.u32 %s221_s10, 7  ;;  %s12766_s21 = scalar_lea.hbm %s12823_s3, %s9969_s8 }
  0x1a   : > { %v905_v5 = vand.u32 %v10232_v1, %v903_v4  ;;  %s9712_s4 = sshll.u32 %s226_s30, 9  ;;  %s10873_s18 = scalar_lea.vmem [#allocation2], %s8805_s11 }
  0x1b   : > { %s10474_s7 = scalar_lea.vmem %s12820_s0, %s9712_s4  ;;  %s8685_s9 = sshll.u32 %s10873_s18, 4  ;;  %s12768_s9 = int_to_ptr.vmem [resolvable:$true] %s8685_s9 }
  0x1c   : > { %10038 = vmatprep.subr.bf16.mxu0 %v905_v5  ;;  %10169 = vmatprep.subr.bf16.mxu1 %v905_v5  ;;  %v10233_v6 = vld [vmem:[%s10474_s7] sm:$0xff]   ;;  %v10235_v8 = vld [vmem:[%s10474_s7 + $0x8] sm:$0xff]   ;;  %v10237_v10 = vld [vmem:[%s10474_s7 + $0x10] sm:$0xff]   ;;  %s12774_s15 = scalar_lea.sflag [#allocation3], %s221_s10  ;;  %s10303_s23 = scalar_lea.vmem %s12768_s9, 2048 }
  0x1d   : > { %10039 = vmatpush3.bf16.msra.mxu0 %v905_v5  ;;  %10171 = vmatpush3.bf16.msra.mxu1 %v905_v5  ;;  %v10234_v7 = vld [vmem:[%s10474_s7 + $0x100] sm:$0xff]   ;;  %v10236_v9 = vld [vmem:[%s10474_s7 + $0x108] sm:$0xff]   ;;  %v10238_v11 = vld [vmem:[%s10474_s7 + $0x110] sm:$0xff]   ;;  %p10304_p12 = scmp.ne.s32.totalorder %s12768_s9, %s10303_s23  ;;  %s10385_s26 = smov [#allocation2]  }
  0x1e   : > { %10040 = vmatprep.mubr.msk.bf16.mxu0 %vm707_vm2, %v10233_v6  ;;  %10104 = vmatprep.mubr.msk.bf16.mxu1 %vm707_vm2, %v10234_v7  ;;  %v10239_v12 = vld [vmem:[%s10474_s7 + $0x18] sm:$0xff]   ;;  %v10241_v14 = vld [vmem:[%s10474_s7 + $0x20] sm:$0xff]   ;;  %v10243_v16 = vld [vmem:[%s10474_s7 + $0x28] sm:$0xff]   ;;  %v10384_v6 = vmov 1983009808   ;;  %s10307_s27 = sshll.u32 %s10385_s26, 4  ;;  %s10308_s27 = int_to_ptr.vmem [resolvable:$false] %s10307_s27 }
  0x1f   : > { %v10240_v13 = vld [vmem:[%s10474_s7 + $0x118] sm:$0xff]   ;;  %v10242_v15 = vld [vmem:[%s10474_s7 + $0x120] sm:$0xff]   ;;  %v10244_v17 = vld [vmem:[%s10474_s7 + $0x128] sm:$0xff]   ;;  %v1845_v7 = vunpack.c.l.s4 %v10384_v6  ;;  %p10305_p13 = pnand %p10304_p12, %p10448_p4  ;;  %s10309_s28 = scalar_lea.vmem %s10308_s27, 4096 }
  0x20   : > { %10041 = vmatmul.mubr.msk.bf16.vlgmr.msra.gmra.mrb[0].mxu0 %vm707_vm2, %v10235_v8  ;;  %10105 = vmatmul.mubr.msk.bf16.vlgmr.msra.gmra.mrb[0].mxu1 %vm707_vm2, %v10236_v9  ;;  %v10245_v18 = vld [vmem:[%s10474_s7 + $0x30] sm:$0xff]   ;;  %v10247_v20 = vld [vmem:[%s10474_s7 + $0x38] sm:$0xff]   ;;  %v10249_v22 = vld [vmem:[%s10474_s7 + $0x40] sm:$0xff]   ;;  %v1847_v8 = vlaneseq  ;;  %p10310_p1 = scmp.lt.s32.totalorder %s12768_s9, %s10308_s27  ;;  %p10311_p2 = scmp.lt.s32.totalorder %s10309_s28, %s10303_s23 }
  0x21   : > { %10044 = vmatprep.mubr.msk.bf16.mxu0 %vm707_vm2, %v10237_v10  ;;  %10108 = vmatprep.mubr.msk.bf16.mxu1 %vm707_vm2, %v10238_v11  ;;  %v10246_v19 = vld [vmem:[%s10474_s7 + $0x130] sm:$0xff]   ;;  %v10248_v21 = vld [vmem:[%s10474_s7 + $0x138] sm:$0xff]   ;;  %v10250_v23 = vld [vmem:[%s10474_s7 + $0x140] sm:$0xff]   ;;  %v1846_v9 = vunpack.c.0.s8 %v1845_v7  ;;  %p10306_p0 = pneg %p10305_p13 }
  0x22   : > { %v10251_v24 = vld [vmem:[%s10474_s7 + $0x48] sm:$0xff]   ;;  %v10253_v26 = vld [vmem:[%s10474_s7 + $0x50] sm:$0xff]   ;;  %v10255_v28 = vld [vmem:[%s10474_s7 + $0x58] sm:$0xff]   ;;  %v1848_v10 = vshrl.u32 %v1847_v8, 7  ;;  %p10312_p3 = por %p10311_p2, %p10310_p1 }
  0x23   : > { %v10252_v25 = vld [vmem:[%s10474_s7 + $0x148] sm:$0xff]   ;;  %v10254_v27 = vld [vmem:[%s10474_s7 + $0x150] sm:$0xff]   ;;  %v10256_v29 = vld [vmem:[%s10474_s7 + $0x158] sm:$0xff]  }
  0x24   : > { %v10257_v30 = vld [vmem:[%s10474_s7 + $0x60] sm:$0xff]   ;;  %v10259_v32 = vld [vmem:[%s10474_s7 + $0x68] sm:$0xff]   ;;  %v10261_v34 = vld [vmem:[%s10474_s7 + $0x70] sm:$0xff]   ;;  %p10313_p5 = pnand %p10312_p3, %p10306_p0 }
  0x25   : > { %v10258_v31 = vld [vmem:[%s10474_s7 + $0x160] sm:$0xff]   ;;  %v10260_v33 = vld [vmem:[%s10474_s7 + $0x168] sm:$0xff]   ;;  %v10262_v35 = vld [vmem:[%s10474_s7 + $0x170] sm:$0xff]  }
  0x26   : > { %v10263_v36 = vld [vmem:[%s10474_s7 + $0x78] sm:$0xff]   ;;  %v10265_v38 = vld [vmem:[%s10474_s7 + $0x80] sm:$0xff]   ;;  %v10267_v40 = vld [vmem:[%s10474_s7 + $0x88] sm:$0xff]  }
  0x27   : > { %v10264_v37 = vld [vmem:[%s10474_s7 + $0x178] sm:$0xff]   ;;  %v10266_v39 = vld [vmem:[%s10474_s7 + $0x180] sm:$0xff]   ;;  %v10268_v41 = vld [vmem:[%s10474_s7 + $0x188] sm:$0xff]  }
  0x28   : > { %10045 = vmatmul.mubr.msk.bf16.gmra.mrb[4].mxu0 %vm707_vm2, %v10239_v12  ;;  %10109 = vmatmul.mubr.msk.bf16.gmra.mrb[4].mxu1 %vm707_vm2, %v10240_v13  ;;  %v10269_v42 = vld [vmem:[%s10474_s7 + $0x90] sm:$0xff]   ;;  %v10271_v44 = vld [vmem:[%s10474_s7 + $0x98] sm:$0xff]   ;;  %v10273_v46 = vld [vmem:[%s10474_s7 + $0xa0] sm:$0xff]  }
  0x29   : > { %10048 = vmatprep.mubr.msk.bf16.mxu0 %vm707_vm2, %v10241_v14  ;;  %10112 = vmatprep.mubr.msk.bf16.mxu1 %vm707_vm2, %v10242_v15  ;;  %v10270_v43 = vld [vmem:[%s10474_s7 + $0x190] sm:$0xff]   ;;  %v10272_v45 = vld [vmem:[%s10474_s7 + $0x198] sm:$0xff]   ;;  %v10274_v47 = vld [vmem:[%s10474_s7 + $0x1a0] sm:$0xff]   ;;  %v10610_v14 = vsub.s32 %v1846_v9, %v1848_v10 }
  0x2a   : > { %v10275_v48 = vld [vmem:[%s10474_s7 + $0xa8] sm:$0xff]   ;;  %v10277_v50 = vld [vmem:[%s10474_s7 + $0xb0] sm:$0xff]   ;;  %v10279_v52 = vld [vmem:[%s10474_s7 + $0xb8] sm:$0xff]  }
  0x2b   : > { %v10276_v49 = vld [vmem:[%s10474_s7 + $0x1a8] sm:$0xff]   ;;  %v10278_v51 = vld [vmem:[%s10474_s7 + $0x1b0] sm:$0xff]   ;;  %v10280_v53 = vld [vmem:[%s10474_s7 + $0x1b8] sm:$0xff]  }
  0x2c   : > { %v10281_v54 = vld [vmem:[%s10474_s7 + $0xc0] sm:$0xff]   ;;  %v10283_v56 = vld [vmem:[%s10474_s7 + $0xc8] sm:$0xff]   ;;  %v10285_v58 = vld [vmem:[%s10474_s7 + $0xd0] sm:$0xff]  }
  0x2d   : > { %v10282_v55 = vld [vmem:[%s10474_s7 + $0x1c0] sm:$0xff]   ;;  %v10284_v57 = vld [vmem:[%s10474_s7 + $0x1c8] sm:$0xff]   ;;  %v10286_v59 = vld [vmem:[%s10474_s7 + $0x1d0] sm:$0xff]  }
  0x2e   : > { %v10287_v60 = vld [vmem:[%s10474_s7 + $0xd8] sm:$0xff]   ;;  %v10289_v62 = vld [vmem:[%s10474_s7 + $0xe0] sm:$0xff]   ;;  %v10291_v0 = vld [vmem:[%s10474_s7 + $0xe8] sm:$0xff]  }
  0x2f   : > { %v10288_v61 = vld [vmem:[%s10474_s7 + $0x1d8] sm:$0xff]   ;;  %v10290_v63 = vld [vmem:[%s10474_s7 + $0x1e0] sm:$0xff]   ;;  %v10292_v1 = vld [vmem:[%s10474_s7 + $0x1e8] sm:$0xff]  }
  0x30   : > { %10049 = vmatmul.mubr.msk.bf16.gmra.mrb[8].mxu0 %vm707_vm2, %v10243_v16  ;;  %10113 = vmatmul.mubr.msk.bf16.gmra.mrb[8].mxu1 %vm707_vm2, %v10244_v17  ;;  %v10293_v2 = vld [vmem:[%s10474_s7 + $0xf0] sm:$0xff]   ;;  %v10295_v4 = vld [vmem:[%s10474_s7 + $0xf8] sm:$0xff]   ;;  %v10607_v11 = vld [vmem:[%s12822_s2] ss:$0 sm:$0xff] }
  0x31   : > { %10052 = vmatprep.mubr.msk.bf16.mxu0 %vm707_vm2, %v10245_v18  ;;  %10116 = vmatprep.mubr.msk.bf16.mxu1 %vm707_vm2, %v10246_v19  ;;  %v10294_v3 = vld [vmem:[%s10474_s7 + $0x1f0] sm:$0xff]   ;;  %v10296_v5 = vld [vmem:[%s10474_s7 + $0x1f8] sm:$0xff]  }
  0x38   : > { %10053 = vmatmul.mubr.msk.bf16.gmra.mrb[12].mxu0 %vm707_vm2, %v10247_v20  ;;  %10117 = vmatmul.mubr.msk.bf16.gmra.mrb[12].mxu1 %vm707_vm2, %v10248_v21 }
  0x39   : > { %10056 = vmatprep.mubr.msk.bf16.mxu0 %vm707_vm2, %v10249_v22  ;;  %10120 = vmatprep.mubr.msk.bf16.mxu1 %vm707_vm2, %v10250_v23 }
  0x40   : > { %10057 = vmatmul.mubr.msk.bf16.gmra.mrb[16].mxu0 %vm707_vm2, %v10251_v24  ;;  %10121 = vmatmul.mubr.msk.bf16.gmra.mrb[16].mxu1 %vm707_vm2, %v10252_v25 }
  0x41   : > { %10060 = vmatprep.mubr.msk.bf16.mxu0 %vm707_vm2, %v10253_v26  ;;  %10124 = vmatprep.mubr.msk.bf16.mxu1 %vm707_vm2, %v10254_v27 }
  0x48   : > { %10061 = vmatmul.mubr.msk.bf16.gmra.mrb[20].mxu0 %vm707_vm2, %v10255_v28  ;;  %10125 = vmatmul.mubr.msk.bf16.gmra.mrb[20].mxu1 %vm707_vm2, %v10256_v29 }
  0x49   : > { %10064 = vmatprep.mubr.msk.bf16.mxu0 %vm707_vm2, %v10257_v30  ;;  %10128 = vmatprep.mubr.msk.bf16.mxu1 %vm707_vm2, %v10258_v31 }
  0x50   : > { %10065 = vmatmul.mubr.msk.bf16.gmra.mrb[24].mxu0 %vm707_vm2, %v10259_v32  ;;  %10129 = vmatmul.mubr.msk.bf16.gmra.mrb[24].mxu1 %vm707_vm2, %v10260_v33 }
  0x51   : > { %10068 = vmatprep.mubr.msk.bf16.mxu0 %vm707_vm2, %v10261_v34  ;;  %10132 = vmatprep.mubr.msk.bf16.mxu1 %vm707_vm2, %v10262_v35 }
  0x58   : > { %10069 = vmatmul.mubr.msk.bf16.gmra.mrb[28].mxu0 %vm707_vm2, %v10263_v36  ;;  %10133 = vmatmul.mubr.msk.bf16.gmra.mrb[28].mxu1 %vm707_vm2, %v10264_v37 }
  0x59   : > { %10072 = vmatprep.mubr.msk.bf16.mxu0 %vm707_vm2, %v10265_v38  ;;  %10136 = vmatprep.mubr.msk.bf16.mxu1 %vm707_vm2, %v10266_v39 }
  0x60   : > { %10073 = vmatmul.mubr.msk.bf16.gmra.mrb[32].mxu0 %vm707_vm2, %v10267_v40  ;;  %10137 = vmatmul.mubr.msk.bf16.gmra.mrb[32].mxu1 %vm707_vm2, %v10268_v41 }
  0x61   : > { %10076 = vmatprep.mubr.msk.bf16.mxu0 %vm707_vm2, %v10269_v42  ;;  %10140 = vmatprep.mubr.msk.bf16.mxu1 %vm707_vm2, %v10270_v43 }
  0x68   : > { %10077 = vmatmul.mubr.msk.bf16.gmra.mrb[36].mxu0 %vm707_vm2, %v10271_v44  ;;  %10141 = vmatmul.mubr.msk.bf16.gmra.mrb[36].mxu1 %vm707_vm2, %v10272_v45 }
  0x69   : > { %10080 = vmatprep.mubr.msk.bf16.mxu0 %vm707_vm2, %v10273_v46  ;;  %10144 = vmatprep.mubr.msk.bf16.mxu1 %vm707_vm2, %v10274_v47 }
  0x70   : > { %10081 = vmatmul.mubr.msk.bf16.gmra.mrb[40].mxu0 %vm707_vm2, %v10275_v48  ;;  %10145 = vmatmul.mubr.msk.bf16.gmra.mrb[40].mxu1 %vm707_vm2, %v10276_v49 }
  0x71   : > { %10084 = vmatprep.mubr.msk.bf16.mxu0 %vm707_vm2, %v10277_v50  ;;  %10148 = vmatprep.mubr.msk.bf16.mxu1 %vm707_vm2, %v10278_v51 }
  0x78   : > { %10085 = vmatmul.mubr.msk.bf16.gmra.mrb[44].mxu0 %vm707_vm2, %v10279_v52  ;;  %10149 = vmatmul.mubr.msk.bf16.gmra.mrb[44].mxu1 %vm707_vm2, %v10280_v53 }
  0x79   : > { %10088 = vmatprep.mubr.msk.bf16.mxu0 %vm707_vm2, %v10281_v54  ;;  %10152 = vmatprep.mubr.msk.bf16.mxu1 %vm707_vm2, %v10282_v55 }
  0x80   : > { %10089 = vmatmul.mubr.msk.bf16.gmra.mrb[48].mxu0 %vm707_vm2, %v10283_v56  ;;  %10153 = vmatmul.mubr.msk.bf16.gmra.mrb[48].mxu1 %vm707_vm2, %v10284_v57 }
  0x81   : > { %10092 = vmatprep.mubr.msk.bf16.mxu0 %vm707_vm2, %v10285_v58  ;;  %10156 = vmatprep.mubr.msk.bf16.mxu1 %vm707_vm2, %v10286_v59 }
  0x88   : > { %10093 = vmatmul.mubr.msk.bf16.gmra.mrb[52].mxu0 %vm707_vm2, %v10287_v60  ;;  %10157 = vmatmul.mubr.msk.bf16.gmra.mrb[52].mxu1 %vm707_vm2, %v10288_v61 }
  0x89   : > { %10096 = vmatprep.mubr.msk.bf16.mxu0 %vm707_vm2, %v10289_v62  ;;  %10160 = vmatprep.mubr.msk.bf16.mxu1 %vm707_vm2, %v10290_v63 }
  0x90   : > { %10097 = vmatmul.mubr.msk.bf16.gmra.mrb[56].mxu0 %vm707_vm2, %v10291_v0  ;;  %10161 = vmatmul.mubr.msk.bf16.gmra.mrb[56].mxu1 %vm707_vm2, %v10292_v1 }
  0x91   : > { %10100 = vmatprep.mubr.msk.bf16.mxu0 %vm707_vm2, %v10293_v2  ;;  %10164 = vmatprep.mubr.msk.bf16.mxu1 %vm707_vm2, %v10294_v3 }
  0x98   : > { %10101 = vmatmul.mubr.msk.bf16.gmra.mrb[60].mxu0 %vm707_vm2, %v10295_v4  ;;  %10165 = vmatmul.mubr.msk.bf16.gmra.mrb[60].mxu1 %vm707_vm2, %v10296_v5 }
  0xf3   : > { %v10042_v12 = vpop.f32.mrb[0].mxu0  ;;  %v10106_v15 = vpop.f32.mrb[0].mxu1 }
  0xf4   : > { %v1461_v13 = vadd.f32 %v10042_v12, %v10607_v11  ;;  %v941_v16 = vpop.f32.mrb[1].mxu0  ;;  %v1525_v17 = vadd.f32 %v10106_v15, %v10607_v11  ;;  %v1197_v19 = vpop.f32.mrb[1].mxu1 }
  0xf5   : > { %v1459_v18 = vadd.f32 %v10607_v11, %v941_v16  ;;  %v10043_v20 = vpop.f32.mrb[2].mxu0  ;;  %v1523_v22 = vadd.f32 %v10607_v11, %v1197_v19  ;;  %v10107_v24 = vpop.f32.mrb[2].mxu1 }
  0xf6   : > { %v1589_v21 = vmax.f32 %v1461_v13, 0.0  ;;  %v1462_v23 = vadd.f32 %v10043_v20, %v10607_v11  ;;  %v944_v25 = vpop.f32.mrb[3].mxu0  ;;  %v1653_v26 = vmax.f32 %v1525_v17, 0.0  ;;  %v10617_v28 = vadd.f32 %v10107_v24, %v10607_v11  ;;  %v10622_v30 = vpop.f32.mrb[3].mxu1 }
  0xf7   : > { %v1587_v27 = vmax.f32 %v1459_v18, 0.0  ;;  %v10620_v29 = vadd.f32 %v10607_v11, %v944_v25  ;;  %v1651_v33 = vmax.f32 %v1523_v22, 0.0 }
  0xf8   : > { %v1877_v31 = vcombine.high %v1589_v21, %v1589_v21  ;;  %v1884_v32 = vrot.slane %v1589_v21, %v10610_v14  ;;  %v1590_v34 = vmax.f32 %v1462_v23, 0.0  ;;  %v2965_v35 = vcombine.high %v1653_v26, %v1653_v26 }
  0xf9   : > { %v2972_v36 = vrot.slane %v1653_v26, %v10610_v14  ;;  %v1843_v37 = vcombine.high %v1587_v27, %v1587_v27  ;;  %v1850_v38 = vrot.slane %v1587_v27, %v10610_v14  ;;  %v2931_v42 = vcombine.high %v1651_v33, %v1651_v33 }
  0xfa   : > { %v1891_v39 = vrot.slane %v1877_v31, %v10610_v14  ;;  %v1892_v40 = vcombine.high %v1884_v32, %v1884_v32  ;;  %v8947_v41 = vrot.slane %v1884_v32, 9  ;;  %v2979_v43 = vrot.slane %v2965_v35, %v10610_v14 }
  0xfb   : > { %v2980_v44 = vcombine.high %v2972_v36, %v2972_v36  ;;  %v9075_v45 = vrot.slane %v2972_v36, 9  ;;  %v1857_v46 = vrot.slane %v1843_v37, %v10610_v14  ;;  %v10630_v47 = vpop.f32.mrb[4].mxu0  ;;  %v10634_v52 = vpop.f32.mrb[4].mxu1  ;;  %v1858_v63 = vcombine.high %v1850_v38, %v1850_v38 }
  0xfc   : > { %v1893_v48 = vcombine.high %v1891_v39, %v1891_v39  ;;  %v8948_v49 = vrot.slane %v1892_v40, 9  ;;  %v8949_v50 = vrot.slane %v1891_v39, 9  ;;  %v10632_v51 = vmax.f32 %v1884_v32, %v8947_v41  ;;  %v10636_v53 = vpop.f32.mrb[5].mxu0  ;;  %v10640_v58 = vpop.f32.mrb[5].mxu1 }
  0xfd   : > { %v2981_v54 = vcombine.high %v2979_v43, %v2979_v43  ;;  %v9076_v55 = vrot.slane %v2980_v44, 9  ;;  %v9077_v56 = vrot.slane %v2979_v43, 9  ;;  %v10638_v57 = vmax.f32 %v2972_v36, %v9075_v45  ;;  %v10642_v59 = vpop.f32.mrb[6].mxu0  ;;  %v10648_v0 = vpop.f32.mrb[6].mxu1 }
  0xfe   : > { %v8950_v60 = vrot.slane %v1893_v48, 9  ;;  %v10644_v61 = vmax.f32 %v1892_v40, %v8948_v49  ;;  %v10646_v62 = vmax.f32 %v1891_v39, %v8949_v50  ;;  %v10650_v1 = vpop.f32.mrb[7].mxu0  ;;  %v1859_v5 = vcombine.high %v1857_v46, %v1857_v46  ;;  %v10656_v6 = vpop.f32.mrb[7].mxu1 }
  0xff   : > { %v9078_v2 = vrot.slane %v2981_v54, 9  ;;  %v10652_v3 = vmax.f32 %v2980_v44, %v9076_v55  ;;  %v10654_v4 = vmax.f32 %v2979_v43, %v9077_v56  ;;  %v8939_v8 = vrot.slane %v1850_v38, 9 }
 0x100   : > { %v10658_v7 = vmax.f32 %v1893_v48, %v8950_v60  ;;  %v8940_v9 = vrot.slane %v1858_v63, 9  ;;  %v8941_v10 = vrot.slane %v1857_v46, 9  ;;  %v8942_v13 = vrot.slane %v1859_v5, 9 }
 0x101   : > { %v10660_v12 = vmax.f32 %v2981_v54, %v9078_v2  ;;  %v2938_v15 = vrot.slane %v1651_v33, %v10610_v14  ;;  %v2945_v16 = vrot.slane %v2931_v42, %v10610_v14  ;;  %v10664_v17 = vmax.f32 %v1850_v38, %v8939_v8 }
 0x102   : > { %v10666_v18 = vmax.f32 %v1858_v63, %v8940_v9  ;;  %v10668_v19 = vmax.f32 %v1857_v46, %v8941_v10  ;;  %v1894_v20 = vcombine.high %v1590_v34, %v1590_v34  ;;  %v10670_v21 = vmax.f32 %v1859_v5, %v8942_v13 }
 0x103   : > { %v2946_v22 = vcombine.high %v2938_v15, %v2938_v15  ;;  %v2947_v23 = vcombine.high %v2945_v16, %v2945_v16  ;;  %v9067_v24 = vrot.slane %v2938_v15, 9  ;;  %v10672_v25 = vpop.f32.mrb[8].mxu0  ;;  %v9069_v26 = vrot.slane %v2945_v16, 9  ;;  %v10677_v33 = vpop.f32.mrb[8].mxu1 }
 0x104   : > { %v1901_v27 = vrot.slane %v1590_v34, %v10610_v14  ;;  %v1908_v31 = vrot.slane %v1894_v20, %v10610_v14  ;;  %v1654_v32 = vmax.f32 %v10617_v28, 0.0  ;;  %v10679_v35 = vpop.f32.mrb[9].mxu0  ;;  %v1588_v39 = vmax.f32 %v10620_v29, 0.0  ;;  %v10684_v40 = vpop.f32.mrb[9].mxu1 }
 0x105   : > { %12828 = vst [vmem:[#allocation5_spill] sm:$0xff] %v10679_v35  ;;  %v9068_v36 = vrot.slane %v2946_v22, 9  ;;  %v9070_v37 = vrot.slane %v2947_v23, 9  ;;  %v10681_v38 = vmax.f32 %v2938_v15, %v9067_v24  ;;  %12829 = vst [vmem:[#allocation6_spill] sm:$0xff] %v10684_v40  ;;  %v10686_v41 = vpop.f32.mrb[10].mxu0  ;;  %v10688_v42 = vmax.f32 %v2945_v16, %v9069_v26  ;;  %v10690_v28 = vpop.f32.mrb[10].mxu1 }
 0x106   : > { %12830 = vst [vmem:[#allocation7_spill] sm:$0xff] %v10686_v41  ;;  %v1909_v34 = vcombine.high %v1901_v27, %v1901_v27  ;;  %v1910_v43 = vcombine.high %v1908_v31, %v1908_v31  ;;  %v8951_v44 = vrot.slane %v1901_v27, 9  ;;  %12831 = vst [vmem:[#allocation8_spill] sm:$0xff] %v10690_v28  ;;  %v10692_v45 = vpop.f32.mrb[11].mxu0  ;;  %v8953_v49 = vrot.slane %v1908_v31, 9  ;;  %v10698_v29 = vpop.f32.mrb[11].mxu1 }
 0x107   : > { %12832 = vst [vmem:[#allocation9_spill] sm:$0xff] %v10692_v45  ;;  %v10694_v46 = vmax.f32 %v2946_v22, %v9068_v36  ;;  %v10696_v48 = vmax.f32 %v2947_v23, %v9070_v37  ;;  %v2982_v50 = vcombine.high %v1654_v32, %v1654_v32  ;;  %12833 = vst [vmem:[#allocation10_spill] sm:$0xff] %v10698_v29 }
 0x108   : > { %v8952_v54 = vrot.slane %v1909_v34, 9  ;;  %v8954_v55 = vrot.slane %v1910_v43, 9  ;;  %v10700_v56 = vmax.f32 %v1901_v27, %v8951_v44  ;;  %v2989_v60 = vrot.slane %v1654_v32, %v10610_v14 }
 0x109   : > { %v10703_v63 = vmax.f32 %v1908_v31, %v8953_v49  ;;  %v2996_v2 = vrot.slane %v2982_v50, %v10610_v14  ;;  %v1860_v5 = vcombine.high %v1588_v39, %v1588_v39  ;;  %v1867_v8 = vrot.slane %v1588_v39, %v10610_v14 }
 0x10a   : > { %v10707_v9 = vmax.f32 %v1909_v34, %v8952_v54  ;;  %v10709_v10 = vmax.f32 %v1910_v43, %v8954_v55  ;;  %v2997_v13 = vcombine.high %v2989_v60, %v2989_v60  ;;  %v9079_v15 = vrot.slane %v2989_v60, 9 }
 0x10b   : > { %v2998_v16 = vcombine.high %v2996_v2, %v2996_v2  ;;  %v9081_v20 = vrot.slane %v2996_v2, 9  ;;  %v1874_v22 = vrot.slane %v1860_v5, %v10610_v14  ;;  %v1875_v23 = vcombine.high %v1867_v8, %v1867_v8  ;;  %v10712_v24 = vpop.f32.mrb[12].mxu0  ;;  %v10718_v36 = vpop.f32.mrb[12].mxu1 }
 0x10c   : > { %12834 = vst [vmem:[#allocation11_spill] sm:$0xff] %v10712_v24  ;;  %v9080_v26 = vrot.slane %v2997_v13, 9  ;;  %v10714_v27 = vmax.f32 %v2989_v60, %v9079_v15  ;;  %v8943_v31 = vrot.slane %v1867_v8, 9  ;;  %v1524_v32 = vadd.f32 %v10607_v11, %v10622_v30  ;;  %12835 = vst [vmem:[#allocation12_spill] sm:$0xff] %v10718_v36  ;;  %v10720_v37 = vpop.f32.mrb[13].mxu0  ;;  %v10724_v49 = vpop.f32.mrb[13].mxu1 }
 0x10d   : > { %12836 = vst [vmem:[#allocation13_spill] sm:$0xff] %v10720_v37  ;;  %v9082_v39 = vrot.slane %v2998_v16, 9  ;;  %v10722_v34 = vmax.f32 %v2996_v2, %v9081_v20  ;;  %v1876_v43 = vcombine.high %v1874_v22, %v1874_v22  ;;  %v8944_v44 = vrot.slane %v1875_v23, 9  ;;  %12837 = vst [vmem:[#allocation14_spill] sm:$0xff] %v10724_v49  ;;  %v10726_v50 = vpop.f32.mrb[14].mxu0  ;;  %v10738_v20 = vpop.f32.mrb[14].mxu1 }
 0x10e   : > { %12838 = vst [vmem:[#allocation15_spill] sm:$0xff] %v10726_v50  ;;  %v10728_v54 = vmax.f32 %v2997_v13, %v9080_v26  ;;  %v8945_v55 = vrot.slane %v1874_v22, 9  ;;  %v10730_v60 = vmax.f32 %v1867_v8, %v8943_v31  ;;  %v1652_v5 = vmax.f32 %v1524_v32, 0.0  ;;  %12839 = vst [vmem:[#allocation16_spill] sm:$0xff] %v10738_v20 }
 0x10f   : > { %v10732_v30 = vmax.f32 %v2998_v16, %v9082_v39  ;;  %v8946_v15 = vrot.slane %v1876_v43, 9  ;;  %v10734_v36 = vmax.f32 %v1875_v23, %v8944_v44  ;;  %v1465_v2 = vadd.f32 %v10630_v47, %v10607_v11 }
 0x110   : > { %v10740_v37 = vmax.f32 %v1874_v22, %v8945_v55  ;;  %v2948_v49 = vcombine.high %v1652_v5, %v1652_v5  ;;  %v2955_v13 = vrot.slane %v1652_v5, %v10610_v14  ;;  %v1529_v8 = vadd.f32 %v10634_v52, %v10607_v11 }
 0x111   : > { %v10745_v26 = vmax.f32 %v1876_v43, %v8946_v15  ;;  %v1593_v16 = vmax.f32 %v1465_v2, 0.0  ;;  %v1463_v23 = vadd.f32 %v10607_v11, %v10636_v53  ;;  %v1527_v31 = vadd.f32 %v10607_v11, %v10640_v58 }
 0x112   : > { %v2962_v47 = vrot.slane %v2948_v49, %v10610_v14  ;;  %v2963_v32 = vcombine.high %v2955_v13, %v2955_v13  ;;  %v9071_v22 = vrot.slane %v2955_v13, 9  ;;  %v1657_v39 = vmax.f32 %v1529_v8, 0.0 }
 0x113   : > { %v1945_v44 = vcombine.high %v1593_v16, %v1593_v16  ;;  %v1952_v55 = vrot.slane %v1593_v16, %v10610_v14  ;;  %v10753_v5 = vmax.f32 %v1463_v23, 0.0  ;;  %v10755_v52 = vmax.f32 %v1527_v31, 0.0 }
 0x114   : > { %v2964_v43 = vcombine.high %v2962_v47, %v2962_v47  ;;  %v9072_v15 = vrot.slane %v2963_v32, 9  ;;  %v9073_v2 = vrot.slane %v2962_v47, 9  ;;  %v10757_v20 = vmax.f32 %v2955_v13, %v9071_v22 }
 0x115   : > { %v1959_v53 = vrot.slane %v1945_v44, %v10610_v14  ;;  %v1960_v58 = vcombine.high %v1952_v55, %v1952_v55  ;;  %v9203_v50 = vrot.slane %v1952_v55, 9  ;;  %v3033_v49 = vcombine.high %v1657_v39, %v1657_v39 }
 0x116   : > { %12840 = vst [vmem:[#allocation17_spill] sm:$0xff] %v10757_v20  ;;  %v9074_v24 = vrot.slane %v2964_v43, 9  ;;  %v10760_v29 = vmax.f32 %v2963_v32, %v9072_v15  ;;  %v10762_v8 = vmax.f32 %v2962_v47, %v9073_v2  ;;  %v3040_v16 = vrot.slane %v1657_v39, %v10610_v14  ;;  %v10769_v47 = vpop.f32.mrb[15].mxu0 }
 0x117   : > { %v1961_v23 = vcombine.high %v1959_v53, %v1959_v53  ;;  %v9204_v31 = vrot.slane %v1960_v58, 9  ;;  %v9205_v45 = vrot.slane %v1959_v53, 9  ;;  %v6331_v28 = vmax.f32 %v1952_v55, %v9203_v50  ;;  %12844 = vst [vmem:[#allocation21_spill] sm:$0xff] %v10769_v47 }
 0x118   : > { %12841 = vst [vmem:[#allocation18_spill] sm:$0xff] %v10760_v29  ;;  %12842 = vst [vmem:[#allocation19_spill] sm:$0xff] %v10762_v8  ;;  %v10765_v41 = vmax.f32 %v2964_v43, %v9074_v24  ;;  %v3047_v13 = vrot.slane %v3033_v49, %v10610_v14  ;;  %v3048_v22 = vcombine.high %v3040_v16, %v3040_v16  ;;  %v9331_v44 = vrot.slane %v3040_v16, 9 }
 0x119   : > { %v9206_v40 = vrot.slane %v1961_v23, 9  ;;  %v6332_v35 = vmax.f32 %v1960_v58, %v9204_v31  ;;  %v6333_v20 = vmax.f32 %v1959_v53, %v9205_v45  ;;  %v6587_v32 = vmax.f32 %v10632_v51, %v6331_v28 }
 0x11a   : > { %12843 = vst [vmem:[#allocation20_spill] sm:$0xff] %v10765_v41  ;;  %v3049_v39 = vcombine.high %v3047_v13, %v3047_v13  ;;  %v9332_v15 = vrot.slane %v3048_v22, 9  ;;  %v9333_v2 = vrot.slane %v3047_v13, 9  ;;  %v6459_v8 = vmax.f32 %v3040_v16, %v9331_v44 }
 0x11b   : > { %v6334_v50 = vmax.f32 %v1961_v23, %v9206_v40  ;;  %v6588_v24 = vmax.f32 %v10644_v61, %v6332_v35  ;;  %v6589_v55 = vmax.f32 %v10646_v62, %v6333_v20  ;;  %v9721_v43 = vpack.c.bf16 %v6587_v32, %v6587_v32 }
 0x11c   : > { %v9334_v49 = vrot.slane %v3049_v39, 9  ;;  %v6460_v41 = vmax.f32 %v3048_v22, %v9332_v15  ;;  %v6461_v29 = vmax.f32 %v3047_v13, %v9333_v2  ;;  %v6715_v45 = vmax.f32 %v10638_v57, %v6459_v8  ;;  %v10780_v13 = vpop.f32.mrb[15].mxu1 }
 0x11d   : > { %v6590_v51 = vmax.f32 %v10658_v7, %v6334_v50  ;;  %v9722_v28 = vpack.c.bf16 %v6588_v24, %v6588_v24  ;;  %v9723_v53 = vpack.c.bf16 %v6589_v55, %v6589_v55  ;;  %v7867_v58 = vunpack.c.l.b16 %v9721_v43 }
 0x11e   : > { %v6462_v31 = vmax.f32 %v3049_v39, %v9334_v49  ;;  %v6716_v47 = vmax.f32 %v10652_v3, %v6460_v41  ;;  %v6717_v40 = vmax.f32 %v10654_v4, %v6461_v29  ;;  %v9849_v16 = vpack.c.bf16 %v6715_v45, %v6715_v45 }
 0x11f   : > { %v9724_v61 = vpack.c.bf16 %v6590_v51, %v6590_v51  ;;  %v7868_v35 = vunpack.c.l.b16 %v9722_v28  ;;  %v7869_v62 = vunpack.c.l.b16 %v9723_v53  ;;  %v1911_v20 = vcombine.high %v10753_v5, %v10753_v5 }
 0x120   : > { %v6718_v23 = vmax.f32 %v10660_v12, %v6462_v31  ;;  %v9850_v57 = vpack.c.bf16 %v6716_v47, %v6716_v47  ;;  %v9851_v8 = vpack.c.bf16 %v6717_v40, %v6717_v40  ;;  %v7995_v7 = vunpack.c.l.b16 %v9849_v16 }
 0x121   : > { %v10782_v22 = vunpack.c.l.b16 %v9724_v61  ;;  %v8136_v44 = vrot.slane %v7868_v35, 7  ;;  %v8138_v3 = vrot.slane %v7869_v62, 6  ;;  %v1918_v4 = vrot.slane %v10753_v5, %v10610_v14 }
 0x122   : > { %v9852_v41 = vpack.c.bf16 %v6718_v23, %v6718_v23  ;;  %v7996_v29 = vunpack.c.l.b16 %v9850_v57  ;;  %v7997_v32 = vunpack.c.l.b16 %v9851_v8  ;;  %v1925_v39 = vrot.slane %v1911_v20, %v10610_v14 }
 0x123   : > { %v8137_v15 = vsel %vm8116_vm3, %v8136_v44, %v7867_v58  ;;  %v8140_v12 = vrot.slane %v10782_v22, 5  ;;  %v1926_v47 = vcombine.high %v1918_v4, %v1918_v4  ;;  %v9195_v2 = vrot.slane %v1918_v4, 9 }
 0x124   : > { %v10790_v50 = vsel %vm8119_vm4, %v8138_v3, %v8137_v15  ;;  %v10792_v24 = vunpack.c.l.b16 %v9852_v41  ;;  %v8360_v55 = vrot.slane %v7996_v29, 7  ;;  %v8362_v43 = vrot.slane %v7997_v32, 6 }
 0x125   : > { %v1927_v49 = vcombine.high %v1925_v39, %v1925_v39  ;;  %v9196_v5 = vrot.slane %v1926_v47, 9  ;;  %v9197_v45 = vrot.slane %v1925_v39, 9  ;;  %v6323_v51 = vmax.f32 %v1918_v4, %v9195_v2 }
 0x126   : > { %v8361_v28 = vsel %vm8116_vm3, %v8360_v55, %v7995_v7  ;;  %v8364_v53 = vrot.slane %v10792_v24, 5  ;;  %v2999_v58 = vcombine.high %v10755_v52, %v10755_v52  ;;  %v3006_v31 = vrot.slane %v10755_v52, %v10610_v14 }
 0x127   : > { %v10801_v40 = vsel %vm8119_vm4, %v8362_v43, %v8361_v28  ;;  %v9198_v16 = vrot.slane %v1927_v49, 9  ;;  %v6324_v61 = vmax.f32 %v1926_v47, %v9196_v5  ;;  %v6325_v35 = vmax.f32 %v1925_v39, %v9197_v45 }
 0x128   : > { %v6579_v62 = vmax.f32 %v10664_v17, %v6323_v51  ;;  %v3013_v20 = vrot.slane %v2999_v58, %v10610_v14  ;;  %v3014_v23 = vcombine.high %v3006_v31, %v3006_v31  ;;  %v9323_v57 = vrot.slane %v3006_v31, 9 }
 0x129   : > { %v6326_v8 = vmax.f32 %v1927_v49, %v9198_v16  ;;  %v6580_v7 = vmax.f32 %v10666_v18, %v6324_v61  ;;  %v6581_v44 = vmax.f32 %v10668_v19, %v6325_v35  ;;  %v1466_v52 = vadd.f32 %v10642_v59, %v10607_v11 }
 0x12a   : > { %v9713_v3 = vpack.c.bf16 %v6579_v62, %v6579_v62  ;;  %v3015_v4 = vcombine.high %v3013_v20, %v3013_v20  ;;  %v9324_v41 = vrot.slane %v3014_v23, 9  ;;  %v9325_v29 = vrot.slane %v3013_v20, 9 }
 0x12b   : > { %v6582_v32 = vmax.f32 %v10670_v21, %v6326_v8  ;;  %v9714_v17 = vpack.c.bf16 %v6580_v7, %v6580_v7  ;;  %v9715_v39 = vpack.c.bf16 %v6581_v44, %v6581_v44  ;;  %v6451_v15 = vmax.f32 %v3006_v31, %v9323_v57  ;;  %v10816_v7 = vpop.f32.mrb[16].mxu0 }
 0x12c   : > { %v7859_v47 = vunpack.c.l.b16 %v9713_v3  ;;  %v9326_v2 = vrot.slane %v3015_v4, 9  ;;  %v6452_v55 = vmax.f32 %v3014_v23, %v9324_v41  ;;  %v6453_v43 = vmax.f32 %v3013_v20, %v9325_v29  ;;  %v10819_v3 = vpop.f32.mrb[16].mxu1 }
 0x12d   : > { %v9716_v49 = vpack.c.bf16 %v6582_v32, %v6582_v32  ;;  %v7860_v18 = vunpack.c.l.b16 %v9714_v17  ;;  %v7861_v5 = vunpack.c.l.b16 %v9715_v39  ;;  %v6707_v19 = vmax.f32 %v10681_v38, %v6451_v15 }
 0x12e   : > { %v6454_v45 = vmax.f32 %v3015_v4, %v9326_v2  ;;  %v6708_v59 = vmax.f32 %v10694_v46, %v6452_v55  ;;  %v6709_v51 = vmax.f32 %v10688_v42, %v6453_v43  ;;  %v1594_v28 = vmax.f32 %v1466_v52, 0.0 }
 0x12f   : > { %v7862_v58 = vunpack.c.l.b16 %v9716_v49  ;;  %v8115_v21 = vrot.slane %v7860_v18, 7  ;;  %v8118_v16 = vrot.slane %v7861_v5, 6  ;;  %v9841_v61 = vpack.c.bf16 %v6707_v19, %v6707_v19 }
 0x130   : > { %v6710_v31 = vmax.f32 %v10696_v48, %v6454_v45  ;;  %v9842_v35 = vpack.c.bf16 %v6708_v59, %v6708_v59  ;;  %v9843_v62 = vpack.c.bf16 %v6709_v51, %v6709_v51  ;;  %v1962_v20 = vcombine.high %v1594_v28, %v1594_v28 }
 0x131   : > { %v8117_v23 = vsel %vm8116_vm3, %v8115_v21, %v7859_v47  ;;  %v8121_v57 = vrot.slane %v7862_v58, 5  ;;  %v7987_v8 = vunpack.c.l.b16 %v9841_v61  ;;  %v1969_v38 = vrot.slane %v1594_v28, %v10610_v14 }
 0x132   : > { %v8120_v42 = vsel %vm8119_vm4, %v8118_v16, %v8117_v23  ;;  %v9844_v46 = vpack.c.bf16 %v6710_v31, %v6710_v31  ;;  %v7988_v44 = vunpack.c.l.b16 %v9842_v35  ;;  %v7989_v52 = vunpack.c.l.b16 %v9843_v62  ;;  %v10851_v31 = vpop.f32.mrb[17].mxu0 }
 0x133   : > { %v1976_v48 = vrot.slane %v1962_v20, %v10610_v14  ;;  %v1977_v4 = vcombine.high %v1969_v38, %v1969_v38  ;;  %v9207_v41 = vrot.slane %v1969_v38, 9  ;;  %v8141_v29 = vsel %vm8122_vm5, %v8140_v12, %v10790_v50  ;;  %12845 = vst [vmem:[#allocation22_spill] sm:$0xff] %v10851_v31 }
 0x134   : > { %v10826_v32 = vunpack.c.l.b16 %v9844_v46  ;;  %v8346_v17 = vrot.slane %v7988_v44, 7  ;;  %v8348_v39 = vrot.slane %v7989_v52, 6  ;;  %v1530_v15 = vadd.f32 %v10648_v0, %v10607_v11  ;;  %v10855_v44 = vpop.f32.mrb[17].mxu1 }
 0x135   : > { %v1978_v47 = vcombine.high %v1976_v48, %v1976_v48  ;;  %v9208_v2 = vrot.slane %v1977_v4, 9  ;;  %v9209_v55 = vrot.slane %v1976_v48, 9  ;;  %v6335_v43 = vmax.f32 %v1969_v38, %v9207_v41  ;;  %12846 = vst [vmem:[#allocation23_spill] sm:$0xff] %v10855_v44 }
 0x136   : > { %v8347_v49 = vsel %vm8116_vm3, %v8346_v17, %v7987_v8  ;;  %v8350_v18 = vrot.slane %v10826_v32, 5  ;;  %v1658_v22 = vmax.f32 %v1530_v15, 0.0  ;;  %v10836_v12 = vsel %vm8122_vm5, %v8364_v53, %v10801_v40 }
 0x137   : > { %v10839_v50 = vsel %vm8119_vm4, %v8348_v39, %v8347_v49  ;;  %v9210_v0 = vrot.slane %v1978_v47, 9  ;;  %v6336_v5 = vmax.f32 %v1977_v4, %v9208_v2  ;;  %v6337_v19 = vmax.f32 %v1976_v48, %v9209_v55 }
 0x138   : > { %v6591_v45 = vmax.f32 %v10700_v56, %v6335_v43  ;;  %v3050_v59 = vcombine.high %v1658_v22, %v1658_v22  ;;  %v3057_v51 = vrot.slane %v1658_v22, %v10610_v14  ;;  %v1464_v28 = vadd.f32 %v10607_v11, %v10650_v1 }
 0x139   : > { %v6338_v24 = vmax.f32 %v1978_v47, %v9210_v0  ;;  %v6592_v53 = vmax.f32 %v10707_v9, %v6336_v5  ;;  %v6593_v40 = vmax.f32 %v10703_v63, %v6337_v19  ;;  %v10848_v58 = vsel %vm8122_vm5, %v8121_v57, %v8120_v42 }
 0x13a   : > { %v9725_v21 = vpack.c.bf16 %v6591_v45, %v6591_v45  ;;  %v3064_v16 = vrot.slane %v3050_v59, %v10610_v14  ;;  %v3065_v56 = vcombine.high %v3057_v51, %v3057_v51  ;;  %v9335_v61 = vrot.slane %v3057_v51, 9 }
 0x13b   : > { %v6594_v35 = vmax.f32 %v10709_v10, %v6338_v24  ;;  %v9726_v62 = vpack.c.bf16 %v6592_v53, %v6592_v53  ;;  %v9727_v1 = vpack.c.bf16 %v6593_v40, %v6593_v40  ;;  %v1592_v20 = vmax.f32 %v1464_v28, 0.0  ;;  %v10869_v24 = vpop.f32.mrb[18].mxu0 }
 0x13c   : > { %v7871_v9 = vunpack.c.l.b16 %v9725_v21  ;;  %v3066_v23 = vcombine.high %v3064_v16, %v3064_v16  ;;  %v9336_v63 = vrot.slane %v3065_v56, 9  ;;  %v9337_v8 = vrot.slane %v3064_v16, 9  ;;  %12847 = vst [vmem:[#allocation24_spill] sm:$0xff] %v10869_v24 }
 0x13d   : > { %v9728_v57 = vpack.c.bf16 %v6594_v35, %v6594_v35  ;;  %v7872_v38 = vunpack.c.l.b16 %v9726_v62  ;;  %v7873_v42 = vunpack.c.l.b16 %v9727_v1  ;;  %v6463_v46 = vmax.f32 %v3057_v51, %v9335_v61 }
 0x13e   : > { %v8142_v52 = vrot.slane %v7871_v9, 4  ;;  %v9338_v48 = vrot.slane %v3066_v23, 9  ;;  %v6464_v4 = vmax.f32 %v3065_v56, %v9336_v63  ;;  %v6465_v10 = vmax.f32 %v3064_v16, %v9337_v8 }
 0x13f   : > { %v7874_v41 = vunpack.c.l.b16 %v9728_v57  ;;  %v8144_v17 = vrot.slane %v7872_v38, 3  ;;  %v8146_v39 = vrot.slane %v7873_v42, 2  ;;  %v6719_v15 = vmax.f32 %v10714_v27, %v6463_v46 }
 0x140   : > { %v8143_v47 = vsel %vm8125_vm6, %v8142_v52, %v8141_v29  ;;  %v6466_v2 = vmax.f32 %v3066_v23, %v9338_v48  ;;  %v6720_v55 = vmax.f32 %v10728_v54, %v6464_v4  ;;  %v6721_v43 = vmax.f32 %v10722_v34, %v6465_v10 }
 0x141   : > { %v8145_v49 = vsel %vm8128_vm7, %v8144_v17, %v8143_v47  ;;  %v8148_v22 = vrot.slane %v7874_v41, 1  ;;  %v9853_v0 = vpack.c.bf16 %v6719_v15, %v6719_v15  ;;  %v1928_v5 = vcombine.high %v1592_v20, %v1592_v20  ;;  %v10884_v17 = vpop.f32.mrb[19].mxu0 }
 0x142   : > { %v8147_v19 = vsel %vm8131_vm8, %v8146_v39, %v8145_v49  ;;  %v6722_v45 = vmax.f32 %v10732_v30, %v6466_v2  ;;  %v9854_v59 = vpack.c.bf16 %v6720_v55, %v6720_v55  ;;  %v9855_v27 = vpack.c.bf16 %v6721_v43, %v6721_v43  ;;  %v10871_v30 = vpop.f32.mrb[18].mxu1  ;;  %12849 = vst [vmem:[#allocation26_spill] sm:$0xff] %v10884_v17 }
 0x143   : > { %v8149_v51 = vsel %vm8134_vm9, %v8148_v22, %v8147_v19  ;;  %v7999_v28 = vunpack.c.l.b16 %v9853_v0  ;;  %v1935_v29 = vrot.slane %v1592_v20, %v10610_v14  ;;  %v1942_v54 = vrot.slane %v1928_v5, %v10610_v14  ;;  %12848 = vst [vmem:[#allocation25_spill] sm:$0xff] %v10871_v30 }
 0x144   : > { %v8571_v34 = vpack.c.b16 %v8149_v51, %v8149_v51  ;;  %v9856_v53 = vpack.c.bf16 %v6722_v45, %v6722_v45  ;;  %v8000_v40 = vunpack.c.l.b16 %v9854_v59  ;;  %v8001_v21 = vunpack.c.l.b16 %v9855_v27 }
 0x145   : > { %v8366_v16 = vrot.slane %v7999_v28, 4  ;;  %v1943_v56 = vcombine.high %v1935_v29, %v1935_v29  ;;  %v1944_v61 = vcombine.high %v1942_v54, %v1942_v54  ;;  %v9199_v35 = vrot.slane %v1935_v29, 9 }
 0x146   : > { %8636 = vst.msk [vmem:[%s10873_s18 + $0x4] sm:$0xf] %vm8634_vm10, %v8571_v34  ;;  %v8002_v62 = vunpack.c.l.b16 %v9856_v53  ;;  %v8368_v1 = vrot.slane %v8000_v40, 3  ;;  %v8370_v20 = vrot.slane %v8001_v21, 2  ;;  %v9201_v9 = vrot.slane %v1942_v54, 9 }
 0x147   : > { %v8367_v23 = vsel %vm8125_vm6, %v8366_v16, %v10836_v12  ;;  %v9200_v63 = vrot.slane %v1943_v56, 9  ;;  %v9202_v8 = vrot.slane %v1944_v61, 9  ;;  %v6327_v57 = vmax.f32 %v1935_v29, %v9199_v35 }
 0x148   : > { %v8369_v38 = vsel %vm8128_vm7, %v8368_v1, %v8367_v23  ;;  %v8372_v42 = vrot.slane %v8002_v62, 1  ;;  %v6329_v46 = vmax.f32 %v1942_v54, %v9201_v9  ;;  %v1528_v52 = vadd.f32 %v10607_v11, %v10656_v6  ;;  %v12851_v1 = vld [vmem:[#allocation17_spill] sm:$0xff] }
 0x149   : > { %v8371_v48 = vsel %vm8131_vm8, %v8370_v20, %v8369_v38  ;;  %v6328_v4 = vmax.f32 %v1943_v56, %v9200_v63  ;;  %v6330_v10 = vmax.f32 %v1944_v61, %v9202_v8  ;;  %v6583_v41 = vmax.f32 %v10730_v60, %v6327_v57  ;;  %v12852_v57 = vld [vmem:[#allocation18_spill] sm:$0xff] }
 0x14a   : > { %v8373_v12 = vsel %vm8134_vm9, %v8372_v42, %v8371_v48  ;;  %v6585_v39 = vmax.f32 %v10740_v37, %v6329_v46  ;;  %v1656_v15 = vmax.f32 %v1528_v52, 0.0  ;;  %v10892_v47 = vsel %vm8122_vm5, %v8350_v18, %v10839_v50  ;;  %v10903_v50 = vpop.f32.mrb[19].mxu1 }
 0x14b   : > { %v8587_v6 = vpack.c.b16 %v8373_v12, %v8373_v12  ;;  %v6584_v2 = vmax.f32 %v10734_v36, %v6328_v4  ;;  %v6586_v55 = vmax.f32 %v10745_v26, %v6330_v10  ;;  %v9717_v43 = vpack.c.bf16 %v6583_v41, %v6583_v41  ;;  %12850 = vst [vmem:[#allocation27_spill] sm:$0xff] %v10903_v50  ;;  %v12854_v41 = vld [vmem:[#allocation20_spill] sm:$0xff] }
 0x14c   : > { %v9719_v60 = vpack.c.bf16 %v6585_v39, %v6585_v39  ;;  %v3016_v49 = vcombine.high %v1656_v15, %v1656_v15  ;;  %v3023_v22 = vrot.slane %v1656_v15, %v10610_v14  ;;  %v1469_v37 = vadd.f32 %v10672_v25, %v10607_v11 }
 0x14d   : > { %8652 = vst.msk [vmem:[%s10873_s18 + $0x44] sm:$0xf] %vm8634_vm10, %v8587_v6  ;;  %v9718_v0 = vpack.c.bf16 %v6584_v2, %v6584_v2  ;;  %v9720_v32 = vpack.c.bf16 %v6586_v55, %v6586_v55  ;;  %v7863_v5 = vunpack.c.l.b16 %v9717_v43  ;;  %v1533_v18 = vadd.f32 %v10677_v33, %v10607_v11  ;;  %v10917_v6 = vpop.f32.mrb[20].mxu0  ;;  %v10919_v2 = vpop.f32.mrb[20].mxu1 }
 0x14e   : > { %v7865_v36 = vunpack.c.l.b16 %v9719_v60  ;;  %v3030_v26 = vrot.slane %v3016_v49, %v10610_v14  ;;  %v3031_v19 = vcombine.high %v3023_v22, %v3023_v22  ;;  %v9327_v45 = vrot.slane %v3023_v22, 9  ;;  %12855 = vst [vmem:[#allocation17_spill] sm:$0xff] %v10917_v6  ;;  %12856 = vst [vmem:[#allocation18_spill] sm:$0xff] %v10919_v2 }
 0x14f   : > { %v7864_v59 = vunpack.c.l.b16 %v9718_v0  ;;  %v7866_v27 = vunpack.c.l.b16 %v9720_v32  ;;  %v8124_v51 = vrot.slane %v7863_v5, 4  ;;  %v1597_v28 = vmax.f32 %v1469_v37, 0.0 }
 0x150   : > { %v8130_v25 = vrot.slane %v7865_v36, 2  ;;  %v3032_v29 = vcombine.high %v3030_v26, %v3030_v26  ;;  %v9328_v54 = vrot.slane %v3031_v19, 9  ;;  %v9329_v34 = vrot.slane %v3030_v26, 9 }
 0x151   : > { %v8126_v53 = vsel %vm8125_vm6, %v8124_v51, %v10848_v58  ;;  %v8127_v40 = vrot.slane %v7864_v59, 3  ;;  %v8133_v33 = vrot.slane %v7866_v27, 1  ;;  %v6455_v21 = vmax.f32 %v3023_v22, %v9327_v45  ;;  %v12853_v58 = vld [vmem:[#allocation19_spill] sm:$0xff]  ;;  %v10929_v51 = vpop.f32.mrb[21].mxu0 }
 0x152   : > { %v9330_v16 = vrot.slane %v3032_v29, 9  ;;  %v6456_v56 = vmax.f32 %v3031_v19, %v9328_v54  ;;  %v6457_v61 = vmax.f32 %v3030_v26, %v9329_v34  ;;  %v2013_v35 = vcombine.high %v1597_v28, %v1597_v28  ;;  %12857 = vst [vmem:[#allocation19_spill] sm:$0xff] %v10929_v51  ;;  %v12874_v51 = vld [vmem:[#allocation15_spill] sm:$0xff] }
 0x153   : > { %v8129_v62 = vsel %vm8128_vm7, %v8127_v40, %v8126_v53  ;;  %v6711_v20 = vmax.f32 %v12851_v1, %v6455_v21  ;;  %v2020_v9 = vrot.slane %v1597_v28, %v10610_v14  ;;  %v1661_v23 = vmax.f32 %v1533_v18, 0.0  ;;  %v12858_v40 = vld [vmem:[#allocation5_spill] sm:$0xff]  ;;  %v12859_v21 = vld [vmem:[#allocation6_spill] sm:$0xff] }
 0x154   : > { %v8132_v63 = vsel %vm8131_vm8, %v8130_v25, %v8129_v62  ;;  %v6458_v8 = vmax.f32 %v3032_v29, %v9330_v16  ;;  %v6712_v38 = vmax.f32 %v12852_v57, %v6456_v56  ;;  %v6713_v42 = vmax.f32 %v12853_v58, %v6457_v61 }
 0x155   : > { %v8135_v46 = vsel %vm8134_vm9, %v8133_v33, %v8132_v63  ;;  %v9845_v52 = vpack.c.bf16 %v6711_v20, %v6711_v20  ;;  %v2027_v48 = vrot.slane %v2013_v35, %v10610_v14  ;;  %v2028_v4 = vcombine.high %v2020_v9, %v2020_v9 }
 0x156   : > { %v8570_v10 = vpack.c.b16 %v8135_v46, %v8135_v46  ;;  %v6714_v12 = vmax.f32 %v12854_v41, %v6458_v8  ;;  %v9846_v39 = vpack.c.bf16 %v6712_v38, %v6712_v38  ;;  %v9847_v15 = vpack.c.bf16 %v6713_v42, %v6713_v42 }
 0x157   : > { %v7991_v55 = vunpack.c.l.b16 %v9845_v52  ;;  %v2029_v43 = vcombine.high %v2027_v48, %v2027_v48  ;;  %v8963_v60 = vrot.slane %v2020_v9, 9  ;;  %v8964_v49 = vrot.slane %v2028_v4, 9 }
 0x158   : > { %8635 = vst.msk [vmem:[%s10873_s18] sm:$0xf] %vm8634_vm10, %v8570_v10  ;;  %v9848_v22 = vpack.c.bf16 %v6714_v12, %v6714_v12  ;;  %v7992_v37 = vunpack.c.l.b16 %v9846_v39  ;;  %v7993_v0 = vunpack.c.l.b16 %v9847_v15  ;;  %v8965_v32 = vrot.slane %v2027_v48, 9 }
 0x159   : > { %v8352_v5 = vrot.slane %v7991_v55, 4  ;;  %v8966_v18 = vrot.slane %v2029_v43, 9  ;;  %v10923_v36 = vmax.f32 %v2020_v9, %v8963_v60  ;;  %v10925_v26 = vmax.f32 %v2028_v4, %v8964_v49  ;;  %v12860_v9 = vld [vmem:[#allocation7_spill] sm:$0xff]  ;;  %v10958_v55 = vpop.f32.mrb[21].mxu1 }
 0x15a   : > { %v7994_v19 = vunpack.c.l.b16 %v9848_v22  ;;  %v8354_v45 = vrot.slane %v7992_v37, 3  ;;  %v8356_v59 = vrot.slane %v7993_v0, 2  ;;  %v10927_v27 = vmax.f32 %v2027_v48, %v8965_v32  ;;  %12861 = vst [vmem:[#allocation20_spill] sm:$0xff] %v10958_v55  ;;  %v12873_v55 = vld [vmem:[#allocation14_spill] sm:$0xff] }
 0x15b   : > { %v8353_v28 = vsel %vm8125_vm6, %v8352_v5, %v10892_v47  ;;  %v10933_v25 = vmax.f32 %v2029_v43, %v8966_v18  ;;  %v3101_v29 = vcombine.high %v1661_v23, %v1661_v23  ;;  %v3108_v54 = vrot.slane %v1661_v23, %v10610_v14 }
 0x15c   : > { %v8355_v34 = vsel %vm8128_vm7, %v8354_v45, %v8353_v28  ;;  %v8358_v53 = vrot.slane %v7994_v19, 1  ;;  %v1467_v33 = vadd.f32 %v10607_v11, %v12858_v40  ;;  %v1531_v16 = vadd.f32 %v10607_v11, %v12859_v21 }
 0x15d   : > { %v8357_v56 = vsel %vm8131_vm8, %v8356_v59, %v8355_v34  ;;  %v3115_v61 = vrot.slane %v3101_v29, %v10610_v14  ;;  %v3116_v47 = vcombine.high %v3108_v54, %v3108_v54  ;;  %v9091_v35 = vrot.slane %v3108_v54, 9 }
 0x15e   : > { %v8359_v62 = vsel %vm8134_vm9, %v8358_v53, %v8357_v56  ;;  %v1595_v1 = vmax.f32 %v1467_v33, 0.0  ;;  %v1659_v20 = vmax.f32 %v1531_v16, 0.0  ;;  %v1470_v23 = vadd.f32 %v12860_v9, %v10607_v11 }
 0x15f   : > { %v8586_v63 = vpack.c.b16 %v8359_v62, %v8359_v62  ;;  %v3117_v8 = vcombine.high %v3115_v61, %v3115_v61  ;;  %v9092_v57 = vrot.slane %v3116_v47, 9  ;;  %v9093_v38 = vrot.slane %v3115_v61, 9  ;;  %v12863_v62 = vld [vmem:[#allocation9_spill] sm:$0xff] }
 0x160   : > { %v10946_v58 = vmax.f32 %v3108_v54, %v9091_v35  ;;  %v1979_v42 = vcombine.high %v1595_v1, %v1595_v1  ;;  %v1986_v46 = vrot.slane %v1595_v1, %v10610_v14  ;;  %v3067_v52 = vcombine.high %v1659_v20, %v1659_v20 }
 0x161   : > { %8651 = vst.msk [vmem:[%s10873_s18 + $0x40] sm:$0xf] %vm8634_vm10, %v8586_v63  ;;  %v9094_v48 = vrot.slane %v3117_v8, 9  ;;  %v10951_v4 = vmax.f32 %v3116_v47, %v9092_v57  ;;  %v10953_v10 = vmax.f32 %v3115_v61, %v9093_v38  ;;  %v3074_v41 = vrot.slane %v1659_v20, %v10610_v14  ;;  %v10981_v61 = vld [vmem:[%s12822_s2] ss:$0 sm:$0xff]  ;;  %v12862_v47 = vld [vmem:[#allocation8_spill] sm:$0xff] }
 0x162   : > { %v1993_v11 = vrot.slane %v1979_v42, %v10610_v14  ;;  %v1994_v12 = vcombine.high %v1986_v46, %v1986_v46  ;;  %v8955_v39 = vrot.slane %v1986_v46, 9  ;;  %v3081_v15 = vrot.slane %v3067_v52, %v10610_v14  ;;  %v12864_v63 = vld [vmem:[#allocation10_spill] sm:$0xff] }
 0x163   : > { %v10960_v43 = vmax.f32 %v3117_v8, %v9094_v48  ;;  %v3082_v60 = vcombine.high %v3074_v41, %v3074_v41  ;;  %v9083_v49 = vrot.slane %v3074_v41, 9  ;;  %v1598_v22 = vmax.f32 %v1470_v23, 0.0 }
 0x164   : > { %v1995_v37 = vcombine.high %v1993_v11, %v1993_v11  ;;  %v8956_v0 = vrot.slane %v1994_v12, 9  ;;  %v8957_v32 = vrot.slane %v1993_v11, 9  ;;  %v10962_v5 = vmax.f32 %v1986_v46, %v8955_v39  ;;  %v10995_v39 = vpop.f32.mrb[22].mxu0 }
 0x165   : > { %v3083_v18 = vcombine.high %v3081_v15, %v3081_v15  ;;  %v9084_v19 = vrot.slane %v3082_v60, 9  ;;  %v9085_v45 = vrot.slane %v3081_v15, 9  ;;  %v10964_v59 = vmax.f32 %v3074_v41, %v9083_v49  ;;  %12866 = vst [vmem:[#allocation5_spill] sm:$0xff] %v10995_v39  ;;  %v11054_v24 = vpop.f32.mrb[23].mxu0 }
 0x166   : > { %v8958_v28 = vrot.slane %v1995_v37, 9  ;;  %v10966_v29 = vmax.f32 %v1994_v12, %v8956_v0  ;;  %v10968_v54 = vmax.f32 %v1993_v11, %v8957_v32  ;;  %v2030_v34 = vcombine.high %v1598_v22, %v1598_v22  ;;  %v12865_v11 = vld [vmem:[#allocation11_spill] sm:$0xff]  ;;  %12875 = vst [vmem:[#allocation10_spill] sm:$0xff] %v11054_v24 }
 0x167   : > { %v9086_v53 = vrot.slane %v3083_v18, 9  ;;  %v10970_v40 = vmax.f32 %v3082_v60, %v9084_v19  ;;  %v10972_v33 = vmax.f32 %v3081_v15, %v9085_v45  ;;  %v2037_v21 = vrot.slane %v1598_v22, %v10610_v14 }
 0x168   : > { %v10975_v16 = vmax.f32 %v1995_v37, %v8958_v28  ;;  %v2044_v56 = vrot.slane %v2030_v34, %v10610_v14  ;;  %v1534_v35 = vadd.f32 %v10981_v61, %v12862_v47  ;;  %v1468_v1 = vadd.f32 %v10981_v61, %v12863_v62 }
 0x169   : > { %v10987_v20 = vmax.f32 %v3083_v18, %v9086_v53  ;;  %v2045_v9 = vcombine.high %v2037_v21, %v2037_v21  ;;  %v8967_v23 = vrot.slane %v2037_v21, 9  ;;  %v1532_v8 = vadd.f32 %v10981_v61, %v12864_v63 }
 0x16a   : > { %v2046_v57 = vcombine.high %v2044_v56, %v2044_v56  ;;  %v8969_v38 = vrot.slane %v2044_v56, 9  ;;  %v1662_v42 = vmax.f32 %v1534_v35, 0.0  ;;  %v1596_v46 = vmax.f32 %v1468_v1, 0.0 }
 0x16b   : > { %v8968_v52 = vrot.slane %v2045_v9, 9  ;;  %v10991_v48 = vmax.f32 %v2037_v21, %v8967_v23  ;;  %v1660_v41 = vmax.f32 %v1532_v8, 0.0  ;;  %v1473_v12 = vadd.f32 %v10981_v61, %v12865_v11 }
 0x16c   : > { %v8970_v15 = vrot.slane %v2046_v57, 9  ;;  %v10997_v60 = vmax.f32 %v2044_v56, %v8969_v38  ;;  %v3118_v49 = vcombine.high %v1662_v42, %v1662_v42  ;;  %v3125_v22 = vrot.slane %v1662_v42, %v10610_v14  ;;  %v11012_v38 = vpop.f32.mrb[22].mxu1 }
 0x16d   : > { %v11000_v37 = vmax.f32 %v2045_v9, %v8968_v52  ;;  %v1996_v0 = vcombine.high %v1596_v46, %v1596_v46  ;;  %v2003_v32 = vrot.slane %v1596_v46, %v10610_v14  ;;  %v3084_v18 = vcombine.high %v1660_v41, %v1660_v41  ;;  %12867 = vst [vmem:[#allocation6_spill] sm:$0xff] %v11012_v38 }
 0x16e   : > { %v11003_v19 = vmax.f32 %v2046_v57, %v8970_v15  ;;  %v3132_v45 = vrot.slane %v3118_v49, %v10610_v14  ;;  %v3133_v28 = vcombine.high %v3125_v22, %v3125_v22  ;;  %v9095_v34 = vrot.slane %v3125_v22, 9 }
 0x16f   : > { %v2010_v53 = vrot.slane %v1996_v0, %v10610_v14  ;;  %v2011_v21 = vcombine.high %v2003_v32, %v2003_v32  ;;  %v8959_v56 = vrot.slane %v2003_v32, 9  ;;  %v3091_v47 = vrot.slane %v1660_v41, %v10610_v14 }
 0x170   : > { %v3134_v35 = vcombine.high %v3132_v45, %v3132_v45  ;;  %v9096_v62 = vrot.slane %v3133_v28, 9  ;;  %v9097_v1 = vrot.slane %v3132_v45, 9  ;;  %v11008_v9 = vmax.f32 %v3125_v22, %v9095_v34 }
 0x171   : > { %v2012_v23 = vcombine.high %v2010_v53, %v2010_v53  ;;  %v8960_v63 = vrot.slane %v2011_v21, 9  ;;  %v8961_v8 = vrot.slane %v2010_v53, 9  ;;  %v11010_v57 = vmax.f32 %v2003_v32, %v8959_v56 }
 0x172   : > { %v9098_v42 = vrot.slane %v3134_v35, 9  ;;  %v11014_v46 = vmax.f32 %v3133_v28, %v9096_v62  ;;  %v11016_v52 = vmax.f32 %v3132_v45, %v9097_v1  ;;  %v3098_v11 = vrot.slane %v3084_v18, %v10610_v14  ;;  %v12868_v62 = vld [vmem:[#allocation12_spill] sm:$0xff] }
 0x173   : > { %v8962_v41 = vrot.slane %v2012_v23, 9  ;;  %v11019_v15 = vmax.f32 %v2011_v21, %v8960_v63  ;;  %v11021_v49 = vmax.f32 %v2010_v53, %v8961_v8  ;;  %v3099_v22 = vcombine.high %v3091_v47, %v3091_v47  ;;  %v12870_v53 = vld [vmem:[#allocation13_spill] sm:$0xff] }
 0x174   : > { %v11023_v0 = vmax.f32 %v3134_v35, %v9098_v42  ;;  %v3100_v34 = vcombine.high %v3098_v11, %v3098_v11  ;;  %v9087_v32 = vrot.slane %v3091_v47, 9  ;;  %v9089_v56 = vrot.slane %v3098_v11, 9 }
 0x175   : > { %v11025_v39 = vmax.f32 %v2012_v23, %v8962_v41  ;;  %v9088_v38 = vrot.slane %v3099_v22, 9  ;;  %v1601_v28 = vmax.f32 %v1473_v12, 0.0  ;;  %v1537_v45 = vadd.f32 %v10981_v61, %v12868_v62 }
 0x176   : > { %v9090_v1 = vrot.slane %v3100_v34, 9  ;;  %v11029_v18 = vmax.f32 %v3091_v47, %v9087_v32  ;;  %v11031_v21 = vmax.f32 %v3098_v11, %v9089_v56  ;;  %v1471_v63 = vadd.f32 %v10981_v61, %v12870_v53 }
 0x177   : > { %v11035_v35 = vmax.f32 %v3099_v22, %v9088_v38  ;;  %v2081_v8 = vcombine.high %v1601_v28, %v1601_v28  ;;  %v2088_v42 = vrot.slane %v1601_v28, %v10610_v14  ;;  %v1665_v23 = vmax.f32 %v1537_v45, 0.0 }
 0x178   : > { %12869 = vst [vmem:[#allocation7_spill] sm:$0xff] %v11031_v21  ;;  %v11038_v41 = vmax.f32 %v3100_v34, %v9090_v1  ;;  %v1599_v12 = vmax.f32 %v1471_v63, 0.0  ;;  %v1535_v62 = vadd.f32 %v10981_v61, %v12873_v55  ;;  %v11044_v47 = vadd.f32 %v10981_v61, %v12874_v51 }
 0x179   : > { %12871 = vst [vmem:[#allocation8_spill] sm:$0xff] %v11035_v35  ;;  %v2095_v11 = vrot.slane %v2081_v8, %v10610_v14  ;;  %v2096_v32 = vcombine.high %v2088_v42, %v2088_v42  ;;  %v9219_v56 = vrot.slane %v2088_v42, 9  ;;  %v3169_v38 = vcombine.high %v1665_v23, %v1665_v23 }
 0x17a   : > { %12872 = vst [vmem:[#allocation9_spill] sm:$0xff] %v11038_v41  ;;  %v3176_v22 = vrot.slane %v1665_v23, %v10610_v14  ;;  %v2047_v53 = vcombine.high %v1599_v12, %v1599_v12  ;;  %v2054_v28 = vrot.slane %v1599_v12, %v10610_v14  ;;  %v11049_v34 = vmax.f32 %v1535_v62, 0.0 }
 0x17b   : > { %v2097_v45 = vcombine.high %v2095_v11, %v2095_v11  ;;  %v9220_v1 = vrot.slane %v2096_v32, 9  ;;  %v9221_v63 = vrot.slane %v2095_v11, 9  ;;  %v6347_v55 = vmax.f32 %v2088_v42, %v9219_v56 }
 0x17c   : > { %v3183_v2 = vrot.slane %v3169_v38, %v10610_v14  ;;  %v3184_v51 = vcombine.high %v3176_v22, %v3176_v22  ;;  %v9347_v6 = vrot.slane %v3176_v22, 9  ;;  %v2061_v8 = vrot.slane %v2047_v53, %v10610_v14 }
 0x17d   : > { %v9222_v50 = vrot.slane %v2097_v45, 9  ;;  %v6348_v17 = vmax.f32 %v2096_v32, %v9220_v1  ;;  %v6349_v30 = vmax.f32 %v2095_v11, %v9221_v63  ;;  %v6603_v23 = vmax.f32 %v10923_v36, %v6347_v55 }
 0x17e   : > { %v3185_v12 = vcombine.high %v3183_v2, %v3183_v2  ;;  %v9348_v62 = vrot.slane %v3184_v51, 9  ;;  %v9349_v44 = vrot.slane %v3183_v2, 9  ;;  %v6475_v31 = vmax.f32 %v3176_v22, %v9347_v6 }
 0x17f   : > { %v6350_v41 = vmax.f32 %v2097_v45, %v9222_v50  ;;  %v6604_v42 = vmax.f32 %v10925_v26, %v6348_v17  ;;  %v6605_v56 = vmax.f32 %v10927_v27, %v6349_v30  ;;  %v9737_v38 = vpack.c.bf16 %v6603_v23, %v6603_v23  ;;  %v11062_v17 = vpop.f32.mrb[23].mxu1 }
 0x180   : > { %v9350_v21 = vrot.slane %v3185_v12, 9  ;;  %v6476_v35 = vmax.f32 %v3184_v51, %v9348_v62  ;;  %v6477_v53 = vmax.f32 %v3183_v2, %v9349_v44  ;;  %v6731_v32 = vmax.f32 %v10946_v58, %v6475_v31 }
 0x181   : > { %v6606_v11 = vmax.f32 %v10933_v25, %v6350_v41  ;;  %v9738_v36 = vpack.c.bf16 %v6604_v42, %v6604_v42  ;;  %v9739_v1 = vpack.c.bf16 %v6605_v56, %v6605_v56  ;;  %v7883_v63 = vunpack.c.l.b16 %v9737_v38 }
 0x182   : > { %v6478_v55 = vmax.f32 %v3185_v12, %v9350_v21  ;;  %v6732_v24 = vmax.f32 %v10951_v4, %v6476_v35  ;;  %v6733_v50 = vmax.f32 %v10953_v10, %v6477_v53  ;;  %v9865_v6 = vpack.c.bf16 %v6731_v32, %v6731_v32 }
 0x183   : > { %v9740_v30 = vpack.c.bf16 %v6606_v11, %v6606_v11  ;;  %v7884_v26 = vunpack.c.l.b16 %v9738_v36  ;;  %v7885_v27 = vunpack.c.l.b16 %v9739_v1  ;;  %v2062_v22 = vcombine.high %v2054_v28, %v2054_v28 }
 0x184   : > { %v6734_v44 = vmax.f32 %v10960_v43, %v6478_v55  ;;  %v9866_v31 = vpack.c.bf16 %v6732_v24, %v6732_v24  ;;  %v9867_v2 = vpack.c.bf16 %v6733_v50, %v6733_v50  ;;  %v8011_v25 = vunpack.c.l.b16 %v9865_v6 }
 0x185   : > { %v11065_v58 = vunpack.c.l.b16 %v9740_v30  ;;  %v8164_v41 = vrot.slane %v7884_v26, 7  ;;  %v8166_v21 = vrot.slane %v7885_v27, 6  ;;  %v2063_v45 = vcombine.high %v2061_v8, %v2061_v8 }
 0x186   : > { %v9868_v4 = vpack.c.bf16 %v6734_v44, %v6734_v44  ;;  %v8012_v35 = vunpack.c.l.b16 %v9866_v31  ;;  %v8013_v10 = vunpack.c.l.b16 %v9867_v2  ;;  %v9211_v51 = vrot.slane %v2054_v28, 9 }
 0x187   : > { %v8165_v23 = vsel %vm8116_vm3, %v8164_v41, %v7883_v63  ;;  %v8168_v12 = vrot.slane %v11065_v58, 5  ;;  %v9212_v62 = vrot.slane %v2062_v22, 9  ;;  %v9213_v42 = vrot.slane %v2061_v8, 9 }
 0x188   : > { %v8167_v43 = vsel %vm8119_vm4, %v8166_v21, %v8165_v23  ;;  %v11070_v24 = vunpack.c.l.b16 %v9868_v4  ;;  %v8388_v56 = vrot.slane %v8012_v35, 7  ;;  %v8390_v38 = vrot.slane %v8013_v10, 6 }
 0x189   : > { %v9214_v53 = vrot.slane %v2063_v45, 9  ;;  %v6339_v32 = vmax.f32 %v2054_v28, %v9211_v51  ;;  %v6340_v11 = vmax.f32 %v2062_v22, %v9212_v62  ;;  %v6341_v36 = vmax.f32 %v2061_v8, %v9213_v42 }
 0x18a   : > { %v8389_v1 = vsel %vm8116_vm3, %v8388_v56, %v8011_v25  ;;  %v8392_v55 = vrot.slane %v11070_v24, 5  ;;  %v3135_v63 = vcombine.high %v11049_v34, %v11049_v34  ;;  %v3142_v50 = vrot.slane %v11049_v34, %v10610_v14 }
 0x18b   : > { %v11079_v6 = vsel %vm8119_vm4, %v8390_v38, %v8389_v1  ;;  %v6342_v30 = vmax.f32 %v2063_v45, %v9214_v53  ;;  %v6595_v26 = vmax.f32 %v10962_v5, %v6339_v32  ;;  %v6596_v28 = vmax.f32 %v10966_v29, %v6340_v11 }
 0x18c   : > { %v6597_v8 = vmax.f32 %v10968_v54, %v6341_v36  ;;  %v3149_v27 = vrot.slane %v3135_v63, %v10610_v14  ;;  %v3150_v22 = vcombine.high %v3142_v50, %v3142_v50  ;;  %v9339_v44 = vrot.slane %v3142_v50, 9 }
 0x18d   : > { %v6598_v31 = vmax.f32 %v10975_v16, %v6342_v30  ;;  %v9729_v2 = vpack.c.bf16 %v6595_v26, %v6595_v26  ;;  %v9730_v25 = vpack.c.bf16 %v6596_v28, %v6596_v28  ;;  %v1602_v34 = vmax.f32 %v11044_v47, 0.0 }
 0x18e   : > { %v9731_v41 = vpack.c.bf16 %v6597_v8, %v6597_v8  ;;  %v3151_v21 = vcombine.high %v3149_v27, %v3149_v27  ;;  %v9340_v4 = vrot.slane %v3150_v22, 9  ;;  %v9341_v45 = vrot.slane %v3149_v27, 9 }
 0x18f   : > { %v9732_v35 = vpack.c.bf16 %v6598_v31, %v6598_v31  ;;  %v7875_v5 = vunpack.c.l.b16 %v9729_v2  ;;  %v7876_v10 = vunpack.c.l.b16 %v9730_v25  ;;  %v6467_v29 = vmax.f32 %v3142_v50, %v9339_v44 }
 0x190   : > { %v7877_v51 = vunpack.c.l.b16 %v9731_v41  ;;  %v9342_v54 = vrot.slane %v3151_v21, 9  ;;  %v6468_v23 = vmax.f32 %v3150_v22, %v9340_v4  ;;  %v6469_v62 = vmax.f32 %v3149_v27, %v9341_v45 }
 0x191   : > { %v7878_v42 = vunpack.c.l.b16 %v9732_v35  ;;  %v8150_v56 = vrot.slane %v7876_v10, 7  ;;  %v6723_v16 = vmax.f32 %v10964_v59, %v6467_v29  ;;  %v2098_v38 = vcombine.high %v1602_v34, %v1602_v34  ;;  %v12876_v10 = vld [vmem:[#allocation16_spill] sm:$0xff] }
 0x192   : > { %v8152_v53 = vrot.slane %v7877_v51, 6  ;;  %v6470_v32 = vmax.f32 %v3151_v21, %v9342_v54  ;;  %v6724_v47 = vmax.f32 %v10970_v40, %v6468_v23  ;;  %v6725_v11 = vmax.f32 %v10972_v33, %v6469_v62  ;;  %v11095_v40 = vpop.f32.mrb[24].mxu0  ;;  %v11097_v33 = vpop.f32.mrb[24].mxu1 }
 0x193   : > { %v8151_v36 = vsel %vm8116_vm3, %v8150_v56, %v7875_v5  ;;  %v8154_v1 = vrot.slane %v7878_v42, 5  ;;  %v9857_v63 = vpack.c.bf16 %v6723_v16, %v6723_v16  ;;  %v2105_v50 = vrot.slane %v1602_v34, %v10610_v14 }
 0x194   : > { %v8153_v30 = vsel %vm8119_vm4, %v8152_v53, %v8151_v36  ;;  %v6726_v26 = vmax.f32 %v10987_v20, %v6470_v32  ;;  %v9858_v28 = vpack.c.bf16 %v6724_v47, %v6724_v47  ;;  %v9859_v8 = vpack.c.bf16 %v6725_v11, %v6725_v11  ;;  %v12877_v11 = vld [vmem:[#allocation21_spill] sm:$0xff] }
 0x195   : > { %v8003_v59 = vunpack.c.l.b16 %v9857_v63  ;;  %v2112_v27 = vrot.slane %v2098_v38, %v10610_v14  ;;  %v2113_v22 = vcombine.high %v2105_v50, %v2105_v50  ;;  %v9223_v44 = vrot.slane %v2105_v50, 9 }
 0x196   : > { %v9860_v31 = vpack.c.bf16 %v6726_v26, %v6726_v26  ;;  %v8004_v2 = vunpack.c.l.b16 %v9858_v28  ;;  %v8005_v25 = vunpack.c.l.b16 %v9859_v8  ;;  %v8169_v34 = vsel %vm8122_vm5, %v8168_v12, %v8167_v43 }
 0x197   : > { %v2114_v41 = vcombine.high %v2112_v27, %v2112_v27  ;;  %v9224_v20 = vrot.slane %v2113_v22, 9  ;;  %v9225_v21 = vrot.slane %v2112_v27, 9  ;;  %v6351_v4 = vmax.f32 %v2105_v50, %v9223_v44  ;;  %v11127_v50 = vpop.f32.mrb[25].mxu0 }
 0x198   : > { %v11102_v45 = vunpack.c.l.b16 %v9860_v31  ;;  %v8374_v35 = vrot.slane %v8004_v2, 7  ;;  %v8376_v5 = vrot.slane %v8005_v25, 6  ;;  %v1538_v29 = vadd.f32 %v10981_v61, %v12876_v10 }
 0x199   : > { %v9226_v51 = vrot.slane %v2114_v41, 9  ;;  %v6352_v54 = vmax.f32 %v2113_v22, %v9224_v20  ;;  %v6353_v23 = vmax.f32 %v2112_v27, %v9225_v21  ;;  %v6607_v62 = vmax.f32 %v10991_v48, %v6351_v4 }
 0x19a   : > { %v8375_v58 = vsel %vm8116_vm3, %v8374_v35, %v8003_v59  ;;  %v8378_v12 = vrot.slane %v11102_v45, 5  ;;  %v1666_v43 = vmax.f32 %v1538_v29, 0.0  ;;  %v11113_v42 = vsel %vm8122_vm5, %v8392_v55, %v11079_v6 }
 0x19b   : > { %v11116_v56 = vsel %vm8119_vm4, %v8376_v5, %v8375_v58  ;;  %v6354_v16 = vmax.f32 %v2114_v41, %v9226_v51  ;;  %v6608_v38 = vmax.f32 %v11000_v37, %v6352_v54  ;;  %v6609_v53 = vmax.f32 %v10997_v60, %v6353_v23 }
 0x19c   : > { %v9741_v48 = vpack.c.bf16 %v6607_v62, %v6607_v62  ;;  %v3186_v32 = vcombine.high %v1666_v43, %v1666_v43  ;;  %v3193_v47 = vrot.slane %v1666_v43, %v10610_v14  ;;  %v1472_v36 = vadd.f32 %v10981_v61, %v12877_v11 }
 0x19d   : > { %v6610_v24 = vmax.f32 %v11003_v19, %v6354_v16  ;;  %v9742_v63 = vpack.c.bf16 %v6608_v38, %v6608_v38  ;;  %v9743_v55 = vpack.c.bf16 %v6609_v53, %v6609_v53  ;;  %v11125_v6 = vsel %vm8122_vm5, %v8154_v1, %v8153_v30  ;;  %v11130_v30 = vpop.f32.mrb[25].mxu1 }
 0x19e   : > { %v7887_v26 = vunpack.c.l.b16 %v9741_v48  ;;  %v3200_v37 = vrot.slane %v3186_v32, %v10610_v14  ;;  %v3201_v60 = vcombine.high %v3193_v47, %v3193_v47  ;;  %v9351_v28 = vrot.slane %v3193_v47, 9  ;;  %v11141_v48 = vpop.f32.mrb[26].mxu0 }
 0x19f   : > { %v9744_v8 = vpack.c.bf16 %v6610_v24, %v6610_v24  ;;  %v7888_v59 = vunpack.c.l.b16 %v9742_v63  ;;  %v7889_v27 = vunpack.c.l.b16 %v9743_v55  ;;  %v1600_v22 = vmax.f32 %v1472_v36, 0.0  ;;  %v11144_v55 = vpop.f32.mrb[26].mxu1 }
 0x1a0   : > { %v8170_v44 = vrot.slane %v7887_v26, 4  ;;  %v3202_v31 = vcombine.high %v3200_v37, %v3200_v37  ;;  %v9352_v2 = vrot.slane %v3201_v60, 9  ;;  %v9353_v19 = vrot.slane %v3200_v37, 9  ;;  %12878 = vst [vmem:[#allocation11_spill] sm:$0xff] %v11144_v55 }
 0x1a1   : > { %v7890_v25 = vunpack.c.l.b16 %v9744_v8  ;;  %v8172_v41 = vrot.slane %v7888_v59, 3  ;;  %v8174_v20 = vrot.slane %v7889_v27, 2  ;;  %v6479_v1 = vmax.f32 %v3193_v47, %v9351_v28 }
 0x1a2   : > { %v8171_v21 = vsel %vm8125_vm6, %v8170_v44, %v8169_v34  ;;  %v9354_v4 = vrot.slane %v3202_v31, 9  ;;  %v6480_v35 = vmax.f32 %v3201_v60, %v9352_v2  ;;  %v6481_v5 = vmax.f32 %v3200_v37, %v9353_v19 }
 0x1a3   : > { %v8173_v10 = vsel %vm8128_vm7, %v8172_v41, %v8171_v21  ;;  %v8176_v29 = vrot.slane %v7890_v25, 1  ;;  %v6735_v51 = vmax.f32 %v11008_v9, %v6479_v1  ;;  %v2064_v54 = vcombine.high %v1600_v22, %v1600_v22 }
 0x1a4   : > { %v8175_v23 = vsel %vm8131_vm8, %v8174_v20, %v8173_v10  ;;  %v6482_v62 = vmax.f32 %v3202_v31, %v9354_v4  ;;  %v6736_v58 = vmax.f32 %v11014_v46, %v6480_v35  ;;  %v6737_v43 = vmax.f32 %v11016_v52, %v6481_v5  ;;  %v11151_v20 = vpop.f32.mrb[27].mxu0 }
 0x1a5   : > { %v8177_v16 = vsel %vm8134_vm9, %v8176_v29, %v8175_v23  ;;  %v9869_v34 = vpack.c.bf16 %v6735_v51, %v6735_v51  ;;  %v2071_v38 = vrot.slane %v1600_v22, %v10610_v14  ;;  %v2078_v53 = vrot.slane %v2064_v54, %v10610_v14  ;;  %12879 = vst [vmem:[#allocation12_spill] sm:$0xff] %v11151_v20 }
 0x1a6   : > { %v8573_v32 = vpack.c.b16 %v8177_v16, %v8177_v16  ;;  %v6738_v9 = vmax.f32 %v11023_v0, %v6482_v62  ;;  %v9870_v47 = vpack.c.bf16 %v6736_v58, %v6736_v58  ;;  %v9871_v11 = vpack.c.bf16 %v6737_v43, %v6737_v43 }
 0x1a7   : > { %v8015_v36 = vunpack.c.l.b16 %v9869_v34  ;;  %v2079_v24 = vcombine.high %v2071_v38, %v2071_v38  ;;  %v2080_v46 = vcombine.high %v2078_v53, %v2078_v53  ;;  %v9215_v63 = vrot.slane %v2071_v38, 9 }
 0x1a8   : > { %8638 = vst.msk [vmem:[%s10873_s18 + $0xc] sm:$0xf] %vm8634_vm10, %v8573_v32  ;;  %v9872_v52 = vpack.c.bf16 %v6738_v9, %v6738_v9  ;;  %v8016_v26 = vunpack.c.l.b16 %v9870_v47  ;;  %v8017_v37 = vunpack.c.l.b16 %v9871_v11  ;;  %v9217_v60 = vrot.slane %v2078_v53, 9 }
 0x1a9   : > { %v8394_v28 = vrot.slane %v8015_v36, 4  ;;  %v9216_v8 = vrot.slane %v2079_v24, 9  ;;  %v9218_v59 = vrot.slane %v2080_v46, 9  ;;  %v6343_v27 = vmax.f32 %v2071_v38, %v9215_v63 }
 0x1aa   : > { %v8018_v22 = vunpack.c.l.b16 %v9872_v52  ;;  %v8396_v0 = vrot.slane %v8016_v26, 3  ;;  %v8398_v44 = vrot.slane %v8017_v37, 2  ;;  %v6345_v31 = vmax.f32 %v2078_v53, %v9217_v60 }
 0x1ab   : > { %v8395_v2 = vsel %vm8125_vm6, %v8394_v28, %v11113_v42  ;;  %v6344_v19 = vmax.f32 %v2079_v24, %v9216_v8  ;;  %v6346_v25 = vmax.f32 %v2080_v46, %v9218_v59  ;;  %v6599_v41 = vmax.f32 %v11010_v57, %v6343_v27 }
 0x1ac   : > { %v8397_v1 = vsel %vm8128_vm7, %v8396_v0, %v8395_v2  ;;  %v8400_v21 = vrot.slane %v8018_v22, 1  ;;  %v6601_v4 = vmax.f32 %v11021_v49, %v6345_v31  ;;  %v1536_v35 = vadd.f32 %v10981_v61, %v10780_v13 }
 0x1ad   : > { %v8399_v5 = vsel %vm8131_vm8, %v8398_v44, %v8397_v1  ;;  %v6600_v10 = vmax.f32 %v11019_v15, %v6344_v19  ;;  %v6602_v42 = vmax.f32 %v11025_v39, %v6346_v25  ;;  %v9733_v29 = vpack.c.bf16 %v6599_v41, %v6599_v41  ;;  %v12881_v25 = vld [vmem:[#allocation8_spill] sm:$0xff]  ;;  %v12882_v1 = vld [vmem:[#allocation7_spill] sm:$0xff] }
 0x1ae   : > { %v8401_v57 = vsel %vm8134_vm9, %v8400_v21, %v8399_v5  ;;  %v9735_v51 = vpack.c.bf16 %v6601_v4, %v6601_v4  ;;  %v1664_v54 = vmax.f32 %v1536_v35, 0.0  ;;  %v11165_v49 = vsel %vm8122_vm5, %v8378_v12, %v11116_v56  ;;  %v11174_v12 = vpop.f32.mrb[27].mxu1 }
 0x1af   : > { %v8589_v23 = vpack.c.b16 %v8401_v57, %v8401_v57  ;;  %v9734_v13 = vpack.c.bf16 %v6600_v10, %v6600_v10  ;;  %v9736_v62 = vpack.c.bf16 %v6602_v42, %v6602_v42  ;;  %v7879_v58 = vunpack.c.l.b16 %v9733_v29  ;;  %12880 = vst [vmem:[#allocation13_spill] sm:$0xff] %v11174_v12  ;;  %v11187_v42 = vpop.f32.mrb[28].mxu0  ;;  %v11189_v29 = vpop.f32.mrb[28].mxu1 }
 0x1b0   : > { %v7881_v43 = vunpack.c.l.b16 %v9735_v51  ;;  %v3152_v16 = vcombine.high %v1664_v54, %v1664_v54  ;;  %v3159_v15 = vrot.slane %v1664_v54, %v10610_v14  ;;  %v1477_v39 = vadd.f32 %v10981_v61, %v10816_v7  ;;  %12883 = vst [vmem:[#allocation14_spill] sm:$0xff] %v11187_v42  ;;  %12884 = vst [vmem:[#allocation15_spill] sm:$0xff] %v11189_v29 }
 0x1b1   : > { %8654 = vst.msk [vmem:[%s10873_s18 + $0x4c] sm:$0xf] %vm8634_vm10, %v8589_v23  ;;  %v7880_v34 = vunpack.c.l.b16 %v9734_v13  ;;  %v7882_v38 = vunpack.c.l.b16 %v9736_v62  ;;  %v8156_v53 = vrot.slane %v7879_v58, 4  ;;  %v1541_v45 = vadd.f32 %v10981_v61, %v10819_v3 }
 0x1b2   : > { %v8160_v56 = vrot.slane %v7881_v43, 2  ;;  %v3166_v32 = vrot.slane %v3152_v16, %v10610_v14  ;;  %v3167_v9 = vcombine.high %v3159_v15, %v3159_v15  ;;  %v9343_v47 = vrot.slane %v3159_v15, 9 }
 0x1b3   : > { %v8157_v11 = vsel %vm8125_vm6, %v8156_v53, %v11125_v6  ;;  %v8158_v36 = vrot.slane %v7880_v34, 3  ;;  %v8162_v7 = vrot.slane %v7882_v38, 1  ;;  %v1605_v24 = vmax.f32 %v1477_v39, 0.0 }
 0x1b4   : > { %v3168_v46 = vcombine.high %v3166_v32, %v3166_v32  ;;  %v9344_v63 = vrot.slane %v3167_v9, 9  ;;  %v9345_v52 = vrot.slane %v3166_v32, 9  ;;  %v6471_v26 = vmax.f32 %v3159_v15, %v9343_v47 }
 0x1b5   : > { %v8159_v37 = vsel %vm8128_vm7, %v8158_v36, %v8157_v11  ;;  %v2149_v3 = vcombine.high %v1605_v24, %v1605_v24  ;;  %v2156_v60 = vrot.slane %v1605_v24, %v10610_v14  ;;  %v1669_v28 = vmax.f32 %v1541_v45, 0.0  ;;  %v12887_v36 = vld [vmem:[#allocation22_spill] sm:$0xff] }
 0x1b6   : > { %v8161_v8 = vsel %vm8131_vm8, %v8160_v56, %v8159_v37  ;;  %v9346_v59 = vrot.slane %v3168_v46, 9  ;;  %v6472_v27 = vmax.f32 %v3167_v9, %v9344_v63  ;;  %v6473_v22 = vmax.f32 %v3166_v32, %v9345_v52  ;;  %v11203_v32 = vpop.f32.mrb[29].mxu0 }
 0x1b7   : > { %v8163_v6 = vsel %vm8134_vm9, %v8162_v7, %v8161_v8  ;;  %v6727_v0 = vmax.f32 %v11029_v18, %v6471_v26  ;;  %v2163_v44 = vrot.slane %v2149_v3, %v10610_v14  ;;  %v2164_v31 = vcombine.high %v2156_v60, %v2156_v60  ;;  %v12885_v18 = vld [vmem:[#allocation9_spill] sm:$0xff]  ;;  %12886 = vst [vmem:[#allocation16_spill] sm:$0xff] %v11203_v32 }
 0x1b8   : > { %v8572_v2 = vpack.c.b16 %v8163_v6, %v8163_v6  ;;  %v6474_v19 = vmax.f32 %v3168_v46, %v9346_v59  ;;  %v6728_v41 = vmax.f32 %v12881_v25, %v6472_v27  ;;  %v6729_v21 = vmax.f32 %v12882_v1, %v6473_v22 }
 0x1b9   : > { %v9861_v4 = vpack.c.bf16 %v6727_v0, %v6727_v0  ;;  %v2165_v35 = vcombine.high %v2163_v44, %v2163_v44  ;;  %v8979_v5 = vrot.slane %v2156_v60, 9  ;;  %v8980_v10 = vrot.slane %v2164_v31, 9 }
 0x1ba   : > { %8637 = vst.msk [vmem:[%s10873_s18 + $0x8] sm:$0xf] %vm8634_vm10, %v8572_v2  ;;  %v6730_v57 = vmax.f32 %v12885_v18, %v6474_v19  ;;  %v9862_v51 = vpack.c.bf16 %v6728_v41, %v6728_v41  ;;  %v9863_v54 = vpack.c.bf16 %v6729_v21, %v6729_v21  ;;  %v8981_v23 = vrot.slane %v2163_v44, 9  ;;  %v12890_v18 = vld [vmem:[#allocation25_spill] sm:$0xff] }
 0x1bb   : > { %v8007_v13 = vunpack.c.l.b16 %v9861_v4  ;;  %v8982_v62 = vrot.slane %v2165_v35, 9  ;;  %v11194_v58 = vmax.f32 %v2156_v60, %v8979_v5  ;;  %v11196_v43 = vmax.f32 %v2164_v31, %v8980_v10  ;;  %v12888_v60 = vld [vmem:[#allocation23_spill] sm:$0xff]  ;;  %v12889_v5 = vld [vmem:[#allocation24_spill] sm:$0xff] }
 0x1bc   : > { %v9864_v16 = vpack.c.bf16 %v6730_v57, %v6730_v57  ;;  %v8008_v15 = vunpack.c.l.b16 %v9862_v51  ;;  %v8009_v39 = vunpack.c.l.b16 %v9863_v54  ;;  %v11198_v34 = vmax.f32 %v2163_v44, %v8981_v23  ;;  %v12891_v51 = vld [vmem:[#allocation26_spill] sm:$0xff] }
 0x1bd   : > { %v8380_v38 = vrot.slane %v8007_v13, 4  ;;  %v11200_v53 = vmax.f32 %v2165_v35, %v8982_v62  ;;  %v3237_v45 = vcombine.high %v1669_v28, %v1669_v28  ;;  %v3244_v56 = vrot.slane %v1669_v28, %v10610_v14 }
 0x1be   : > { %v8010_v9 = vunpack.c.l.b16 %v9864_v16  ;;  %v8382_v47 = vrot.slane %v8008_v15, 3  ;;  %v8384_v11 = vrot.slane %v8009_v39, 2  ;;  %v1475_v7 = vadd.f32 %v10981_v61, %v12887_v36  ;;  %v11235_v15 = vpop.f32.mrb[29].mxu1 }
 0x1bf   : > { %v8381_v24 = vsel %vm8125_vm6, %v8380_v38, %v11165_v49  ;;  %v3251_v46 = vrot.slane %v3237_v45, %v10610_v14  ;;  %v3252_v63 = vcombine.high %v3244_v56, %v3244_v56  ;;  %v9107_v52 = vrot.slane %v3244_v56, 9  ;;  %12892 = vst [vmem:[#allocation21_spill] sm:$0xff] %v11235_v15 }
 0x1c0   : > { %v8383_v26 = vsel %vm8128_vm7, %v8382_v47, %v8381_v24  ;;  %v8386_v37 = vrot.slane %v8010_v9, 1  ;;  %v1603_v3 = vmax.f32 %v1475_v7, 0.0  ;;  %v1539_v28 = vadd.f32 %v10981_v61, %v12888_v60 }
 0x1c1   : > { %v8385_v8 = vsel %vm8131_vm8, %v8384_v11, %v8383_v26  ;;  %v3253_v59 = vcombine.high %v3251_v46, %v3251_v46  ;;  %v9108_v27 = vrot.slane %v3252_v63, 9  ;;  %v9109_v22 = vrot.slane %v3251_v46, 9 }
 0x1c2   : > { %v8387_v6 = vsel %vm8134_vm9, %v8386_v37, %v8385_v8  ;;  %v11215_v49 = vmax.f32 %v3244_v56, %v9107_v52  ;;  %v2115_v0 = vcombine.high %v1603_v3, %v1603_v3  ;;  %v2122_v44 = vrot.slane %v1603_v3, %v10610_v14 }
 0x1c3   : > { %v8588_v31 = vpack.c.b16 %v8387_v6, %v8387_v6  ;;  %v9110_v2 = vrot.slane %v3253_v59, 9  ;;  %v11218_v19 = vmax.f32 %v3252_v63, %v9108_v27  ;;  %v11220_v25 = vmax.f32 %v3251_v46, %v9109_v22 }
 0x1c4   : > { %v2129_v41 = vrot.slane %v2115_v0, %v10610_v14  ;;  %v2130_v1 = vcombine.high %v2122_v44, %v2122_v44  ;;  %v8971_v21 = vrot.slane %v2122_v44, 9  ;;  %v1667_v4 = vmax.f32 %v1539_v28, 0.0 }
 0x1c5   : > { %8653 = vst.msk [vmem:[%s10873_s18 + $0x48] sm:$0xf] %vm8634_vm10, %v8588_v31  ;;  %v11225_v35 = vmax.f32 %v3253_v59, %v9110_v2  ;;  %v1478_v10 = vadd.f32 %v10981_v61, %v12889_v5  ;;  %v1542_v57 = vadd.f32 %v10981_v61, %v12890_v18  ;;  %v1476_v54 = vadd.f32 %v10981_v61, %v12891_v51 }
 0x1c6   : > { %v2131_v23 = vcombine.high %v2129_v41, %v2129_v41  ;;  %v8972_v13 = vrot.slane %v2130_v1, 9  ;;  %v8973_v62 = vrot.slane %v2129_v41, 9  ;;  %v11233_v16 = vmax.f32 %v2122_v44, %v8971_v21  ;;  %v11251_v44 = vpop.f32.mrb[30].mxu0 }
 0x1c7   : > { %v3203_v39 = vcombine.high %v1667_v4, %v1667_v4  ;;  %v3210_v38 = vrot.slane %v1667_v4, %v10610_v14  ;;  %v1606_v45 = vmax.f32 %v1478_v10, 0.0  ;;  %v1670_v56 = vmax.f32 %v1542_v57, 0.0  ;;  %12893 = vst [vmem:[#allocation8_spill] sm:$0xff] %v11251_v44  ;;  %v11310_v55 = vpop.f32.mrb[31].mxu0 }
 0x1c8   : > { %v8974_v9 = vrot.slane %v2131_v23, 9  ;;  %v11238_v47 = vmax.f32 %v2130_v1, %v8972_v13  ;;  %v11240_v11 = vmax.f32 %v2129_v41, %v8973_v62  ;;  %v1604_v36 = vmax.f32 %v1476_v54, 0.0  ;;  %12899 = vst [vmem:[#allocation9_spill] sm:$0xff] %v11310_v55 }
 0x1c9   : > { %v3217_v7 = vrot.slane %v3203_v39, %v10610_v14  ;;  %v3218_v24 = vcombine.high %v3210_v38, %v3210_v38  ;;  %v9099_v46 = vrot.slane %v3210_v38, 9  ;;  %v2166_v63 = vcombine.high %v1606_v45, %v1606_v45 }
 0x1ca   : > { %v11243_v52 = vmax.f32 %v2131_v23, %v8974_v9  ;;  %v2173_v26 = vrot.slane %v1606_v45, %v10610_v14  ;;  %v3254_v37 = vcombine.high %v1670_v56, %v1670_v56  ;;  %v3261_v3 = vrot.slane %v1670_v56, %v10610_v14 }
 0x1cb   : > { %v3219_v60 = vcombine.high %v3217_v7, %v3217_v7  ;;  %v9100_v28 = vrot.slane %v3218_v24, 9  ;;  %v9101_v8 = vrot.slane %v3217_v7, 9  ;;  %v11247_v59 = vmax.f32 %v3210_v38, %v9099_v46 }
 0x1cc   : > { %v2180_v27 = vrot.slane %v2166_v63, %v10610_v14  ;;  %v2181_v22 = vcombine.high %v2173_v26, %v2173_v26  ;;  %v8983_v6 = vrot.slane %v2173_v26, 9  ;;  %v3268_v0 = vrot.slane %v3254_v37, %v10610_v14  ;;  %v12894_v63 = vld [vmem:[#allocation27_spill] sm:$0xff] }
 0x1cd   : > { %v9102_v31 = vrot.slane %v3219_v60, 9  ;;  %v11253_v2 = vmax.f32 %v3218_v24, %v9100_v28  ;;  %v11255_v41 = vmax.f32 %v3217_v7, %v9101_v8  ;;  %v3269_v1 = vcombine.high %v3261_v3, %v3261_v3  ;;  %v12895_v28 = vld [vmem:[#allocation17_spill] sm:$0xff]  ;;  %v12896_v8 = vld [vmem:[#allocation18_spill] sm:$0xff] }
 0x1ce   : > { %v2182_v21 = vcombine.high %v2180_v27, %v2180_v27  ;;  %v8984_v4 = vrot.slane %v2181_v22, 9  ;;  %v8985_v5 = vrot.slane %v2180_v27, 9  ;;  %v11257_v10 = vmax.f32 %v2173_v26, %v8983_v6 }
 0x1cf   : > { %v11259_v18 = vmax.f32 %v3219_v60, %v9102_v31  ;;  %v3270_v57 = vcombine.high %v3268_v0, %v3268_v0  ;;  %v9111_v51 = vrot.slane %v3261_v3, 9  ;;  %v9112_v54 = vrot.slane %v3269_v1, 9 }
 0x1d0   : > { %v8986_v23 = vrot.slane %v2182_v21, 9  ;;  %v11261_v13 = vmax.f32 %v2181_v22, %v8984_v4  ;;  %v11263_v62 = vmax.f32 %v2180_v27, %v8985_v5  ;;  %v9113_v39 = vrot.slane %v3268_v0, 9 }
 0x1d1   : > { %v9114_v38 = vrot.slane %v3270_v57, 9  ;;  %v11265_v45 = vmax.f32 %v3261_v3, %v9111_v51  ;;  %v11267_v56 = vmax.f32 %v3269_v1, %v9112_v54  ;;  %v2132_v9 = vcombine.high %v1604_v36, %v1604_v36 }
 0x1d2   : > { %v11269_v7 = vmax.f32 %v2182_v21, %v8986_v23  ;;  %v11271_v24 = vmax.f32 %v3268_v0, %v9113_v39  ;;  %v2139_v46 = vrot.slane %v1604_v36, %v10610_v14  ;;  %v1540_v26 = vadd.f32 %v10981_v61, %v12894_v63  ;;  %v12897_v0 = vld [vmem:[#allocation19_spill] sm:$0xff]  ;;  %v11288_v39 = vpop.f32.mrb[30].mxu1 }
 0x1d3   : > { %v11276_v37 = vmax.f32 %v3270_v57, %v9114_v38  ;;  %v2146_v60 = vrot.slane %v2132_v9, %v10610_v14  ;;  %v1481_v3 = vadd.f32 %v10981_v61, %v12895_v28  ;;  %v1545_v27 = vadd.f32 %v10981_v61, %v12896_v8  ;;  %12898 = vst [vmem:[#allocation7_spill] sm:$0xff] %v11288_v39 }
 0x1d4   : > { %v2147_v22 = vcombine.high %v2139_v46, %v2139_v46  ;;  %v8975_v6 = vrot.slane %v2139_v46, 9  ;;  %v1668_v31 = vmax.f32 %v1540_v26, 0.0  ;;  %v1479_v1 = vadd.f32 %v10981_v61, %v12897_v0 }
 0x1d5   : > { %v2148_v36 = vcombine.high %v2146_v60, %v2146_v60  ;;  %v8977_v21 = vrot.slane %v2146_v60, 9  ;;  %v1609_v4 = vmax.f32 %v1481_v3, 0.0  ;;  %v1673_v5 = vmax.f32 %v1545_v27, 0.0 }
 0x1d6   : > { %v8976_v57 = vrot.slane %v2147_v22, 9  ;;  %v11285_v51 = vmax.f32 %v2139_v46, %v8975_v6  ;;  %v3220_v54 = vcombine.high %v1668_v31, %v1668_v31  ;;  %v3227_v23 = vrot.slane %v1668_v31, %v10610_v14 }
 0x1d7   : > { %v8978_v38 = vrot.slane %v2148_v36, 9  ;;  %v11290_v9 = vmax.f32 %v2146_v60, %v8977_v21  ;;  %v2217_v63 = vcombine.high %v1609_v4, %v1609_v4  ;;  %v2224_v26 = vrot.slane %v1609_v4, %v10610_v14 }
 0x1d8   : > { %v11293_v28 = vmax.f32 %v2147_v22, %v8976_v57  ;;  %v3234_v61 = vrot.slane %v3220_v54, %v10610_v14  ;;  %v3235_v3 = vcombine.high %v3227_v23, %v3227_v23  ;;  %v9103_v8 = vrot.slane %v3227_v23, 9 }
 0x1d9   : > { %v11296_v27 = vmax.f32 %v2148_v36, %v8978_v38  ;;  %v2231_v46 = vrot.slane %v2217_v63, %v10610_v14  ;;  %v2232_v6 = vcombine.high %v2224_v26, %v2224_v26  ;;  %v9235_v31 = vrot.slane %v2224_v26, 9 }
 0x1da   : > { %v3236_v0 = vcombine.high %v3234_v61, %v3234_v61  ;;  %v9104_v39 = vrot.slane %v3235_v3, 9  ;;  %v9105_v44 = vrot.slane %v3234_v61, 9  ;;  %v11299_v60 = vmax.f32 %v3227_v23, %v9103_v8 }
 0x1db   : > { %v2233_v21 = vcombine.high %v2231_v46, %v2231_v46  ;;  %v9236_v15 = vrot.slane %v2232_v6, 9  ;;  %v9237_v4 = vrot.slane %v2231_v46, 9  ;;  %v6363_v22 = vmax.f32 %v2224_v26, %v9235_v31 }
 0x1dc   : > { %v9106_v57 = vrot.slane %v3236_v0, 9  ;;  %v11301_v32 = vmax.f32 %v3235_v3, %v9104_v39  ;;  %v11303_v54 = vmax.f32 %v3234_v61, %v9105_v44  ;;  %v3305_v36 = vcombine.high %v1673_v5, %v1673_v5 }
 0x1dd   : > { %v9238_v38 = vrot.slane %v2233_v21, 9  ;;  %v6364_v29 = vmax.f32 %v2232_v6, %v9236_v15  ;;  %v6365_v63 = vmax.f32 %v2231_v46, %v9237_v4  ;;  %v6619_v42 = vmax.f32 %v11194_v58, %v6363_v22 }
 0x1de   : > { %v11306_v12 = vmax.f32 %v3236_v0, %v9106_v57  ;;  %v3312_v23 = vrot.slane %v1673_v5, %v10610_v14  ;;  %v3319_v8 = vrot.slane %v3305_v36, %v10610_v14  ;;  %v1607_v20 = vmax.f32 %v1479_v1, 0.0 }
 0x1df   : > { %v6366_v26 = vmax.f32 %v2233_v21, %v9238_v38  ;;  %v6620_v39 = vmax.f32 %v11196_v43, %v6364_v29  ;;  %v6621_v44 = vmax.f32 %v11198_v34, %v6365_v63  ;;  %v9753_v61 = vpack.c.bf16 %v6619_v42, %v6619_v42 }
 0x1e0   : > { %v3320_v3 = vcombine.high %v3312_v23, %v3312_v23  ;;  %v3321_v15 = vcombine.high %v3319_v8, %v3319_v8  ;;  %v9363_v46 = vrot.slane %v3312_v23, 9  ;;  %v9365_v6 = vrot.slane %v3319_v8, 9 }
 0x1e1   : > { %v6622_v58 = vmax.f32 %v11200_v53, %v6366_v26  ;;  %v9754_v31 = vpack.c.bf16 %v6620_v39, %v6620_v39  ;;  %v9755_v0 = vpack.c.bf16 %v6621_v44, %v6621_v44  ;;  %v7899_v5 = vunpack.c.l.b16 %v9753_v61 }
 0x1e2   : > { %v9364_v4 = vrot.slane %v3320_v3, 9  ;;  %v9366_v22 = vrot.slane %v3321_v15, 9  ;;  %v6491_v1 = vmax.f32 %v3312_v23, %v9363_v46  ;;  %v6493_v57 = vmax.f32 %v3319_v8, %v9365_v6 }
 0x1e3   : > { %v9756_v36 = vpack.c.bf16 %v6622_v58, %v6622_v58  ;;  %v7900_v21 = vunpack.c.l.b16 %v9754_v31  ;;  %v7901_v38 = vunpack.c.l.b16 %v9755_v0  ;;  %v2183_v29 = vcombine.high %v1607_v20, %v1607_v20 }
 0x1e4   : > { %v6492_v43 = vmax.f32 %v3320_v3, %v9364_v4  ;;  %v6494_v34 = vmax.f32 %v3321_v15, %v9366_v22  ;;  %v6747_v42 = vmax.f32 %v11215_v49, %v6491_v1  ;;  %v6749_v63 = vmax.f32 %v11220_v25, %v6493_v57  ;;  %v11325_v25 = vpop.f32.mrb[31].mxu1  ;;  %v11335_v57 = vld [vmem:[%s12822_s2] ss:$0 sm:$0xff] }
 0x1e5   : > { %v11317_v55 = vunpack.c.l.b16 %v9756_v36  ;;  %v8192_v53 = vrot.slane %v7900_v21, 7  ;;  %v8194_v26 = vrot.slane %v7901_v38, 6  ;;  %v2190_v39 = vrot.slane %v1607_v20, %v10610_v14  ;;  %v12900_v36 = vld [vmem:[#allocation20_spill] sm:$0xff] }
 0x1e6   : > { %v6748_v44 = vmax.f32 %v11218_v19, %v6492_v43  ;;  %v6750_v23 = vmax.f32 %v11225_v35, %v6494_v34  ;;  %v9881_v8 = vpack.c.bf16 %v6747_v42, %v6747_v42  ;;  %v9883_v61 = vpack.c.bf16 %v6749_v63, %v6749_v63 }
 0x1e7   : > { %v8193_v46 = vsel %vm8116_vm3, %v8192_v53, %v7899_v5  ;;  %v8196_v3 = vrot.slane %v11317_v55, 5  ;;  %v2197_v49 = vrot.slane %v2183_v29, %v10610_v14  ;;  %v2198_v15 = vcombine.high %v2190_v39, %v2190_v39 }
 0x1e8   : > { %v11328_v6 = vsel %vm8119_vm4, %v8194_v26, %v8193_v46  ;;  %v9882_v58 = vpack.c.bf16 %v6748_v44, %v6748_v44  ;;  %v9884_v20 = vpack.c.bf16 %v6750_v23, %v6750_v23  ;;  %v8027_v31 = vunpack.c.l.b16 %v9881_v8 }
 0x1e9   : > { %v8029_v19 = vunpack.c.l.b16 %v9883_v61  ;;  %v2199_v0 = vcombine.high %v2197_v49, %v2197_v49  ;;  %v9227_v35 = vrot.slane %v2190_v39, 9  ;;  %v9228_v4 = vrot.slane %v2198_v15, 9  ;;  %v12901_v61 = vld [vmem:[#allocation5_spill] sm:$0xff] }
 0x1ea   : > { %v8028_v22 = vunpack.c.l.b16 %v9882_v58  ;;  %v11330_v1 = vunpack.c.l.b16 %v9884_v20  ;;  %v9229_v5 = vrot.slane %v2197_v49, 9  ;;  %v1543_v21 = vadd.f32 %v11335_v57, %v12900_v36 }
 0x1eb   : > { %v8418_v38 = vrot.slane %v8029_v19, 6  ;;  %v9230_v29 = vrot.slane %v2199_v0, 9  ;;  %v6355_v43 = vmax.f32 %v2190_v39, %v9227_v35  ;;  %v6356_v34 = vmax.f32 %v2198_v15, %v9228_v4 }
 0x1ec   : > { %v8416_v42 = vrot.slane %v8028_v22, 7  ;;  %v8420_v63 = vrot.slane %v11330_v1, 5  ;;  %v6357_v53 = vmax.f32 %v2197_v49, %v9229_v5  ;;  %v1671_v26 = vmax.f32 %v1543_v21, 0.0 }
 0x1ed   : > { %v6358_v44 = vmax.f32 %v2199_v0, %v9230_v29  ;;  %v6611_v23 = vmax.f32 %v11233_v16, %v6355_v43  ;;  %v6612_v8 = vmax.f32 %v11238_v47, %v6356_v34  ;;  %v1482_v46 = vadd.f32 %v11335_v57, %v12901_v61 }
 0x1ee   : > { %v8417_v58 = vsel %vm8116_vm3, %v8416_v42, %v8027_v31  ;;  %v6613_v20 = vmax.f32 %v11240_v11, %v6357_v53  ;;  %v3271_v19 = vcombine.high %v1671_v26, %v1671_v26  ;;  %v3278_v39 = vrot.slane %v1671_v26, %v10610_v14 }
 0x1ef   : > { %v11348_v15 = vsel %vm8119_vm4, %v8418_v38, %v8417_v58  ;;  %v6614_v49 = vmax.f32 %v11243_v52, %v6358_v44  ;;  %v9745_v0 = vpack.c.bf16 %v6611_v23, %v6611_v23  ;;  %v9746_v35 = vpack.c.bf16 %v6612_v8, %v6612_v8 }
 0x1f0   : > { %v9747_v16 = vpack.c.bf16 %v6613_v20, %v6613_v20  ;;  %v3285_v47 = vrot.slane %v3271_v19, %v10610_v14  ;;  %v3286_v4 = vcombine.high %v3278_v39, %v3278_v39  ;;  %v9355_v22 = vrot.slane %v3278_v39, 9 }
 0x1f1   : > { %v9748_v5 = vpack.c.bf16 %v6614_v49, %v6614_v49  ;;  %v7891_v36 = vunpack.c.l.b16 %v9745_v0  ;;  %v7892_v31 = vunpack.c.l.b16 %v9746_v35  ;;  %v1610_v21 = vmax.f32 %v1482_v46, 0.0  ;;  %v11361_v35 = vpop.f32.mrb[32].mxu0 }
 0x1f2   : > { %v7893_v11 = vunpack.c.l.b16 %v9747_v16  ;;  %v3287_v29 = vcombine.high %v3285_v47, %v3285_v47  ;;  %v9356_v43 = vrot.slane %v3286_v4, 9  ;;  %v9357_v34 = vrot.slane %v3285_v47, 9 }
 0x1f3   : > { %v11352_v42 = vunpack.c.l.b16 %v9748_v5  ;;  %v8178_v38 = vrot.slane %v7892_v31, 7  ;;  %v6483_v53 = vmax.f32 %v3278_v39, %v9355_v22  ;;  %v2234_v52 = vcombine.high %v1610_v21, %v1610_v21 }
 0x1f4   : > { %v8180_v26 = vrot.slane %v7893_v11, 6  ;;  %v9358_v44 = vrot.slane %v3287_v29, 9  ;;  %v6484_v23 = vmax.f32 %v3286_v4, %v9356_v43  ;;  %v6485_v8 = vmax.f32 %v3285_v47, %v9357_v34 }
 0x1f5   : > { %v8179_v61 = vsel %vm8116_vm3, %v8178_v38, %v7891_v36  ;;  %v8182_v58 = vrot.slane %v11352_v42, 5  ;;  %v6739_v20 = vmax.f32 %v11247_v59, %v6483_v53  ;;  %v2241_v46 = vrot.slane %v1610_v21, %v10610_v14 }
 0x1f6   : > { %v8181_v19 = vsel %vm8119_vm4, %v8180_v26, %v8179_v61  ;;  %v6486_v49 = vmax.f32 %v3287_v29, %v9358_v44  ;;  %v6740_v0 = vmax.f32 %v11253_v2, %v6484_v23  ;;  %v6741_v39 = vmax.f32 %v11255_v41, %v6485_v8  ;;  %v11369_v29 = vpop.f32.mrb[32].mxu1  ;;  %v12902_v26 = vld [vmem:[#allocation6_spill] sm:$0xff] }
 0x1f7   : > { %v9873_v16 = vpack.c.bf16 %v6739_v20, %v6739_v20  ;;  %v2248_v47 = vrot.slane %v2234_v52, %v10610_v14  ;;  %v2249_v4 = vcombine.high %v2241_v46, %v2241_v46  ;;  %v9239_v22 = vrot.slane %v2241_v46, 9 }
 0x1f8   : > { %v6742_v5 = vmax.f32 %v11259_v18, %v6486_v49  ;;  %v9874_v36 = vpack.c.bf16 %v6740_v0, %v6740_v0  ;;  %v9875_v59 = vpack.c.bf16 %v6741_v39, %v6741_v39  ;;  %v8197_v31 = vsel %vm8122_vm5, %v8196_v3, %v11328_v6 }
 0x1f9   : > { %v8019_v21 = vunpack.c.l.b16 %v9873_v16  ;;  %v2250_v2 = vcombine.high %v2248_v47, %v2248_v47  ;;  %v9240_v11 = vrot.slane %v2249_v4, 9  ;;  %v9241_v41 = vrot.slane %v2248_v47, 9 }
 0x1fa   : > { %v9876_v43 = vpack.c.bf16 %v6742_v5, %v6742_v5  ;;  %v8020_v34 = vunpack.c.l.b16 %v9874_v36  ;;  %v8021_v42 = vunpack.c.l.b16 %v9875_v59  ;;  %v6367_v38 = vmax.f32 %v2241_v46, %v9239_v22  ;;  %v12903_v36 = vld [vmem:[#allocation10_spill] sm:$0xff] }
 0x1fb   : > { %v9242_v53 = vrot.slane %v2250_v2, 9  ;;  %v6368_v52 = vmax.f32 %v2249_v4, %v9240_v11  ;;  %v6369_v18 = vmax.f32 %v2248_v47, %v9241_v41  ;;  %v1546_v44 = vadd.f32 %v11335_v57, %v12902_v26 }
 0x1fc   : > { %v11373_v23 = vunpack.c.l.b16 %v9876_v43  ;;  %v8402_v55 = vrot.slane %v8020_v34, 7  ;;  %v8404_v3 = vrot.slane %v8021_v42, 6  ;;  %v6623_v6 = vmax.f32 %v11257_v10, %v6367_v38 }
 0x1fd   : > { %v6370_v8 = vmax.f32 %v2250_v2, %v9242_v53  ;;  %v6624_v61 = vmax.f32 %v11261_v13, %v6368_v52  ;;  %v6625_v20 = vmax.f32 %v11263_v62, %v6369_v18  ;;  %v1674_v49 = vmax.f32 %v1546_v44, 0.0 }
 0x1fe   : > { %v8403_v46 = vsel %vm8116_vm3, %v8402_v55, %v8019_v21  ;;  %v8406_v0 = vrot.slane %v11373_v23, 5  ;;  %v9757_v39 = vpack.c.bf16 %v6623_v6, %v6623_v6  ;;  %v11384_v16 = vsel %vm8122_vm5, %v8420_v63, %v11348_v15  ;;  %v11396_v15 = vpop.f32.mrb[33].mxu0  ;;  %v11400_v55 = vpop.f32.mrb[33].mxu1 }
 0x1ff   : > { %v11387_v47 = vsel %vm8119_vm4, %v8404_v3, %v8403_v46  ;;  %v6626_v10 = vmax.f32 %v11269_v7, %v6370_v8  ;;  %v9758_v13 = vpack.c.bf16 %v6624_v61, %v6624_v61  ;;  %v9759_v4 = vpack.c.bf16 %v6625_v20, %v6625_v20  ;;  %12904 = vst [vmem:[#allocation22_spill] sm:$0xff] %v11400_v55  ;;  %v11404_v46 = vpop.f32.mrb[34].mxu0 }
 0x200   : > { %v7903_v62 = vunpack.c.l.b16 %v9757_v39  ;;  %v3322_v22 = vcombine.high %v1674_v49, %v1674_v49  ;;  %v3329_v5 = vrot.slane %v1674_v49, %v10610_v14  ;;  %v1480_v59 = vadd.f32 %v11335_v57, %v12903_v36  ;;  %12905 = vst [vmem:[#allocation23_spill] sm:$0xff] %v11404_v46 }
 0x201   : > { %v9760_v21 = vpack.c.bf16 %v6626_v10, %v6626_v10  ;;  %v7904_v2 = vunpack.c.l.b16 %v9758_v13  ;;  %v7905_v1 = vunpack.c.l.b16 %v9759_v4  ;;  %v11394_v63 = vsel %vm8122_vm5, %v8182_v58, %v8181_v19 }
 0x202   : > { %v8198_v11 = vrot.slane %v7903_v62, 4  ;;  %v3336_v7 = vrot.slane %v3322_v22, %v10610_v14  ;;  %v3337_v41 = vcombine.high %v3329_v5, %v3329_v5  ;;  %v9367_v43 = vrot.slane %v3329_v5, 9 }
 0x203   : > { %v7906_v34 = vunpack.c.l.b16 %v9760_v21  ;;  %v8200_v42 = vrot.slane %v7904_v2, 3  ;;  %v8202_v38 = vrot.slane %v7905_v1, 2  ;;  %v1608_v53 = vmax.f32 %v1480_v59, 0.0 }
 0x204   : > { %v8199_v52 = vsel %vm8125_vm6, %v8198_v11, %v8197_v31  ;;  %v3338_v18 = vcombine.high %v3336_v7, %v3336_v7  ;;  %v9368_v26 = vrot.slane %v3337_v41, 9  ;;  %v9369_v44 = vrot.slane %v3336_v7, 9 }
 0x205   : > { %v8201_v58 = vsel %vm8128_vm7, %v8200_v42, %v8199_v52  ;;  %v8204_v19 = vrot.slane %v7906_v34, 1  ;;  %v6495_v3 = vmax.f32 %v3329_v5, %v9367_v43  ;;  %v2200_v6 = vcombine.high %v1608_v53, %v1608_v53 }
 0x206   : > { %v8203_v8 = vsel %vm8131_vm8, %v8202_v38, %v8201_v58  ;;  %v9370_v61 = vrot.slane %v3338_v18, 9  ;;  %v6496_v20 = vmax.f32 %v3337_v41, %v9368_v26  ;;  %v6497_v49 = vmax.f32 %v3336_v7, %v9369_v44  ;;  %v11415_v38 = vpop.f32.mrb[34].mxu1 }
 0x207   : > { %v8205_v31 = vsel %vm8134_vm9, %v8204_v19, %v8203_v8  ;;  %v6751_v39 = vmax.f32 %v11265_v45, %v6495_v3  ;;  %v2207_v10 = vrot.slane %v1608_v53, %v10610_v14  ;;  %v2214_v13 = vrot.slane %v2200_v6, %v10610_v14  ;;  %12906 = vst [vmem:[#allocation24_spill] sm:$0xff] %v11415_v38 }
 0x208   : > { %v8575_v4 = vpack.c.b16 %v8205_v31, %v8205_v31  ;;  %v6498_v62 = vmax.f32 %v3338_v18, %v9370_v61  ;;  %v6752_v22 = vmax.f32 %v11267_v56, %v6496_v20  ;;  %v6753_v5 = vmax.f32 %v11271_v24, %v6497_v49 }
 0x209   : > { %v9885_v36 = vpack.c.bf16 %v6751_v39, %v6751_v39  ;;  %v2215_v59 = vcombine.high %v2207_v10, %v2207_v10  ;;  %v2216_v21 = vcombine.high %v2214_v13, %v2214_v13  ;;  %v9231_v2 = vrot.slane %v2207_v10, 9 }
 0x20a   : > { %8640 = vst.msk [vmem:[%s10873_s18 + $0x14] sm:$0xf] %vm8634_vm10, %v8575_v4  ;;  %v6754_v1 = vmax.f32 %v11276_v37, %v6498_v62  ;;  %v9886_v11 = vpack.c.bf16 %v6752_v22, %v6752_v22  ;;  %v9887_v45 = vpack.c.bf16 %v6753_v5, %v6753_v5  ;;  %v9233_v7 = vrot.slane %v2214_v13, 9  ;;  %v11427_v22 = vpop.f32.mrb[35].mxu0 }
 0x20b   : > { %v8031_v41 = vunpack.c.l.b16 %v9885_v36  ;;  %v9232_v43 = vrot.slane %v2215_v59, 9  ;;  %v9234_v34 = vrot.slane %v2216_v21, 9  ;;  %v6359_v42 = vmax.f32 %v2207_v10, %v9231_v2  ;;  %12907 = vst [vmem:[#allocation25_spill] sm:$0xff] %v11427_v22 }
 0x20c   : > { %v9888_v56 = vpack.c.bf16 %v6754_v1, %v6754_v1  ;;  %v8032_v53 = vunpack.c.l.b16 %v9886_v11  ;;  %v8033_v24 = vunpack.c.l.b16 %v9887_v45  ;;  %v6361_v52 = vmax.f32 %v2214_v13, %v9233_v7 }
 0x20d   : > { %v8422_v18 = vrot.slane %v8031_v41, 4  ;;  %v6360_v26 = vmax.f32 %v2215_v59, %v9232_v43  ;;  %v6362_v44 = vmax.f32 %v2216_v21, %v9234_v34  ;;  %v6615_v58 = vmax.f32 %v11285_v51, %v6359_v42 }
 0x20e   : > { %v8034_v19 = vunpack.c.l.b16 %v9888_v56  ;;  %v8424_v37 = vrot.slane %v8032_v53, 3  ;;  %v8426_v3 = vrot.slane %v8033_v24, 2  ;;  %v6617_v6 = vmax.f32 %v11290_v9, %v6361_v52 }
 0x20f   : > { %v8423_v8 = vsel %vm8125_vm6, %v8422_v18, %v11384_v16  ;;  %v6616_v61 = vmax.f32 %v11293_v28, %v6360_v26  ;;  %v6618_v20 = vmax.f32 %v11296_v27, %v6362_v44  ;;  %v9749_v49 = vpack.c.bf16 %v6615_v58, %v6615_v58  ;;  %v11429_v16 = vpop.f32.mrb[35].mxu1 }
 0x210   : > { %v8425_v31 = vsel %vm8128_vm7, %v8424_v37, %v8423_v8  ;;  %v8428_v39 = vrot.slane %v8034_v19, 1  ;;  %v9751_v10 = vpack.c.bf16 %v6617_v6, %v6617_v6  ;;  %v1544_v51 = vadd.f32 %v11335_v57, %v11062_v17  ;;  %12908 = vst [vmem:[#allocation26_spill] sm:$0xff] %v11429_v16 }
 0x211   : > { %v8427_v13 = vsel %vm8131_vm8, %v8426_v3, %v8425_v31  ;;  %v9750_v4 = vpack.c.bf16 %v6616_v61, %v6616_v61  ;;  %v9752_v62 = vpack.c.bf16 %v6618_v20, %v6618_v20  ;;  %v7895_v9 = vunpack.c.l.b16 %v9749_v49  ;;  %v11460_v31 = vpop.f32.mrb[36].mxu0 }
 0x212   : > { %v8429_v28 = vsel %vm8134_vm9, %v8428_v39, %v8427_v13  ;;  %v7897_v27 = vunpack.c.l.b16 %v9751_v10  ;;  %v1672_v5 = vmax.f32 %v1544_v51, 0.0  ;;  %v11436_v36 = vsel %vm8122_vm5, %v8406_v0, %v11387_v47  ;;  %12909 = vst [vmem:[#allocation27_spill] sm:$0xff] %v11460_v31  ;;  %v11462_v39 = vpop.f32.mrb[36].mxu1 }
 0x213   : > { %v8591_v17 = vpack.c.b16 %v8429_v28, %v8429_v28  ;;  %v7896_v59 = vunpack.c.l.b16 %v9750_v4  ;;  %v7898_v21 = vunpack.c.l.b16 %v9752_v62  ;;  %v8184_v2 = vrot.slane %v7895_v9, 4  ;;  %12910 = vst [vmem:[#allocation17_spill] sm:$0xff] %v11462_v39 }
 0x214   : > { %v8188_v1 = vrot.slane %v7897_v27, 2  ;;  %v3288_v11 = vcombine.high %v1672_v5, %v1672_v5  ;;  %v3295_v45 = vrot.slane %v1672_v5, %v10610_v14  ;;  %v1485_v7 = vadd.f32 %v11335_v57, %v11095_v40 }
 0x215   : > { %8656 = vst.msk [vmem:[%s10873_s18 + $0x54] sm:$0xf] %vm8634_vm10, %v8591_v17  ;;  %v8185_v41 = vsel %vm8125_vm6, %v8184_v2, %v11394_v63  ;;  %v8186_v23 = vrot.slane %v7896_v59, 3  ;;  %v8190_v43 = vrot.slane %v7898_v21, 1  ;;  %v1549_v0 = vadd.f32 %v11335_v57, %v11097_v33 }
 0x216   : > { %v3302_v47 = vrot.slane %v3288_v11, %v10610_v14  ;;  %v3303_v34 = vcombine.high %v3295_v45, %v3295_v45  ;;  %v9359_v42 = vrot.slane %v3295_v45, 9  ;;  %v1613_v56 = vmax.f32 %v1485_v7, 0.0 }
 0x217   : > { %v8187_v53 = vsel %vm8128_vm7, %v8186_v23, %v8185_v41  ;;  %v1677_v24 = vmax.f32 %v1549_v0, 0.0  ;;  %v1483_v40 = vadd.f32 %v11335_v57, %v11127_v50  ;;  %v11453_v52 = vadd.f32 %v11335_v57, %v11130_v30 }
 0x218   : > { %v8189_v63 = vsel %vm8131_vm8, %v8188_v1, %v8187_v53  ;;  %v3304_v18 = vcombine.high %v3302_v47, %v3302_v47  ;;  %v9360_v26 = vrot.slane %v3303_v34, 9  ;;  %v9361_v33 = vrot.slane %v3302_v47, 9 }
 0x219   : > { %v8191_v44 = vsel %vm8134_vm9, %v8190_v43, %v8189_v63  ;;  %v6487_v58 = vmax.f32 %v3295_v45, %v9359_v42  ;;  %v2285_v19 = vcombine.high %v1613_v56, %v1613_v56  ;;  %v2292_v37 = vrot.slane %v1613_v56, %v10610_v14 }
 0x21a   : > { %v8574_v3 = vpack.c.b16 %v8191_v44, %v8191_v44  ;;  %v9362_v6 = vrot.slane %v3304_v18, 9  ;;  %v6488_v8 = vmax.f32 %v3303_v34, %v9360_v26  ;;  %v6489_v50 = vmax.f32 %v3302_v47, %v9361_v33 }
 0x21b   : > { %v6743_v61 = vmax.f32 %v11299_v60, %v6487_v58  ;;  %v2299_v30 = vrot.slane %v2285_v19, %v10610_v14  ;;  %v2300_v20 = vcombine.high %v2292_v37, %v2292_v37  ;;  %v8995_v49 = vrot.slane %v2292_v37, 9 }
 0x21c   : > { %8639 = vst.msk [vmem:[%s10873_s18 + $0x10] sm:$0xf] %vm8634_vm10, %v8574_v3  ;;  %v6490_v10 = vmax.f32 %v3304_v18, %v9362_v6  ;;  %v6744_v51 = vmax.f32 %v11301_v32, %v6488_v8  ;;  %v6745_v13 = vmax.f32 %v11303_v54, %v6489_v50  ;;  %v3373_v4 = vcombine.high %v1677_v24, %v1677_v24  ;;  %v11475_v32 = vpop.f32.mrb[37].mxu0 }
 0x21d   : > { %v9877_v62 = vpack.c.bf16 %v6743_v61, %v6743_v61  ;;  %v2301_v9 = vcombine.high %v2299_v30, %v2299_v30  ;;  %v8996_v28 = vrot.slane %v2300_v20, 9  ;;  %v8997_v60 = vrot.slane %v2299_v30, 9  ;;  %12911 = vst [vmem:[#allocation18_spill] sm:$0xff] %v11475_v32 }
 0x21e   : > { %v6746_v27 = vmax.f32 %v11306_v12, %v6490_v10  ;;  %v9878_v5 = vpack.c.bf16 %v6744_v51, %v6744_v51  ;;  %v9879_v17 = vpack.c.bf16 %v6745_v13, %v6745_v13  ;;  %v11469_v59 = vmax.f32 %v2292_v37, %v8995_v49 }
 0x21f   : > { %v8023_v21 = vunpack.c.l.b16 %v9877_v62  ;;  %v8998_v2 = vrot.slane %v2301_v9, 9  ;;  %v11471_v1 = vmax.f32 %v2300_v20, %v8996_v28  ;;  %v11473_v11 = vmax.f32 %v2299_v30, %v8997_v60  ;;  %v12912_v60 = vld [vmem:[#allocation11_spill] sm:$0xff] }
 0x220   : > { %v9880_v54 = vpack.c.bf16 %v6746_v27, %v6746_v27  ;;  %v8024_v45 = vunpack.c.l.b16 %v9878_v5  ;;  %v8025_v7 = vunpack.c.l.b16 %v9879_v17  ;;  %v3380_v41 = vrot.slane %v1677_v24, %v10610_v14  ;;  %v11504_v5 = vpop.f32.mrb[37].mxu1 }
 0x221   : > { %v8408_v23 = vrot.slane %v8023_v21, 4  ;;  %v11478_v43 = vmax.f32 %v2301_v9, %v8998_v2  ;;  %v3387_v12 = vrot.slane %v3373_v4, %v10610_v14  ;;  %v1611_v0 = vmax.f32 %v1483_v40, 0.0  ;;  %12913 = vst [vmem:[#allocation19_spill] sm:$0xff] %v11504_v5 }
 0x222   : > { %v8026_v47 = vunpack.c.l.b16 %v9880_v54  ;;  %v8410_v34 = vrot.slane %v8024_v45, 3  ;;  %v8412_v42 = vrot.slane %v8025_v7, 2  ;;  %v3388_v56 = vcombine.high %v3380_v41, %v3380_v41 }
 0x223   : > { %v8409_v53 = vsel %vm8125_vm6, %v8408_v23, %v11436_v36  ;;  %v3389_v63 = vcombine.high %v3387_v12, %v3387_v12  ;;  %v9123_v18 = vrot.slane %v3380_v41, 9  ;;  %v9125_v26 = vrot.slane %v3387_v12, 9 }
 0x224   : > { %v8411_v33 = vsel %vm8128_vm7, %v8410_v34, %v8409_v53  ;;  %v8414_v44 = vrot.slane %v8026_v47, 1  ;;  %v9124_v24 = vrot.slane %v3388_v56, 9  ;;  %v2251_v58 = vcombine.high %v1611_v0, %v1611_v0 }
 0x225   : > { %v8413_v19 = vsel %vm8131_vm8, %v8412_v42, %v8411_v33  ;;  %v9126_v37 = vrot.slane %v3389_v63, 9  ;;  %v11485_v40 = vmax.f32 %v3380_v41, %v9123_v18  ;;  %v11487_v3 = vmax.f32 %v3387_v12, %v9125_v26 }
 0x226   : > { %v8415_v6 = vsel %vm8134_vm9, %v8414_v44, %v8413_v19  ;;  %v11490_v8 = vmax.f32 %v3388_v56, %v9124_v24  ;;  %v2258_v36 = vrot.slane %v1611_v0, %v10610_v14  ;;  %v2265_v50 = vrot.slane %v2251_v58, %v10610_v14 }
 0x227   : > { %v8590_v61 = vpack.c.b16 %v8415_v6, %v8415_v6  ;;  %v11494_v30 = vmax.f32 %v3389_v63, %v9126_v37  ;;  %v1675_v20 = vmax.f32 %v11453_v52, 0.0  ;;  %v1486_v49 = vadd.f32 %v11335_v57, %v11141_v48 }
 0x228   : > { %v2266_v10 = vcombine.high %v2258_v36, %v2258_v36  ;;  %v2267_v51 = vcombine.high %v2265_v50, %v2265_v50  ;;  %v8987_v13 = vrot.slane %v2258_v36, 9  ;;  %v8989_v4 = vrot.slane %v2265_v50, 9 }
 0x229   : > { %8655 = vst.msk [vmem:[%s10873_s18 + $0x50] sm:$0xf] %vm8634_vm10, %v8590_v61  ;;  %v3339_v62 = vcombine.high %v1675_v20, %v1675_v20  ;;  %v3346_v9 = vrot.slane %v1675_v20, %v10610_v14  ;;  %v1614_v28 = vmax.f32 %v1486_v49, 0.0  ;;  %v1550_v27 = vadd.f32 %v11335_v57, %v12912_v60 }
 0x22a   : > { %v8988_v17 = vrot.slane %v2266_v10, 9  ;;  %v8990_v52 = vrot.slane %v2267_v51, 9  ;;  %v11506_v21 = vmax.f32 %v2258_v36, %v8987_v13  ;;  %v11508_v48 = vmax.f32 %v2265_v50, %v8989_v4  ;;  %v11526_v50 = vpop.f32.mrb[38].mxu0 }
 0x22b   : > { %v3353_v2 = vrot.slane %v3339_v62, %v10610_v14  ;;  %v3354_v54 = vcombine.high %v3346_v9, %v3346_v9  ;;  %v9115_v45 = vrot.slane %v3346_v9, 9  ;;  %v2302_v7 = vcombine.high %v1614_v28, %v1614_v28  ;;  %12914 = vst [vmem:[#allocation20_spill] sm:$0xff] %v11526_v50  ;;  %v12915_v62 = vld [vmem:[#allocation12_spill] sm:$0xff] }
 0x22c   : > { %v11511_v41 = vmax.f32 %v2266_v10, %v8988_v17  ;;  %v11513_v23 = vmax.f32 %v2267_v51, %v8990_v52  ;;  %v2309_v12 = vrot.slane %v1614_v28, %v10610_v14  ;;  %v1678_v0 = vmax.f32 %v1550_v27, 0.0 }
 0x22d   : > { %v3355_v47 = vcombine.high %v3353_v2, %v3353_v2  ;;  %v9116_v34 = vrot.slane %v3354_v54, 9  ;;  %v9117_v42 = vrot.slane %v3353_v2, 9  ;;  %v11516_v56 = vmax.f32 %v3346_v9, %v9115_v45 }
 0x22e   : > { %v2316_v53 = vrot.slane %v2302_v7, %v10610_v14  ;;  %v2317_v63 = vcombine.high %v2309_v12, %v2309_v12  ;;  %v8999_v18 = vrot.slane %v2309_v12, 9  ;;  %v3390_v26 = vcombine.high %v1678_v0, %v1678_v0  ;;  %v12917_v7 = vld [vmem:[#allocation14_spill] sm:$0xff] }
 0x22f   : > { %v9118_v33 = vrot.slane %v3355_v47, 9  ;;  %v11519_v44 = vmax.f32 %v3354_v54, %v9116_v34  ;;  %v11521_v24 = vmax.f32 %v3353_v2, %v9117_v42  ;;  %v3397_v58 = vrot.slane %v1678_v0, %v10610_v14  ;;  %v12916_v54 = vld [vmem:[#allocation13_spill] sm:$0xff]  ;;  %v12918_v42 = vld [vmem:[#allocation15_spill] sm:$0xff] }
 0x230   : > { %v2318_v19 = vcombine.high %v2316_v53, %v2316_v53  ;;  %v9000_v37 = vrot.slane %v2317_v63, 9  ;;  %v9001_v6 = vrot.slane %v2316_v53, 9  ;;  %v11524_v36 = vmax.f32 %v2309_v12, %v8999_v18 }
 0x231   : > { %v11528_v61 = vmax.f32 %v3355_v47, %v9118_v33  ;;  %v3404_v20 = vrot.slane %v3390_v26, %v10610_v14  ;;  %v3405_v49 = vcombine.high %v3397_v58, %v3397_v58  ;;  %v9127_v10 = vrot.slane %v3397_v58, 9 }
 0x232   : > { %v9002_v51 = vrot.slane %v2318_v19, 9  ;;  %v11531_v13 = vmax.f32 %v2317_v63, %v9000_v37  ;;  %v11533_v4 = vmax.f32 %v2316_v53, %v9001_v6  ;;  %v1484_v9 = vadd.f32 %v11335_v57, %v12915_v62  ;;  %v12919_v37 = vld [vmem:[#allocation16_spill] sm:$0xff] }
 0x233   : > { %v3406_v28 = vcombine.high %v3404_v20, %v3404_v20  ;;  %v9128_v60 = vrot.slane %v3405_v49, 9  ;;  %v9129_v27 = vrot.slane %v3404_v20, 9  ;;  %v11537_v17 = vmax.f32 %v3397_v58, %v9127_v10  ;;  %v12920_v10 = vld [vmem:[#allocation21_spill] sm:$0xff] }
 0x234   : > { %v11539_v52 = vmax.f32 %v2318_v19, %v9002_v51  ;;  %v1612_v2 = vmax.f32 %v1484_v9, 0.0  ;;  %v1548_v45 = vadd.f32 %v11335_v57, %v12916_v54  ;;  %v1489_v12 = vadd.f32 %v11335_v57, %v12917_v7 }
 0x235   : > { %v9130_v0 = vrot.slane %v3406_v28, 9  ;;  %v11545_v47 = vmax.f32 %v3405_v49, %v9128_v60  ;;  %v11547_v34 = vmax.f32 %v3404_v20, %v9129_v27  ;;  %v1553_v53 = vadd.f32 %v11335_v57, %v12918_v42  ;;  %v11561_v60 = vpop.f32.mrb[38].mxu1 }
 0x236   : > { %v2268_v63 = vcombine.high %v1612_v2, %v1612_v2  ;;  %v2275_v18 = vrot.slane %v1612_v2, %v10610_v14  ;;  %v1676_v26 = vmax.f32 %v1548_v45, 0.0  ;;  %v1617_v33 = vmax.f32 %v1489_v12, 0.0  ;;  %12921 = vst [vmem:[#allocation5_spill] sm:$0xff] %v11561_v60 }
 0x237   : > { %v11552_v58 = vmax.f32 %v3406_v28, %v9130_v0  ;;  %v1681_v19 = vmax.f32 %v1553_v53, 0.0  ;;  %v1487_v6 = vadd.f32 %v11335_v57, %v12919_v37  ;;  %v11558_v49 = vadd.f32 %v11335_v57, %v12920_v10 }
 0x238   : > { %v2282_v20 = vrot.slane %v2268_v63, %v10610_v14  ;;  %v2283_v51 = vcombine.high %v2275_v18, %v2275_v18  ;;  %v8991_v62 = vrot.slane %v2275_v18, 9  ;;  %v3356_v9 = vcombine.high %v1676_v26, %v1676_v26 }
 0x239   : > { %v3363_v27 = vrot.slane %v1676_v26, %v10610_v14  ;;  %v2353_v2 = vcombine.high %v1617_v33, %v1617_v33  ;;  %v2360_v28 = vrot.slane %v1617_v33, %v10610_v14  ;;  %v3441_v54 = vcombine.high %v1681_v19, %v1681_v19 }
 0x23a   : > { %v2284_v45 = vcombine.high %v2282_v20, %v2282_v20  ;;  %v8992_v7 = vrot.slane %v2283_v51, 9  ;;  %v8993_v12 = vrot.slane %v2282_v20, 9  ;;  %v11565_v0 = vmax.f32 %v2275_v18, %v8991_v62 }
 0x23b   : > { %v3370_v42 = vrot.slane %v3356_v9, %v10610_v14  ;;  %v3371_v53 = vcombine.high %v3363_v27, %v3363_v27  ;;  %v9119_v63 = vrot.slane %v3363_v27, 9  ;;  %v2367_v37 = vrot.slane %v2353_v2, %v10610_v14 }
 0x23c   : > { %v8994_v10 = vrot.slane %v2284_v45, 9  ;;  %v11569_v50 = vmax.f32 %v2283_v51, %v8992_v7  ;;  %v11571_v60 = vmax.f32 %v2282_v20, %v8993_v12  ;;  %v2368_v26 = vcombine.high %v2360_v28, %v2360_v28 }
 0x23d   : > { %v3372_v5 = vcombine.high %v3370_v42, %v3370_v42  ;;  %v9120_v33 = vrot.slane %v3371_v53, 9  ;;  %v9121_v32 = vrot.slane %v3370_v42, 9  ;;  %v11573_v39 = vmax.f32 %v3363_v27, %v9119_v63 }
 0x23e   : > { %v11575_v31 = vmax.f32 %v2284_v45, %v8994_v10  ;;  %v2369_v18 = vcombine.high %v2367_v37, %v2367_v37  ;;  %v9251_v62 = vrot.slane %v2360_v28, 9  ;;  %v9252_v9 = vrot.slane %v2368_v26, 9 }
 0x23f   : > { %v9122_v16 = vrot.slane %v3372_v5, 9  ;;  %v11577_v22 = vmax.f32 %v3371_v53, %v9120_v33  ;;  %v11579_v2 = vmax.f32 %v3370_v42, %v9121_v32  ;;  %v9253_v51 = vrot.slane %v2367_v37, 9  ;;  %v11587_v32 = vpop.f32.mrb[39].mxu0 }
 0x240   : > { %v9254_v7 = vrot.slane %v2369_v18, 9  ;;  %v6379_v20 = vmax.f32 %v2360_v28, %v9251_v62  ;;  %v6380_v12 = vmax.f32 %v2368_v26, %v9252_v9  ;;  %v3448_v38 = vrot.slane %v1681_v19, %v10610_v14  ;;  %12922 = vst [vmem:[#allocation6_spill] sm:$0xff] %v11587_v32 }
 0x241   : > { %v11582_v46 = vmax.f32 %v3372_v5, %v9122_v16  ;;  %v6381_v27 = vmax.f32 %v2367_v37, %v9253_v51  ;;  %v3455_v45 = vrot.slane %v3441_v54, %v10610_v14  ;;  %v1615_v63 = vmax.f32 %v1487_v6, 0.0 }
 0x242   : > { %v6382_v10 = vmax.f32 %v2369_v18, %v9254_v7  ;;  %v6635_v55 = vmax.f32 %v11469_v59, %v6379_v20  ;;  %v6636_v53 = vmax.f32 %v11471_v1, %v6380_v12  ;;  %v3456_v33 = vcombine.high %v3448_v38, %v3448_v38 }
 0x243   : > { %v6637_v42 = vmax.f32 %v11473_v11, %v6381_v27  ;;  %v3457_v28 = vcombine.high %v3455_v45, %v3455_v45  ;;  %v9379_v26 = vrot.slane %v3448_v38, 9  ;;  %v9381_v62 = vrot.slane %v3455_v45, 9 }
 0x244   : > { %v6638_v16 = vmax.f32 %v11478_v43, %v6382_v10  ;;  %v9769_v5 = vpack.c.bf16 %v6635_v55, %v6635_v55  ;;  %v9770_v19 = vpack.c.bf16 %v6636_v53, %v6636_v53  ;;  %v9380_v37 = vrot.slane %v3456_v33, 9 }
 0x245   : > { %v9771_v54 = vpack.c.bf16 %v6637_v42, %v6637_v42  ;;  %v9382_v6 = vrot.slane %v3457_v28, 9  ;;  %v6507_v18 = vmax.f32 %v3448_v38, %v9379_v26  ;;  %v6509_v9 = vmax.f32 %v3455_v45, %v9381_v62  ;;  %v11597_v26 = vpop.f32.mrb[39].mxu1 }
 0x246   : > { %v9772_v59 = vpack.c.bf16 %v6638_v16, %v6638_v16  ;;  %v7915_v51 = vunpack.c.l.b16 %v9769_v5  ;;  %v7916_v1 = vunpack.c.l.b16 %v9770_v19  ;;  %v6508_v7 = vmax.f32 %v3456_v33, %v9380_v37 }
 0x247   : > { %v7917_v20 = vunpack.c.l.b16 %v9771_v54  ;;  %v6510_v12 = vmax.f32 %v3457_v28, %v9382_v6  ;;  %v6763_v11 = vmax.f32 %v11485_v40, %v6507_v18  ;;  %v6765_v27 = vmax.f32 %v11487_v3, %v6509_v9 }
 0x248   : > { %v11593_v32 = vunpack.c.l.b16 %v9772_v59  ;;  %v8220_v43 = vrot.slane %v7916_v1, 7  ;;  %v6764_v55 = vmax.f32 %v11490_v8, %v6508_v7  ;;  %v2319_v10 = vcombine.high %v1615_v63, %v1615_v63  ;;  %v12923_v59 = vld [vmem:[#allocation8_spill] sm:$0xff] }
 0x249   : > { %v8222_v53 = vrot.slane %v7917_v20, 6  ;;  %v6766_v38 = vmax.f32 %v11494_v30, %v6510_v12  ;;  %v9897_v45 = vpack.c.bf16 %v6763_v11, %v6763_v11  ;;  %v9899_v42 = vpack.c.bf16 %v6765_v27, %v6765_v27 }
 0x24a   : > { %v8221_v33 = vsel %vm8116_vm3, %v8220_v43, %v7915_v51  ;;  %v8224_v28 = vrot.slane %v11593_v32, 5  ;;  %v9898_v40 = vpack.c.bf16 %v6764_v55, %v6764_v55  ;;  %v2326_v3 = vrot.slane %v1615_v63, %v10610_v14 }
 0x24b   : > { %v11603_v62 = vsel %vm8119_vm4, %v8222_v53, %v8221_v33  ;;  %v9900_v16 = vpack.c.bf16 %v6766_v38, %v6766_v38  ;;  %v8043_v8 = vunpack.c.l.b16 %v9897_v45  ;;  %v8045_v5 = vunpack.c.l.b16 %v9899_v42 }
 0x24c   : > { %v8044_v19 = vunpack.c.l.b16 %v9898_v40  ;;  %v2333_v30 = vrot.slane %v2319_v10, %v10610_v14  ;;  %v2334_v37 = vcombine.high %v2326_v3, %v2326_v3  ;;  %v9243_v54 = vrot.slane %v2326_v3, 9 }
 0x24d   : > { %v11606_v6 = vunpack.c.l.b16 %v9900_v16  ;;  %v8446_v18 = vrot.slane %v8045_v5, 6  ;;  %v1679_v9 = vmax.f32 %v11558_v49, 0.0  ;;  %v1490_v51 = vadd.f32 %v11335_v57, %v12923_v59 }
 0x24e   : > { %v8444_v63 = vrot.slane %v8044_v19, 7  ;;  %v2335_v1 = vcombine.high %v2333_v30, %v2333_v30  ;;  %v9244_v7 = vrot.slane %v2334_v37, 9  ;;  %v9245_v20 = vrot.slane %v2333_v30, 9 }
 0x24f   : > { %v8448_v12 = vrot.slane %v11606_v6, 5  ;;  %v6371_v11 = vmax.f32 %v2326_v3, %v9243_v54  ;;  %v3407_v27 = vcombine.high %v1679_v9, %v1679_v9  ;;  %v3414_v43 = vrot.slane %v1679_v9, %v10610_v14 }
 0x250   : > { %v8445_v55 = vsel %vm8116_vm3, %v8444_v63, %v8043_v8  ;;  %v9246_v10 = vrot.slane %v2335_v1, 9  ;;  %v6372_v53 = vmax.f32 %v2334_v37, %v9244_v7  ;;  %v6373_v38 = vmax.f32 %v2333_v30, %v9245_v20 }
 0x251   : > { %v8447_v49 = vsel %vm8119_vm4, %v8446_v18, %v8445_v55  ;;  %v6627_v45 = vmax.f32 %v11506_v21, %v6371_v11  ;;  %v3421_v42 = vrot.slane %v3407_v27, %v10610_v14  ;;  %v3422_v33 = vcombine.high %v3414_v43, %v3414_v43 }
 0x252   : > { %v6374_v40 = vmax.f32 %v2335_v1, %v9246_v10  ;;  %v6628_v16 = vmax.f32 %v11511_v41, %v6372_v53  ;;  %v6629_v3 = vmax.f32 %v11508_v48, %v6373_v38  ;;  %v9371_v5 = vrot.slane %v3414_v43, 9 }
 0x253   : > { %v9761_v19 = vpack.c.bf16 %v6627_v45, %v6627_v45  ;;  %v3423_v54 = vcombine.high %v3421_v42, %v3421_v42  ;;  %v9372_v9 = vrot.slane %v3422_v33, 9  ;;  %v9373_v8 = vrot.slane %v3421_v42, 9 }
 0x254   : > { %v6630_v37 = vmax.f32 %v11513_v23, %v6374_v40  ;;  %v9762_v30 = vpack.c.bf16 %v6628_v16, %v6628_v16  ;;  %v9763_v59 = vpack.c.bf16 %v6629_v3, %v6629_v3  ;;  %v6499_v18 = vmax.f32 %v3414_v43, %v9371_v5 }
 0x255   : > { %v7907_v63 = vunpack.c.l.b16 %v9761_v19  ;;  %v9374_v21 = vrot.slane %v3423_v54, 9  ;;  %v6500_v7 = vmax.f32 %v3422_v33, %v9372_v9  ;;  %v6501_v20 = vmax.f32 %v3421_v42, %v9373_v8  ;;  %v11629_v8 = vpop.f32.mrb[40].mxu1 }
 0x256   : > { %v9764_v11 = vpack.c.bf16 %v6630_v37, %v6630_v37  ;;  %v7908_v1 = vunpack.c.l.b16 %v9762_v30  ;;  %v7909_v27 = vunpack.c.l.b16 %v9763_v59  ;;  %v6755_v41 = vmax.f32 %v11516_v56, %v6499_v18 }
 0x257   : > { %v6502_v48 = vmax.f32 %v3423_v54, %v9374_v21  ;;  %v6756_v55 = vmax.f32 %v11519_v44, %v6500_v7  ;;  %v6757_v10 = vmax.f32 %v11521_v24, %v6501_v20  ;;  %v1618_v53 = vmax.f32 %v1490_v51, 0.0  ;;  %v11626_v54 = vpop.f32.mrb[40].mxu0  ;;  %v12924_v7 = vld [vmem:[#allocation7_spill] sm:$0xff] }
 0x258   : > { %v7910_v38 = vunpack.c.l.b16 %v9764_v11  ;;  %v8206_v23 = vrot.slane %v7908_v1, 7  ;;  %v8208_v45 = vrot.slane %v7909_v27, 6  ;;  %v9889_v40 = vpack.c.bf16 %v6755_v41, %v6755_v41 }
 0x259   : > { %v6758_v43 = vmax.f32 %v11528_v61, %v6502_v48  ;;  %v9890_v16 = vpack.c.bf16 %v6756_v55, %v6756_v55  ;;  %v9891_v33 = vpack.c.bf16 %v6757_v10, %v6757_v10  ;;  %v2370_v42 = vcombine.high %v1618_v53, %v1618_v53 }
 0x25a   : > { %v8207_v3 = vsel %vm8116_vm3, %v8206_v23, %v7907_v63  ;;  %v8210_v5 = vrot.slane %v7910_v38, 5  ;;  %v8035_v19 = vunpack.c.l.b16 %v9889_v40  ;;  %v2377_v56 = vrot.slane %v1618_v53, %v10610_v14 }
 0x25b   : > { %v8209_v44 = vsel %vm8119_vm4, %v8208_v45, %v8207_v3  ;;  %v9892_v24 = vpack.c.bf16 %v6758_v43, %v6758_v43  ;;  %v8036_v51 = vunpack.c.l.b16 %v9890_v16  ;;  %v8037_v9 = vunpack.c.l.b16 %v9891_v33  ;;  %v12925_v43 = vld [vmem:[#allocation9_spill] sm:$0xff] }
 0x25c   : > { %v2384_v61 = vrot.slane %v2370_v42, %v10610_v14  ;;  %v2385_v37 = vcombine.high %v2377_v56, %v2377_v56  ;;  %v9255_v30 = vrot.slane %v2377_v56, 9  ;;  %v8225_v59 = vsel %vm8122_vm5, %v8224_v28, %v11603_v62 }
 0x25d   : > { %v11636_v18 = vunpack.c.l.b16 %v9892_v24  ;;  %v8430_v63 = vrot.slane %v8036_v51, 7  ;;  %v8432_v21 = vrot.slane %v8037_v9, 6  ;;  %v1554_v20 = vadd.f32 %v11335_v57, %v12924_v7 }
 0x25e   : > { %v2386_v11 = vcombine.high %v2384_v61, %v2384_v61  ;;  %v9256_v1 = vrot.slane %v2385_v37, 9  ;;  %v9257_v27 = vrot.slane %v2384_v61, 9  ;;  %v6383_v41 = vmax.f32 %v2377_v56, %v9255_v30 }
 0x25f   : > { %v8431_v48 = vsel %vm8116_vm3, %v8430_v63, %v8035_v19  ;;  %v8434_v55 = vrot.slane %v11636_v18, 5  ;;  %v1682_v10 = vmax.f32 %v1554_v20, 0.0  ;;  %v11645_v32 = vsel %vm8122_vm5, %v8448_v12, %v8447_v49 }
 0x260   : > { %v11648_v28 = vsel %vm8119_vm4, %v8432_v21, %v8431_v48  ;;  %v9258_v62 = vrot.slane %v2386_v11, 9  ;;  %v6384_v53 = vmax.f32 %v2385_v37, %v9256_v1  ;;  %v6385_v38 = vmax.f32 %v2384_v61, %v9257_v27  ;;  %v11663_v21 = vpop.f32.mrb[41].mxu1 }
 0x261   : > { %v6639_v23 = vmax.f32 %v11524_v36, %v6383_v41  ;;  %v3458_v45 = vcombine.high %v1682_v10, %v1682_v10  ;;  %v3465_v40 = vrot.slane %v1682_v10, %v10610_v14  ;;  %v1488_v16 = vadd.f32 %v11335_v57, %v12925_v43  ;;  %v11660_v36 = vpop.f32.mrb[41].mxu0  ;;  %12927 = vst [vmem:[#allocation11_spill] sm:$0xff] %v11663_v21 }
 0x262   : > { %v6386_v33 = vmax.f32 %v2386_v11, %v9258_v62  ;;  %v6640_v6 = vmax.f32 %v11531_v13, %v6384_v53  ;;  %v6641_v12 = vmax.f32 %v11533_v4, %v6385_v38  ;;  %v11657_v49 = vsel %vm8122_vm5, %v8210_v5, %v8209_v44  ;;  %12926 = vst [vmem:[#allocation10_spill] sm:$0xff] %v11660_v36 }
 0x263   : > { %v9773_v42 = vpack.c.bf16 %v6639_v23, %v6639_v23  ;;  %v3472_v3 = vrot.slane %v3458_v45, %v10610_v14  ;;  %v3473_v19 = vcombine.high %v3465_v40, %v3465_v40  ;;  %v9383_v56 = vrot.slane %v3465_v40, 9 }
 0x264   : > { %v6642_v24 = vmax.f32 %v11539_v52, %v6386_v33  ;;  %v9774_v51 = vpack.c.bf16 %v6640_v6, %v6640_v6  ;;  %v9775_v9 = vpack.c.bf16 %v6641_v12, %v6641_v12  ;;  %v1616_v57 = vmax.f32 %v1488_v16, 0.0 }
 0x265   : > { %v7919_v61 = vunpack.c.l.b16 %v9773_v42  ;;  %v3474_v37 = vcombine.high %v3472_v3, %v3472_v3  ;;  %v9384_v13 = vrot.slane %v3473_v19, 9  ;;  %v9385_v30 = vrot.slane %v3472_v3, 9 }
 0x266   : > { %v9776_v4 = vpack.c.bf16 %v6642_v24, %v6642_v24  ;;  %v7920_v63 = vunpack.c.l.b16 %v9774_v51  ;;  %v7921_v5 = vunpack.c.l.b16 %v9775_v9  ;;  %v6511_v44 = vmax.f32 %v3465_v40, %v9383_v56 }
 0x267   : > { %v8226_v7 = vrot.slane %v7919_v61, 4  ;;  %v9386_v20 = vrot.slane %v3474_v37, 9  ;;  %v6512_v11 = vmax.f32 %v3473_v19, %v9384_v13  ;;  %v6513_v1 = vmax.f32 %v3472_v3, %v9385_v30 }
 0x268   : > { %v7922_v27 = vunpack.c.l.b16 %v9776_v4  ;;  %v8228_v41 = vrot.slane %v7920_v63, 3  ;;  %v8230_v52 = vrot.slane %v7921_v5, 2  ;;  %v6767_v48 = vmax.f32 %v11537_v17, %v6511_v44 }
 0x269   : > { %v8227_v10 = vsel %vm8125_vm6, %v8226_v7, %v8225_v59  ;;  %v6514_v62 = vmax.f32 %v3474_v37, %v9386_v20  ;;  %v6768_v53 = vmax.f32 %v11545_v47, %v6512_v11  ;;  %v6769_v38 = vmax.f32 %v11547_v34, %v6513_v1  ;;  %v11675_v34 = vpop.f32.mrb[42].mxu0  ;;  %v11677_v37 = vpop.f32.mrb[42].mxu1 }
 0x26a   : > { %v8229_v23 = vsel %vm8128_vm7, %v8228_v41, %v8227_v10  ;;  %v8232_v45 = vrot.slane %v7922_v27, 1  ;;  %v9901_v40 = vpack.c.bf16 %v6767_v48, %v6767_v48  ;;  %v2336_v43 = vcombine.high %v1616_v57, %v1616_v57  ;;  %12928 = vst [vmem:[#allocation12_spill] sm:$0xff] %v11675_v34  ;;  %12929 = vst [vmem:[#allocation13_spill] sm:$0xff] %v11677_v37  ;;  %v11687_v27 = vld [vmem:[%s12822_s2] ss:$0 sm:$0xff] }
 0x26b   : > { %v8231_v16 = vsel %vm8131_vm8, %v8230_v52, %v8229_v23  ;;  %v6770_v33 = vmax.f32 %v11552_v58, %v6514_v62  ;;  %v9902_v6 = vpack.c.bf16 %v6768_v53, %v6768_v53  ;;  %v9903_v12 = vpack.c.bf16 %v6769_v38, %v6769_v38  ;;  %v11693_v62 = vpop.f32.mrb[43].mxu0 }
 0x26c   : > { %v8233_v17 = vsel %vm8134_vm9, %v8232_v45, %v8231_v16  ;;  %v8047_v59 = vunpack.c.l.b16 %v9901_v40  ;;  %v2343_v42 = vrot.slane %v1616_v57, %v10610_v14  ;;  %v2350_v47 = vrot.slane %v2336_v43, %v10610_v14  ;;  %12930 = vst [vmem:[#allocation14_spill] sm:$0xff] %v11693_v62 }
 0x26d   : > { %v8577_v3 = vpack.c.b16 %v8233_v17, %v8233_v17  ;;  %v9904_v19 = vpack.c.bf16 %v6770_v33, %v6770_v33  ;;  %v8048_v56 = vunpack.c.l.b16 %v9902_v6  ;;  %v8049_v24 = vunpack.c.l.b16 %v9903_v12 }
 0x26e   : > { %v8450_v51 = vrot.slane %v8047_v59, 4  ;;  %v2351_v9 = vcombine.high %v2343_v42, %v2343_v42  ;;  %v2352_v61 = vcombine.high %v2350_v47, %v2350_v47  ;;  %v9247_v58 = vrot.slane %v2343_v42, 9 }
 0x26f   : > { %8642 = vst.msk [vmem:[%s10873_s18 + $0x1c] sm:$0xf] %vm8634_vm10, %v8577_v3  ;;  %v8050_v13 = vunpack.c.l.b16 %v9904_v19  ;;  %v8452_v30 = vrot.slane %v8048_v56, 3  ;;  %v8454_v4 = vrot.slane %v8049_v24, 2  ;;  %v9249_v57 = vrot.slane %v2350_v47, 9 }
 0x270   : > { %v8451_v63 = vsel %vm8125_vm6, %v8450_v51, %v11645_v32  ;;  %v9248_v5 = vrot.slane %v2351_v9, 9  ;;  %v9250_v44 = vrot.slane %v2352_v61, 9  ;;  %v6375_v7 = vmax.f32 %v2343_v42, %v9247_v58 }
 0x271   : > { %v8453_v20 = vsel %vm8128_vm7, %v8452_v30, %v8451_v63  ;;  %v8456_v11 = vrot.slane %v8050_v13, 1  ;;  %v6377_v1 = vmax.f32 %v2350_v47, %v9249_v57  ;;  %v1552_v41 = vadd.f32 %v11687_v27, %v11325_v25 }
 0x272   : > { %v8455_v52 = vsel %vm8131_vm8, %v8454_v4, %v8453_v20  ;;  %v6376_v48 = vmax.f32 %v2351_v9, %v9248_v5  ;;  %v6378_v32 = vmax.f32 %v2352_v61, %v9250_v44  ;;  %v6631_v10 = vmax.f32 %v11565_v0, %v6375_v7 }
 0x273   : > { %v8457_v53 = vsel %vm8134_vm9, %v8456_v11, %v8455_v52  ;;  %v6633_v38 = vmax.f32 %v11571_v60, %v6377_v1  ;;  %v1680_v23 = vmax.f32 %v1552_v41, 0.0  ;;  %v11701_v45 = vsel %vm8122_vm5, %v8434_v55, %v11648_v28  ;;  %v11712_v28 = vpop.f32.mrb[43].mxu1 }
 0x274   : > { %v8593_v25 = vpack.c.b16 %v8457_v53, %v8457_v53  ;;  %v6632_v40 = vmax.f32 %v11569_v50, %v6376_v48  ;;  %v6634_v43 = vmax.f32 %v11575_v31, %v6378_v32  ;;  %v9765_v16 = vpack.c.bf16 %v6631_v10, %v6631_v10  ;;  %12931 = vst [vmem:[#allocation15_spill] sm:$0xff] %v11712_v28 }
 0x275   : > { %v9767_v0 = vpack.c.bf16 %v6633_v38, %v6633_v38  ;;  %v3424_v33 = vcombine.high %v1680_v23, %v1680_v23  ;;  %v3431_v6 = vrot.slane %v1680_v23, %v10610_v14  ;;  %v1493_v60 = vadd.f32 %v11687_v27, %v11361_v35 }
 0x276   : > { %8658 = vst.msk [vmem:[%s10873_s18 + $0x5c] sm:$0xf] %vm8634_vm10, %v8593_v25  ;;  %v9766_v12 = vpack.c.bf16 %v6632_v40, %v6632_v40  ;;  %v9768_v18 = vpack.c.bf16 %v6634_v43, %v6634_v43  ;;  %v7911_v17 = vunpack.c.l.b16 %v9765_v16  ;;  %v1557_v55 = vadd.f32 %v11687_v27, %v11369_v29  ;;  %v11726_v25 = vpop.f32.mrb[44].mxu0  ;;  %v11728_v40 = vpop.f32.mrb[44].mxu1 }
 0x277   : > { %v7913_v50 = vunpack.c.l.b16 %v9767_v0  ;;  %v3438_v31 = vrot.slane %v3424_v33, %v10610_v14  ;;  %v3439_v59 = vcombine.high %v3431_v6, %v3431_v6  ;;  %v9375_v42 = vrot.slane %v3431_v6, 9  ;;  %12932 = vst [vmem:[#allocation16_spill] sm:$0xff] %v11726_v25  ;;  %12933 = vst [vmem:[#allocation21_spill] sm:$0xff] %v11728_v40 }
 0x278   : > { %v7912_v47 = vunpack.c.l.b16 %v9766_v12  ;;  %v7914_v3 = vunpack.c.l.b16 %v9768_v18  ;;  %v8212_v19 = vrot.slane %v7911_v17, 4  ;;  %v1621_v56 = vmax.f32 %v1493_v60, 0.0 }
 0x279   : > { %v8216_v35 = vrot.slane %v7913_v50, 2  ;;  %v3440_v24 = vcombine.high %v3438_v31, %v3438_v31  ;;  %v9376_v51 = vrot.slane %v3439_v59, 9  ;;  %v9377_v9 = vrot.slane %v3438_v31, 9 }
 0x27a   : > { %v8213_v61 = vsel %vm8125_vm6, %v8212_v19, %v11657_v49  ;;  %v8214_v58 = vrot.slane %v7912_v47, 3  ;;  %v8218_v29 = vrot.slane %v7914_v3, 1  ;;  %v6503_v13 = vmax.f32 %v3431_v6, %v9375_v42  ;;  %v11738_v42 = vpop.f32.mrb[45].mxu0 }
 0x27b   : > { %v9378_v30 = vrot.slane %v3440_v24, 9  ;;  %v6504_v4 = vmax.f32 %v3439_v59, %v9376_v51  ;;  %v6505_v57 = vmax.f32 %v3438_v31, %v9377_v9  ;;  %v2421_v63 = vcombine.high %v1621_v56, %v1621_v56  ;;  %12934 = vst [vmem:[#allocation8_spill] sm:$0xff] %v11738_v42  ;;  %v12935_v9 = vld [vmem:[#allocation22_spill] sm:$0xff]  ;;  %v12950_v42 = vld [vmem:[#allocation20_spill] sm:$0xff] }
 0x27c   : > { %v8215_v5 = vsel %vm8128_vm7, %v8214_v58, %v8213_v61  ;;  %v6759_v44 = vmax.f32 %v11573_v39, %v6503_v13  ;;  %v2428_v7 = vrot.slane %v1621_v56, %v10610_v14  ;;  %v1685_v20 = vmax.f32 %v1557_v55, 0.0 }
 0x27d   : > { %v8217_v11 = vsel %vm8131_vm8, %v8216_v35, %v8215_v5  ;;  %v6506_v1 = vmax.f32 %v3440_v24, %v9378_v30  ;;  %v6760_v41 = vmax.f32 %v11577_v22, %v6504_v4  ;;  %v6761_v49 = vmax.f32 %v11579_v2, %v6505_v57 }
 0x27e   : > { %v8219_v52 = vsel %vm8134_vm9, %v8218_v29, %v8217_v11  ;;  %v9893_v48 = vpack.c.bf16 %v6759_v44, %v6759_v44  ;;  %v2435_v32 = vrot.slane %v2421_v63, %v10610_v14  ;;  %v2436_v10 = vcombine.high %v2428_v7, %v2428_v7  ;;  %v12936_v63 = vld [vmem:[#allocation23_spill] sm:$0xff] }
 0x27f   : > { %v8576_v53 = vpack.c.b16 %v8219_v52, %v8219_v52  ;;  %v6762_v39 = vmax.f32 %v11582_v46, %v6506_v1  ;;  %v9894_v38 = vpack.c.bf16 %v6760_v41, %v6760_v41  ;;  %v9895_v23 = vpack.c.bf16 %v6761_v49, %v6761_v49 }
 0x280   : > { %v8039_v43 = vunpack.c.l.b16 %v9893_v48  ;;  %v2437_v22 = vcombine.high %v2435_v32, %v2435_v32  ;;  %v9011_v16 = vrot.slane %v2428_v7, 9  ;;  %v9012_v0 = vrot.slane %v2436_v10, 9 }
 0x281   : > { %8641 = vst.msk [vmem:[%s10873_s18 + $0x18] sm:$0xf] %vm8634_vm10, %v8576_v53  ;;  %v9896_v2 = vpack.c.bf16 %v6762_v39, %v6762_v39  ;;  %v8040_v33 = vunpack.c.l.b16 %v9894_v38  ;;  %v8041_v6 = vunpack.c.l.b16 %v9895_v23  ;;  %v9013_v60 = vrot.slane %v2435_v32, 9 }
 0x282   : > { %v8436_v12 = vrot.slane %v8039_v43, 4  ;;  %v9014_v18 = vrot.slane %v2437_v22, 9  ;;  %v11732_v17 = vmax.f32 %v2428_v7, %v9011_v16  ;;  %v11734_v46 = vmax.f32 %v2436_v10, %v9012_v0  ;;  %v11767_v43 = vpop.f32.mrb[45].mxu1 }
 0x283   : > { %v8042_v55 = vunpack.c.l.b16 %v9896_v2  ;;  %v8438_v50 = vrot.slane %v8040_v33, 3  ;;  %v8440_v31 = vrot.slane %v8041_v6, 2  ;;  %v11736_v59 = vmax.f32 %v2435_v32, %v9013_v60  ;;  %12937 = vst [vmem:[#allocation7_spill] sm:$0xff] %v11767_v43  ;;  %v12949_v43 = vld [vmem:[#allocation19_spill] sm:$0xff] }
 0x284   : > { %v8437_v47 = vsel %vm8125_vm6, %v8436_v12, %v11701_v45  ;;  %v11742_v3 = vmax.f32 %v2437_v22, %v9014_v18  ;;  %v3509_v19 = vcombine.high %v1685_v20, %v1685_v20  ;;  %v3516_v56 = vrot.slane %v1685_v20, %v10610_v14 }
 0x285   : > { %v8439_v35 = vsel %vm8128_vm7, %v8438_v50, %v8437_v47  ;;  %v8442_v24 = vrot.slane %v8042_v55, 1  ;;  %v1491_v51 = vadd.f32 %v11687_v27, %v11396_v15  ;;  %v1555_v61 = vadd.f32 %v11687_v27, %v12935_v9 }
 0x286   : > { %v8441_v58 = vsel %vm8131_vm8, %v8440_v31, %v8439_v35  ;;  %v3523_v29 = vrot.slane %v3509_v19, %v10610_v14  ;;  %v3524_v45 = vcombine.high %v3516_v56, %v3516_v56  ;;  %v9139_v13 = vrot.slane %v3516_v56, 9 }
 0x287   : > { %v8443_v30 = vsel %vm8134_vm9, %v8442_v24, %v8441_v58  ;;  %v1619_v4 = vmax.f32 %v1491_v51, 0.0  ;;  %v1683_v57 = vmax.f32 %v1555_v61, 0.0  ;;  %v1494_v5 = vadd.f32 %v11687_v27, %v12936_v63 }
 0x288   : > { %v8592_v44 = vpack.c.b16 %v8443_v30, %v8443_v30  ;;  %v3525_v7 = vcombine.high %v3523_v29, %v3523_v29  ;;  %v9140_v15 = vrot.slane %v3524_v45, 9  ;;  %v9141_v20 = vrot.slane %v3523_v29, 9  ;;  %v12939_v30 = vld [vmem:[#allocation25_spill] sm:$0xff] }
 0x289   : > { %v11755_v11 = vmax.f32 %v3516_v56, %v9139_v13  ;;  %v2387_v1 = vcombine.high %v1619_v4, %v1619_v4  ;;  %v2394_v41 = vrot.slane %v1619_v4, %v10610_v14  ;;  %v3475_v49 = vcombine.high %v1683_v57, %v1683_v57 }
 0x28a   : > { %8657 = vst.msk [vmem:[%s10873_s18 + $0x58] sm:$0xf] %vm8634_vm10, %v8592_v44  ;;  %v9142_v52 = vrot.slane %v3525_v7, 9  ;;  %v11760_v48 = vmax.f32 %v3524_v45, %v9140_v15  ;;  %v11762_v32 = vmax.f32 %v3523_v29, %v9141_v20  ;;  %v3482_v10 = vrot.slane %v1683_v57, %v10610_v14  ;;  %v12938_v45 = vld [vmem:[#allocation24_spill] sm:$0xff]  ;;  %v12940_v44 = vld [vmem:[#allocation26_spill] sm:$0xff] }
 0x28b   : > { %v2401_v53 = vrot.slane %v2387_v1, %v10610_v14  ;;  %v2402_v39 = vcombine.high %v2394_v41, %v2394_v41  ;;  %v9003_v38 = vrot.slane %v2394_v41, 9  ;;  %v3489_v23 = vrot.slane %v3475_v49, %v10610_v14 }
 0x28c   : > { %v11769_v22 = vmax.f32 %v3525_v7, %v9142_v52  ;;  %v3490_v16 = vcombine.high %v3482_v10, %v3482_v10  ;;  %v9131_v0 = vrot.slane %v3482_v10, 9  ;;  %v1622_v2 = vmax.f32 %v1494_v5, 0.0 }
 0x28d   : > { %v2403_v33 = vcombine.high %v2401_v53, %v2401_v53  ;;  %v9004_v6 = vrot.slane %v2402_v39, 9  ;;  %v9005_v60 = vrot.slane %v2401_v53, 9  ;;  %v11771_v12 = vmax.f32 %v2394_v41, %v9003_v38  ;;  %v11799_v38 = vpop.f32.mrb[46].mxu0 }
 0x28e   : > { %v3491_v18 = vcombine.high %v3489_v23, %v3489_v23  ;;  %v9132_v55 = vrot.slane %v3490_v16, 9  ;;  %v9133_v50 = vrot.slane %v3489_v23, 9  ;;  %v11773_v31 = vmax.f32 %v3482_v10, %v9131_v0  ;;  %12942 = vst [vmem:[#allocation9_spill] sm:$0xff] %v11799_v38  ;;  %v11858_v34 = vpop.f32.mrb[47].mxu0 }
 0x28f   : > { %v9006_v47 = vrot.slane %v2403_v33, 9  ;;  %v11775_v19 = vmax.f32 %v2402_v39, %v9004_v6  ;;  %v11777_v56 = vmax.f32 %v2401_v53, %v9005_v60  ;;  %v2438_v35 = vcombine.high %v1622_v2, %v1622_v2  ;;  %v12941_v53 = vld [vmem:[#allocation27_spill] sm:$0xff]  ;;  %12951 = vst [vmem:[#allocation26_spill] sm:$0xff] %v11858_v34 }
 0x290   : > { %v9134_v24 = vrot.slane %v3491_v18, 9  ;;  %v11779_v51 = vmax.f32 %v3490_v16, %v9132_v55  ;;  %v11781_v9 = vmax.f32 %v3489_v23, %v9133_v50  ;;  %v2445_v61 = vrot.slane %v1622_v2, %v10610_v14 }
 0x291   : > { %v11784_v58 = vmax.f32 %v2403_v33, %v9006_v47  ;;  %v2452_v29 = vrot.slane %v2438_v35, %v10610_v14  ;;  %v1558_v13 = vadd.f32 %v11687_v27, %v12938_v45  ;;  %v1492_v4 = vadd.f32 %v11687_v27, %v12939_v30 }
 0x292   : > { %v11791_v57 = vmax.f32 %v3491_v18, %v9134_v24  ;;  %v2453_v63 = vcombine.high %v2445_v61, %v2445_v61  ;;  %v9015_v5 = vrot.slane %v2445_v61, 9  ;;  %v1556_v7 = vadd.f32 %v11687_v27, %v12940_v44 }
 0x293   : > { %v2454_v15 = vcombine.high %v2452_v29, %v2452_v29  ;;  %v9017_v20 = vrot.slane %v2452_v29, 9  ;;  %v1686_v1 = vmax.f32 %v1558_v13, 0.0  ;;  %v1620_v41 = vmax.f32 %v1492_v4, 0.0 }
 0x294   : > { %v9016_v49 = vrot.slane %v2453_v63, 9  ;;  %v11795_v52 = vmax.f32 %v2445_v61, %v9015_v5  ;;  %v1684_v10 = vmax.f32 %v1556_v7, 0.0  ;;  %v1497_v39 = vadd.f32 %v11687_v27, %v12941_v53 }
 0x295   : > { %v9018_v23 = vrot.slane %v2454_v15, 9  ;;  %v11801_v16 = vmax.f32 %v2452_v29, %v9017_v20  ;;  %v3526_v0 = vcombine.high %v1686_v1, %v1686_v1  ;;  %v3533_v2 = vrot.slane %v1686_v1, %v10610_v14  ;;  %v11816_v20 = vpop.f32.mrb[46].mxu1 }
 0x296   : > { %v11804_v33 = vmax.f32 %v2453_v63, %v9016_v49  ;;  %v2404_v6 = vcombine.high %v1620_v41, %v1620_v41  ;;  %v2411_v60 = vrot.slane %v1620_v41, %v10610_v14  ;;  %v3492_v18 = vcombine.high %v1684_v10, %v1684_v10  ;;  %12943 = vst [vmem:[#allocation22_spill] sm:$0xff] %v11816_v20 }
 0x297   : > { %v11807_v55 = vmax.f32 %v2454_v15, %v9018_v23  ;;  %v3540_v50 = vrot.slane %v3526_v0, %v10610_v14  ;;  %v3541_v47 = vcombine.high %v3533_v2, %v3533_v2  ;;  %v9143_v35 = vrot.slane %v3533_v2, 9 }
 0x298   : > { %v2418_v24 = vrot.slane %v2404_v6, %v10610_v14  ;;  %v2419_v61 = vcombine.high %v2411_v60, %v2411_v60  ;;  %v9007_v29 = vrot.slane %v2411_v60, 9  ;;  %v3499_v45 = vrot.slane %v1684_v10, %v10610_v14 }
 0x299   : > { %v3542_v13 = vcombine.high %v3540_v50, %v3540_v50  ;;  %v9144_v30 = vrot.slane %v3541_v47, 9  ;;  %v9145_v4 = vrot.slane %v3540_v50, 9  ;;  %v11812_v63 = vmax.f32 %v3533_v2, %v9143_v35 }
 0x29a   : > { %v2420_v5 = vcombine.high %v2418_v24, %v2418_v24  ;;  %v9008_v44 = vrot.slane %v2419_v61, 9  ;;  %v9009_v7 = vrot.slane %v2418_v24, 9  ;;  %v11814_v15 = vmax.f32 %v2411_v60, %v9007_v29 }
 0x29b   : > { %v9146_v1 = vrot.slane %v3542_v13, 9  ;;  %v11818_v41 = vmax.f32 %v3541_v47, %v9144_v30  ;;  %v11820_v49 = vmax.f32 %v3540_v50, %v9145_v4  ;;  %v3506_v53 = vrot.slane %v3492_v18, %v10610_v14  ;;  %v12944_v30 = vld [vmem:[#allocation17_spill] sm:$0xff] }
 0x29c   : > { %v9010_v10 = vrot.slane %v2420_v5, 9  ;;  %v11823_v23 = vmax.f32 %v2419_v61, %v9008_v44  ;;  %v11825_v0 = vmax.f32 %v2418_v24, %v9009_v7  ;;  %v3507_v2 = vcombine.high %v3499_v45, %v3499_v45  ;;  %v12946_v24 = vld [vmem:[#allocation18_spill] sm:$0xff] }
 0x29d   : > { %v11827_v6 = vmax.f32 %v3542_v13, %v9146_v1  ;;  %v3508_v35 = vcombine.high %v3506_v53, %v3506_v53  ;;  %v9135_v60 = vrot.slane %v3499_v45, 9  ;;  %v9137_v29 = vrot.slane %v3506_v53, 9 }
 0x29e   : > { %v11829_v38 = vmax.f32 %v2420_v5, %v9010_v10  ;;  %v9136_v20 = vrot.slane %v3507_v2, 9  ;;  %v1625_v47 = vmax.f32 %v1497_v39, 0.0  ;;  %v1561_v50 = vadd.f32 %v11687_v27, %v12944_v30 }
 0x29f   : > { %v9138_v4 = vrot.slane %v3508_v35, 9  ;;  %v11833_v18 = vmax.f32 %v3499_v45, %v9135_v60  ;;  %v11835_v61 = vmax.f32 %v3506_v53, %v9137_v29  ;;  %v1495_v44 = vadd.f32 %v11687_v27, %v12946_v24 }
 0x2a0   : > { %v11839_v13 = vmax.f32 %v3507_v2, %v9136_v20  ;;  %v2489_v7 = vcombine.high %v1625_v47, %v1625_v47  ;;  %v2496_v1 = vrot.slane %v1625_v47, %v10610_v14  ;;  %v1689_v5 = vmax.f32 %v1561_v50, 0.0 }
 0x2a1   : > { %12945 = vst [vmem:[#allocation23_spill] sm:$0xff] %v11835_v61  ;;  %v11842_v10 = vmax.f32 %v3508_v35, %v9138_v4  ;;  %v1623_v39 = vmax.f32 %v1495_v44, 0.0  ;;  %v1559_v30 = vadd.f32 %v11687_v27, %v12949_v43  ;;  %v11848_v45 = vadd.f32 %v11687_v27, %v12950_v42 }
 0x2a2   : > { %12947 = vst [vmem:[#allocation24_spill] sm:$0xff] %v11839_v13  ;;  %v2503_v53 = vrot.slane %v2489_v7, %v10610_v14  ;;  %v2504_v60 = vcombine.high %v2496_v1, %v2496_v1  ;;  %v9267_v29 = vrot.slane %v2496_v1, 9  ;;  %v3577_v20 = vcombine.high %v1689_v5, %v1689_v5 }
 0x2a3   : > { %12948 = vst [vmem:[#allocation25_spill] sm:$0xff] %v11842_v10  ;;  %v3584_v2 = vrot.slane %v1689_v5, %v10610_v14  ;;  %v2455_v24 = vcombine.high %v1623_v39, %v1623_v39  ;;  %v2462_v47 = vrot.slane %v1623_v39, %v10610_v14  ;;  %v11853_v35 = vmax.f32 %v1559_v30, 0.0 }
 0x2a4   : > { %v2505_v50 = vcombine.high %v2503_v53, %v2503_v53  ;;  %v9268_v4 = vrot.slane %v2504_v60, 9  ;;  %v9269_v44 = vrot.slane %v2503_v53, 9  ;;  %v6395_v43 = vmax.f32 %v2496_v1, %v9267_v29 }
 0x2a5   : > { %v3591_v40 = vrot.slane %v3577_v20, %v10610_v14  ;;  %v3592_v42 = vcombine.high %v3584_v2, %v3584_v2  ;;  %v9395_v25 = vrot.slane %v3584_v2, 9  ;;  %v2469_v7 = vrot.slane %v2455_v24, %v10610_v14 }
 0x2a6   : > { %v9270_v28 = vrot.slane %v2505_v50, 9  ;;  %v6396_v62 = vmax.f32 %v2504_v60, %v9268_v4  ;;  %v6397_v37 = vmax.f32 %v2503_v53, %v9269_v44  ;;  %v6651_v5 = vmax.f32 %v11732_v17, %v6395_v43 }
 0x2a7   : > { %v3593_v39 = vcombine.high %v3591_v40, %v3591_v40  ;;  %v9396_v30 = vrot.slane %v3592_v42, 9  ;;  %v9397_v21 = vrot.slane %v3591_v40, 9  ;;  %v6523_v36 = vmax.f32 %v3584_v2, %v9395_v25 }
 0x2a8   : > { %v6398_v10 = vmax.f32 %v2505_v50, %v9270_v28  ;;  %v6652_v1 = vmax.f32 %v11734_v46, %v6396_v62  ;;  %v6653_v29 = vmax.f32 %v11736_v59, %v6397_v37  ;;  %v9785_v20 = vpack.c.bf16 %v6651_v5, %v6651_v5  ;;  %v11866_v62 = vpop.f32.mrb[47].mxu1 }
 0x2a9   : > { %v9398_v61 = vrot.slane %v3593_v39, 9  ;;  %v6524_v13 = vmax.f32 %v3592_v42, %v9396_v30  ;;  %v6525_v24 = vmax.f32 %v3591_v40, %v9397_v21  ;;  %v6779_v60 = vmax.f32 %v11755_v11, %v6523_v36 }
 0x2aa   : > { %v6654_v53 = vmax.f32 %v11742_v3, %v6398_v10  ;;  %v9786_v17 = vpack.c.bf16 %v6652_v1, %v6652_v1  ;;  %v9787_v4 = vpack.c.bf16 %v6653_v29, %v6653_v29  ;;  %v7931_v44 = vunpack.c.l.b16 %v9785_v20 }
 0x2ab   : > { %v6526_v43 = vmax.f32 %v3593_v39, %v9398_v61  ;;  %v6780_v34 = vmax.f32 %v11760_v48, %v6524_v13  ;;  %v6781_v28 = vmax.f32 %v11762_v32, %v6525_v24  ;;  %v9913_v25 = vpack.c.bf16 %v6779_v60, %v6779_v60 }
 0x2ac   : > { %v9788_v37 = vpack.c.bf16 %v6654_v53, %v6654_v53  ;;  %v7932_v46 = vunpack.c.l.b16 %v9786_v17  ;;  %v7933_v59 = vunpack.c.l.b16 %v9787_v4  ;;  %v2470_v2 = vcombine.high %v2462_v47, %v2462_v47 }
 0x2ad   : > { %v6782_v21 = vmax.f32 %v11769_v22, %v6526_v43  ;;  %v9914_v36 = vpack.c.bf16 %v6780_v34, %v6780_v34  ;;  %v9915_v40 = vpack.c.bf16 %v6781_v28, %v6781_v28  ;;  %v8059_v3 = vunpack.c.l.b16 %v9913_v25 }
 0x2ae   : > { %v11869_v11 = vunpack.c.l.b16 %v9788_v37  ;;  %v8248_v10 = vrot.slane %v7932_v46, 7  ;;  %v8250_v61 = vrot.slane %v7933_v59, 6  ;;  %v2471_v50 = vcombine.high %v2469_v7, %v2469_v7 }
 0x2af   : > { %v9916_v48 = vpack.c.bf16 %v6782_v21, %v6782_v21  ;;  %v8060_v13 = vunpack.c.l.b16 %v9914_v36  ;;  %v8061_v32 = vunpack.c.l.b16 %v9915_v40  ;;  %v9259_v42 = vrot.slane %v2462_v47, 9 }
 0x2b0   : > { %v8249_v5 = vsel %vm8116_vm3, %v8248_v10, %v7931_v44  ;;  %v8252_v39 = vrot.slane %v11869_v11, 5  ;;  %v9260_v30 = vrot.slane %v2470_v2, 9  ;;  %v9261_v1 = vrot.slane %v2469_v7, 9 }
 0x2b1   : > { %v8251_v22 = vsel %vm8119_vm4, %v8250_v61, %v8249_v5  ;;  %v11874_v34 = vunpack.c.l.b16 %v9916_v48  ;;  %v8472_v29 = vrot.slane %v8060_v13, 7  ;;  %v8474_v20 = vrot.slane %v8061_v32, 6 }
 0x2b2   : > { %v9262_v24 = vrot.slane %v2471_v50, 9  ;;  %v6387_v60 = vmax.f32 %v2462_v47, %v9259_v42  ;;  %v6388_v53 = vmax.f32 %v2470_v2, %v9260_v30  ;;  %v6389_v17 = vmax.f32 %v2469_v7, %v9261_v1 }
 0x2b3   : > { %v8473_v4 = vsel %vm8116_vm3, %v8472_v29, %v8059_v3  ;;  %v8476_v43 = vrot.slane %v11874_v34, 5  ;;  %v3543_v44 = vcombine.high %v11853_v35, %v11853_v35  ;;  %v3550_v28 = vrot.slane %v11853_v35, %v10610_v14 }
 0x2b4   : > { %v11883_v25 = vsel %vm8119_vm4, %v8474_v20, %v8473_v4  ;;  %v6390_v37 = vmax.f32 %v2471_v50, %v9262_v24  ;;  %v6643_v46 = vmax.f32 %v11771_v12, %v6387_v60  ;;  %v6644_v47 = vmax.f32 %v11775_v19, %v6388_v53 }
 0x2b5   : > { %v6645_v7 = vmax.f32 %v11777_v56, %v6389_v17  ;;  %v3557_v59 = vrot.slane %v3543_v44, %v10610_v14  ;;  %v3558_v2 = vcombine.high %v3550_v28, %v3550_v28  ;;  %v9387_v21 = vrot.slane %v3550_v28, 9 }
 0x2b6   : > { %v6646_v36 = vmax.f32 %v11784_v58, %v6390_v37  ;;  %v9777_v40 = vpack.c.bf16 %v6643_v46, %v6643_v46  ;;  %v9778_v3 = vpack.c.bf16 %v6644_v47, %v6644_v47  ;;  %v1626_v35 = vmax.f32 %v11848_v45, 0.0 }
 0x2b7   : > { %v9779_v10 = vpack.c.bf16 %v6645_v7, %v6645_v7  ;;  %v3559_v61 = vcombine.high %v3557_v59, %v3557_v59  ;;  %v9388_v48 = vrot.slane %v3558_v2, 9  ;;  %v9389_v50 = vrot.slane %v3557_v59, 9 }
 0x2b8   : > { %v9780_v13 = vpack.c.bf16 %v6646_v36, %v6646_v36  ;;  %v7923_v12 = vunpack.c.l.b16 %v9777_v40  ;;  %v7924_v32 = vunpack.c.l.b16 %v9778_v3  ;;  %v6515_v19 = vmax.f32 %v3550_v28, %v9387_v21 }
 0x2b9   : > { %v7925_v42 = vunpack.c.l.b16 %v9779_v10  ;;  %v9390_v56 = vrot.slane %v3559_v61, 9  ;;  %v6516_v5 = vmax.f32 %v3558_v2, %v9388_v48  ;;  %v6517_v30 = vmax.f32 %v3557_v59, %v9389_v50 }
 0x2ba   : > { %v7926_v1 = vunpack.c.l.b16 %v9780_v13  ;;  %v8234_v29 = vrot.slane %v7924_v32, 7  ;;  %v6771_v58 = vmax.f32 %v11773_v31, %v6515_v19  ;;  %v2506_v20 = vcombine.high %v1626_v35, %v1626_v35  ;;  %v12952_v32 = vld [vmem:[#allocation5_spill] sm:$0xff] }
 0x2bb   : > { %v8236_v24 = vrot.slane %v7925_v42, 6  ;;  %v6518_v60 = vmax.f32 %v3559_v61, %v9390_v56  ;;  %v6772_v45 = vmax.f32 %v11779_v51, %v6516_v5  ;;  %v6773_v53 = vmax.f32 %v11781_v9, %v6517_v30  ;;  %v11899_v51 = vpop.f32.mrb[48].mxu0  ;;  %v11901_v9 = vpop.f32.mrb[48].mxu1 }
 0x2bc   : > { %v8235_v17 = vsel %vm8116_vm3, %v8234_v29, %v7923_v12  ;;  %v8238_v4 = vrot.slane %v7926_v1, 5  ;;  %v9905_v44 = vpack.c.bf16 %v6771_v58, %v6771_v58  ;;  %v2513_v28 = vrot.slane %v1626_v35, %v10610_v14 }
 0x2bd   : > { %v8237_v37 = vsel %vm8119_vm4, %v8236_v24, %v8235_v17  ;;  %v6774_v46 = vmax.f32 %v11791_v57, %v6518_v60  ;;  %v9906_v47 = vpack.c.bf16 %v6772_v45, %v6772_v45  ;;  %v9907_v7 = vpack.c.bf16 %v6773_v53, %v6773_v53  ;;  %v12953_v53 = vld [vmem:[#allocation6_spill] sm:$0xff] }
 0x2be   : > { %v8051_v31 = vunpack.c.l.b16 %v9905_v44  ;;  %v2520_v59 = vrot.slane %v2506_v20, %v10610_v14  ;;  %v2521_v2 = vcombine.high %v2513_v28, %v2513_v28  ;;  %v9271_v21 = vrot.slane %v2513_v28, 9 }
 0x2bf   : > { %v9908_v36 = vpack.c.bf16 %v6774_v46, %v6774_v46  ;;  %v8052_v40 = vunpack.c.l.b16 %v9906_v47  ;;  %v8053_v3 = vunpack.c.l.b16 %v9907_v7  ;;  %v8253_v35 = vsel %vm8122_vm5, %v8252_v39, %v8251_v22 }
 0x2c0   : > { %v2522_v10 = vcombine.high %v2520_v59, %v2520_v59  ;;  %v9272_v57 = vrot.slane %v2521_v2, 9  ;;  %v9273_v61 = vrot.slane %v2520_v59, 9  ;;  %v6399_v48 = vmax.f32 %v2513_v28, %v9271_v21  ;;  %v11931_v28 = vpop.f32.mrb[49].mxu0 }
 0x2c1   : > { %v11906_v50 = vunpack.c.l.b16 %v9908_v36  ;;  %v8458_v13 = vrot.slane %v8052_v40, 7  ;;  %v8460_v12 = vrot.slane %v8053_v3, 6  ;;  %v1562_v19 = vadd.f32 %v11687_v27, %v12952_v32 }
 0x2c2   : > { %v9274_v42 = vrot.slane %v2522_v10, 9  ;;  %v6400_v56 = vmax.f32 %v2521_v2, %v9272_v57  ;;  %v6401_v5 = vmax.f32 %v2520_v59, %v9273_v61  ;;  %v6655_v30 = vmax.f32 %v11795_v52, %v6399_v48 }
 0x2c3   : > { %v8459_v11 = vsel %vm8116_vm3, %v8458_v13, %v8051_v31  ;;  %v8462_v39 = vrot.slane %v11906_v50, 5  ;;  %v1690_v22 = vmax.f32 %v1562_v19, 0.0  ;;  %v11917_v1 = vsel %vm8122_vm5, %v8476_v43, %v11883_v25 }
 0x2c4   : > { %v11920_v29 = vsel %vm8119_vm4, %v8460_v12, %v8459_v11  ;;  %v6402_v58 = vmax.f32 %v2522_v10, %v9274_v42  ;;  %v6656_v20 = vmax.f32 %v11804_v33, %v6400_v56  ;;  %v6657_v24 = vmax.f32 %v11801_v16, %v6401_v5 }
 0x2c5   : > { %v9789_v52 = vpack.c.bf16 %v6655_v30, %v6655_v30  ;;  %v3594_v60 = vcombine.high %v1690_v22, %v1690_v22  ;;  %v3601_v45 = vrot.slane %v1690_v22, %v10610_v14  ;;  %v1496_v17 = vadd.f32 %v11687_v27, %v12953_v53 }
 0x2c6   : > { %v6658_v34 = vmax.f32 %v11807_v55, %v6402_v58  ;;  %v9790_v44 = vpack.c.bf16 %v6656_v20, %v6656_v20  ;;  %v9791_v43 = vpack.c.bf16 %v6657_v24, %v6657_v24  ;;  %v11929_v25 = vsel %vm8122_vm5, %v8238_v4, %v8237_v37  ;;  %v11934_v37 = vpop.f32.mrb[49].mxu1 }
 0x2c7   : > { %v7935_v46 = vunpack.c.l.b16 %v9789_v52  ;;  %v3608_v33 = vrot.slane %v3594_v60, %v10610_v14  ;;  %v3609_v16 = vcombine.high %v3601_v45, %v3601_v45  ;;  %v9399_v47 = vrot.slane %v3601_v45, 9  ;;  %v11945_v52 = vpop.f32.mrb[50].mxu0 }
 0x2c8   : > { %v9792_v7 = vpack.c.bf16 %v6658_v34, %v6658_v34  ;;  %v7936_v31 = vunpack.c.l.b16 %v9790_v44  ;;  %v7937_v59 = vunpack.c.l.b16 %v9791_v43  ;;  %v1624_v2 = vmax.f32 %v1496_v17, 0.0  ;;  %12954 = vst [vmem:[#allocation27_spill] sm:$0xff] %v11945_v52  ;;  %v11948_v43 = vpop.f32.mrb[50].mxu1 }
 0x2c9   : > { %v8254_v21 = vrot.slane %v7935_v46, 4  ;;  %v3610_v36 = vcombine.high %v3608_v33, %v3608_v33  ;;  %v9400_v40 = vrot.slane %v3609_v16, 9  ;;  %v9401_v55 = vrot.slane %v3608_v33, 9  ;;  %12955 = vst [vmem:[#allocation17_spill] sm:$0xff] %v11948_v43 }
 0x2ca   : > { %v7938_v3 = vunpack.c.l.b16 %v9792_v7  ;;  %v8256_v10 = vrot.slane %v7936_v31, 3  ;;  %v8258_v57 = vrot.slane %v7937_v59, 2  ;;  %v6527_v4 = vmax.f32 %v3601_v45, %v9399_v47 }
 0x2cb   : > { %v8255_v61 = vsel %vm8125_vm6, %v8254_v21, %v8253_v35  ;;  %v9402_v48 = vrot.slane %v3610_v36, 9  ;;  %v6528_v13 = vmax.f32 %v3609_v16, %v9400_v40  ;;  %v6529_v12 = vmax.f32 %v3608_v33, %v9401_v55 }
 0x2cc   : > { %v8257_v32 = vsel %vm8128_vm7, %v8256_v10, %v8255_v61  ;;  %v8260_v19 = vrot.slane %v7938_v3, 1  ;;  %v6783_v42 = vmax.f32 %v11812_v63, %v6527_v4  ;;  %v2472_v56 = vcombine.high %v1624_v2, %v1624_v2 }
 0x2cd   : > { %v8259_v5 = vsel %vm8131_vm8, %v8258_v57, %v8257_v32  ;;  %v6530_v30 = vmax.f32 %v3610_v36, %v9402_v48  ;;  %v6784_v11 = vmax.f32 %v11818_v41, %v6528_v13  ;;  %v6785_v22 = vmax.f32 %v11820_v49, %v6529_v12  ;;  %v11955_v57 = vpop.f32.mrb[51].mxu0 }
 0x2ce   : > { %v8261_v58 = vsel %vm8134_vm9, %v8260_v19, %v8259_v5  ;;  %v9917_v35 = vpack.c.bf16 %v6783_v42, %v6783_v42  ;;  %v2479_v20 = vrot.slane %v1624_v2, %v10610_v14  ;;  %v2486_v24 = vrot.slane %v2472_v56, %v10610_v14  ;;  %12956 = vst [vmem:[#allocation18_spill] sm:$0xff] %v11955_v57 }
 0x2cf   : > { %v8579_v60 = vpack.c.b16 %v8261_v58, %v8261_v58  ;;  %v6786_v63 = vmax.f32 %v11827_v6, %v6530_v30  ;;  %v9918_v45 = vpack.c.bf16 %v6784_v11, %v6784_v11  ;;  %v9919_v53 = vpack.c.bf16 %v6785_v22, %v6785_v22 }
 0x2d0   : > { %v8063_v17 = vunpack.c.l.b16 %v9917_v35  ;;  %v2487_v34 = vcombine.high %v2479_v20, %v2479_v20  ;;  %v2488_v41 = vcombine.high %v2486_v24, %v2486_v24  ;;  %v9263_v44 = vrot.slane %v2479_v20, 9 }
 0x2d1   : > { %8644 = vst.msk [vmem:[%s10873_s18 + $0x24] sm:$0xf] %vm8634_vm10, %v8579_v60  ;;  %v9920_v49 = vpack.c.bf16 %v6786_v63, %v6786_v63  ;;  %v8064_v46 = vunpack.c.l.b16 %v9918_v45  ;;  %v8065_v33 = vunpack.c.l.b16 %v9919_v53  ;;  %v9265_v16 = vrot.slane %v2486_v24, 9 }
 0x2d2   : > { %v8478_v47 = vrot.slane %v8063_v17, 4  ;;  %v9264_v7 = vrot.slane %v2487_v34, 9  ;;  %v9266_v31 = vrot.slane %v2488_v41, 9  ;;  %v6391_v59 = vmax.f32 %v2479_v20, %v9263_v44 }
 0x2d3   : > { %v8066_v2 = vunpack.c.l.b16 %v9920_v49  ;;  %v8480_v6 = vrot.slane %v8064_v46, 3  ;;  %v8482_v21 = vrot.slane %v8065_v33, 2  ;;  %v6393_v36 = vmax.f32 %v2486_v24, %v9265_v16 }
 0x2d4   : > { %v8479_v40 = vsel %vm8125_vm6, %v8478_v47, %v11917_v1  ;;  %v6392_v55 = vmax.f32 %v2487_v34, %v9264_v7  ;;  %v6394_v3 = vmax.f32 %v2488_v41, %v9266_v31  ;;  %v6647_v10 = vmax.f32 %v11814_v15, %v6391_v59 }
 0x2d5   : > { %v8481_v4 = vsel %vm8128_vm7, %v8480_v6, %v8479_v40  ;;  %v8484_v61 = vrot.slane %v8066_v2, 1  ;;  %v6649_v48 = vmax.f32 %v11825_v0, %v6393_v36  ;;  %v1560_v13 = vadd.f32 %v11687_v27, %v11597_v26 }
 0x2d6   : > { %v8483_v12 = vsel %vm8131_vm8, %v8482_v21, %v8481_v4  ;;  %v6648_v32 = vmax.f32 %v11823_v23, %v6392_v55  ;;  %v6650_v1 = vmax.f32 %v11829_v38, %v6394_v3  ;;  %v9781_v19 = vpack.c.bf16 %v6647_v10, %v6647_v10  ;;  %v12958_v3 = vld [vmem:[#allocation24_spill] sm:$0xff]  ;;  %v12959_v4 = vld [vmem:[#allocation23_spill] sm:$0xff] }
 0x2d7   : > { %v8485_v15 = vsel %vm8134_vm9, %v8484_v61, %v8483_v12  ;;  %v9783_v42 = vpack.c.bf16 %v6649_v48, %v6649_v48  ;;  %v1688_v56 = vmax.f32 %v1560_v13, 0.0  ;;  %v11969_v0 = vsel %vm8122_vm5, %v8462_v39, %v11920_v29  ;;  %v11978_v39 = vpop.f32.mrb[51].mxu1 }
 0x2d8   : > { %v8595_v5 = vpack.c.b16 %v8485_v15, %v8485_v15  ;;  %v9782_v26 = vpack.c.bf16 %v6648_v32, %v6648_v32  ;;  %v9784_v30 = vpack.c.bf16 %v6650_v1, %v6650_v1  ;;  %v7927_v11 = vunpack.c.l.b16 %v9781_v19  ;;  %12957 = vst [vmem:[#allocation19_spill] sm:$0xff] %v11978_v39  ;;  %v11991_v1 = vpop.f32.mrb[52].mxu0  ;;  %v11993_v19 = vpop.f32.mrb[52].mxu1 }
 0x2d9   : > { %v7929_v22 = vunpack.c.l.b16 %v9783_v42  ;;  %v3560_v58 = vcombine.high %v1688_v56, %v1688_v56  ;;  %v3567_v23 = vrot.slane %v1688_v56, %v10610_v14  ;;  %v1501_v38 = vadd.f32 %v11687_v27, %v11626_v54  ;;  %12960 = vst [vmem:[#allocation20_spill] sm:$0xff] %v11991_v1  ;;  %12961 = vst [vmem:[#allocation5_spill] sm:$0xff] %v11993_v19 }
 0x2da   : > { %8660 = vst.msk [vmem:[%s10873_s18 + $0x64] sm:$0xf] %vm8634_vm10, %v8595_v5  ;;  %v7928_v35 = vunpack.c.l.b16 %v9782_v26  ;;  %v7930_v20 = vunpack.c.l.b16 %v9784_v30  ;;  %v8240_v24 = vrot.slane %v7927_v11, 4  ;;  %v1565_v50 = vadd.f32 %v11687_v27, %v11629_v8 }
 0x2db   : > { %v8244_v29 = vrot.slane %v7929_v22, 2  ;;  %v3574_v60 = vrot.slane %v3560_v58, %v10610_v14  ;;  %v3575_v63 = vcombine.high %v3567_v23, %v3567_v23  ;;  %v9391_v45 = vrot.slane %v3567_v23, 9 }
 0x2dc   : > { %v8241_v53 = vsel %vm8125_vm6, %v8240_v24, %v11929_v25  ;;  %v8242_v17 = vrot.slane %v7928_v35, 3  ;;  %v8246_v54 = vrot.slane %v7930_v20, 1  ;;  %v1629_v34 = vmax.f32 %v1501_v38, 0.0 }
 0x2dd   : > { %v3576_v41 = vcombine.high %v3574_v60, %v3574_v60  ;;  %v9392_v44 = vrot.slane %v3575_v63, 9  ;;  %v9393_v49 = vrot.slane %v3574_v60, 9  ;;  %v6519_v46 = vmax.f32 %v3567_v23, %v9391_v45 }
 0x2de   : > { %v8243_v33 = vsel %vm8128_vm7, %v8242_v17, %v8241_v53  ;;  %v2557_v8 = vcombine.high %v1629_v34, %v1629_v34  ;;  %v2564_v16 = vrot.slane %v1629_v34, %v10610_v14  ;;  %v1693_v47 = vmax.f32 %v1565_v50, 0.0  ;;  %v12964_v53 = vld [vmem:[#allocation10_spill] sm:$0xff] }
 0x2df   : > { %v8245_v7 = vsel %vm8131_vm8, %v8244_v29, %v8243_v33  ;;  %v9394_v31 = vrot.slane %v3576_v41, 9  ;;  %v6520_v59 = vmax.f32 %v3575_v63, %v9392_v44  ;;  %v6521_v2 = vmax.f32 %v3574_v60, %v9393_v49  ;;  %v12005_v29 = vpop.f32.mrb[53].mxu0 }
 0x2e0   : > { %v8247_v25 = vsel %vm8134_vm9, %v8246_v54, %v8245_v7  ;;  %v6775_v6 = vmax.f32 %v11833_v18, %v6519_v46  ;;  %v2571_v21 = vrot.slane %v2557_v8, %v10610_v14  ;;  %v2572_v36 = vcombine.high %v2564_v16, %v2564_v16  ;;  %v12962_v18 = vld [vmem:[#allocation25_spill] sm:$0xff]  ;;  %12963 = vst [vmem:[#allocation6_spill] sm:$0xff] %v12005_v29  ;;  %v12965_v8 = vld [vmem:[#allocation11_spill] sm:$0xff] }
 0x2e1   : > { %v8578_v40 = vpack.c.b16 %v8247_v25, %v8247_v25  ;;  %v6522_v55 = vmax.f32 %v3576_v41, %v9394_v31  ;;  %v6776_v10 = vmax.f32 %v12958_v3, %v6520_v59  ;;  %v6777_v61 = vmax.f32 %v12959_v4, %v6521_v2 }
 0x2e2   : > { %v9909_v48 = vpack.c.bf16 %v6775_v6, %v6775_v6  ;;  %v2573_v13 = vcombine.high %v2571_v21, %v2571_v21  ;;  %v9027_v12 = vrot.slane %v2564_v16, 9  ;;  %v9028_v32 = vrot.slane %v2572_v36, 9 }
 0x2e3   : > { %8643 = vst.msk [vmem:[%s10873_s18 + $0x20] sm:$0xf] %vm8634_vm10, %v8578_v40  ;;  %v6778_v15 = vmax.f32 %v12962_v18, %v6522_v55  ;;  %v9910_v42 = vpack.c.bf16 %v6776_v10, %v6776_v10  ;;  %v9911_v56 = vpack.c.bf16 %v6777_v61, %v6777_v61  ;;  %v9029_v5 = vrot.slane %v2571_v21, 9  ;;  %v12967_v18 = vld [vmem:[#allocation13_spill] sm:$0xff] }
 0x2e4   : > { %v8055_v26 = vunpack.c.l.b16 %v9909_v48  ;;  %v9030_v30 = vrot.slane %v2573_v13, 9  ;;  %v11998_v11 = vmax.f32 %v2564_v16, %v9027_v12  ;;  %v12000_v38 = vmax.f32 %v2572_v36, %v9028_v32  ;;  %v12966_v12 = vld [vmem:[#allocation12_spill] sm:$0xff] }
 0x2e5   : > { %v9912_v22 = vpack.c.bf16 %v6778_v15, %v6778_v15  ;;  %v8056_v58 = vunpack.c.l.b16 %v9910_v42  ;;  %v8057_v23 = vunpack.c.l.b16 %v9911_v56  ;;  %v12002_v20 = vmax.f32 %v2571_v21, %v9029_v5 }
 0x2e6   : > { %v8464_v35 = vrot.slane %v8055_v26, 4  ;;  %v3645_v24 = vcombine.high %v1693_v47, %v1693_v47  ;;  %v3652_v50 = vrot.slane %v1693_v47, %v10610_v14  ;;  %v1499_v17 = vadd.f32 %v11687_v27, %v12964_v53  ;;  %v12968_v26 = vld [vmem:[#allocation14_spill] sm:$0xff] }
 0x2e7   : > { %v8058_v60 = vunpack.c.l.b16 %v9912_v22  ;;  %v8466_v63 = vrot.slane %v8056_v58, 3  ;;  %v8468_v45 = vrot.slane %v8057_v23, 2  ;;  %v1563_v16 = vadd.f32 %v11687_v27, %v12965_v8  ;;  %v12042_v22 = vpop.f32.mrb[53].mxu1 }
 0x2e8   : > { %v8465_v54 = vsel %vm8125_vm6, %v8464_v35, %v11969_v0  ;;  %v3659_v34 = vrot.slane %v3645_v24, %v10610_v14  ;;  %v3660_v41 = vcombine.high %v3652_v50, %v3652_v50  ;;  %v9155_v44 = vrot.slane %v3652_v50, 9  ;;  %12969 = vst [vmem:[#allocation24_spill] sm:$0xff] %v12042_v22 }
 0x2e9   : > { %v8467_v49 = vsel %vm8128_vm7, %v8466_v63, %v8465_v54  ;;  %v8470_v46 = vrot.slane %v8058_v60, 1  ;;  %v1627_v33 = vmax.f32 %v1499_v17, 0.0  ;;  %v12017_v0 = vmax.f32 %v2573_v13, %v9030_v30  ;;  %v12034_v13 = vld [vmem:[%s12822_s2] ss:$0 sm:$0xff] }
 0x2ea   : > { %v8469_v47 = vsel %vm8131_vm8, %v8468_v45, %v8467_v49  ;;  %v3661_v7 = vcombine.high %v3659_v34, %v3659_v34  ;;  %v9156_v31 = vrot.slane %v3660_v41, 9  ;;  %v9157_v59 = vrot.slane %v3659_v34, 9 }
 0x2eb   : > { %v8471_v2 = vsel %vm8134_vm9, %v8470_v46, %v8469_v47  ;;  %v2523_v25 = vcombine.high %v1627_v33, %v1627_v33  ;;  %v2530_v6 = vrot.slane %v1627_v33, %v10610_v14  ;;  %v12020_v40 = vmax.f32 %v3652_v50, %v9155_v44 }
 0x2ec   : > { %v8594_v21 = vpack.c.b16 %v8471_v2, %v8471_v2  ;;  %v9158_v36 = vrot.slane %v3661_v7, 9  ;;  %v12022_v55 = vmax.f32 %v3660_v41, %v9156_v31  ;;  %v1691_v4 = vmax.f32 %v1563_v16, 0.0 }
 0x2ed   : > { %v2537_v27 = vrot.slane %v2523_v25, %v10610_v14  ;;  %v2538_v3 = vcombine.high %v2530_v6, %v2530_v6  ;;  %v9019_v10 = vrot.slane %v2530_v6, 9  ;;  %v12027_v61 = vmax.f32 %v3659_v34, %v9157_v59  ;;  %v12058_v25 = vpop.f32.mrb[54].mxu0 }
 0x2ee   : > { %8659 = vst.msk [vmem:[%s10873_s18 + $0x60] sm:$0xf] %vm8634_vm10, %v8594_v21  ;;  %v12029_v48 = vmax.f32 %v3661_v7, %v9158_v36  ;;  %v1502_v32 = vadd.f32 %v12034_v13, %v12966_v12  ;;  %v1566_v15 = vadd.f32 %v12034_v13, %v12967_v18  ;;  %v1500_v30 = vadd.f32 %v12034_v13, %v12968_v26 }
 0x2ef   : > { %v2539_v42 = vcombine.high %v2537_v27, %v2537_v27  ;;  %v9020_v56 = vrot.slane %v2538_v3, 9  ;;  %v9021_v5 = vrot.slane %v2537_v27, 9  ;;  %v3611_v58 = vcombine.high %v1691_v4, %v1691_v4  ;;  %12970 = vst [vmem:[#allocation23_spill] sm:$0xff] %v12058_v25 }
 0x2f0   : > { %v3618_v23 = vrot.slane %v1691_v4, %v10610_v14  ;;  %v1630_v35 = vmax.f32 %v1502_v32, 0.0  ;;  %v1694_v24 = vmax.f32 %v1566_v15, 0.0  ;;  %v12045_v60 = vmax.f32 %v2530_v6, %v9019_v10 }
 0x2f1   : > { %v9022_v50 = vrot.slane %v2539_v42, 9  ;;  %v12047_v63 = vmax.f32 %v2538_v3, %v9020_v56  ;;  %v12049_v45 = vmax.f32 %v2537_v27, %v9021_v5  ;;  %v3625_v53 = vrot.slane %v3611_v58, %v10610_v14 }
 0x2f2   : > { %v3626_v17 = vcombine.high %v3618_v23, %v3618_v23  ;;  %v9147_v54 = vrot.slane %v3618_v23, 9  ;;  %v2574_v34 = vcombine.high %v1630_v35, %v1630_v35  ;;  %v2581_v41 = vrot.slane %v1630_v35, %v10610_v14 }
 0x2f3   : > { %v3662_v44 = vcombine.high %v1694_v24, %v1694_v24  ;;  %v3669_v49 = vrot.slane %v1694_v24, %v10610_v14  ;;  %v1628_v46 = vmax.f32 %v1500_v30, 0.0  ;;  %v12054_v33 = vmax.f32 %v2539_v42, %v9022_v50 }
 0x2f4   : > { %v3627_v8 = vcombine.high %v3625_v53, %v3625_v53  ;;  %v9148_v16 = vrot.slane %v3626_v17, 9  ;;  %v9149_v47 = vrot.slane %v3625_v53, 9  ;;  %v2588_v7 = vrot.slane %v2574_v34, %v10610_v14 }
 0x2f5   : > { %v2589_v31 = vcombine.high %v2581_v41, %v2581_v41  ;;  %v9031_v59 = vrot.slane %v2581_v41, 9  ;;  %v3676_v2 = vrot.slane %v3662_v44, %v10610_v14  ;;  %v12060_v21 = vmax.f32 %v3618_v23, %v9147_v54  ;;  %v12971_v54 = vld [vmem:[#allocation15_spill] sm:$0xff] }
 0x2f6   : > { %v9150_v6 = vrot.slane %v3627_v8, 9  ;;  %v12062_v36 = vmax.f32 %v3626_v17, %v9148_v16  ;;  %v3677_v27 = vcombine.high %v3669_v49, %v3669_v49  ;;  %v12064_v3 = vmax.f32 %v3625_v53, %v9149_v47  ;;  %v12973_v47 = vld [vmem:[#allocation21_spill] sm:$0xff] }
 0x2f7   : > { %v2590_v10 = vcombine.high %v2588_v7, %v2588_v7  ;;  %v9032_v4 = vrot.slane %v2589_v31, 9  ;;  %v9033_v12 = vrot.slane %v2588_v7, 9  ;;  %v12066_v32 = vmax.f32 %v2581_v41, %v9031_v59 }
 0x2f8   : > { %v3678_v18 = vcombine.high %v3676_v2, %v3676_v2  ;;  %v9159_v15 = vrot.slane %v3669_v49, 9  ;;  %v9160_v42 = vrot.slane %v3677_v27, 9  ;;  %v12068_v56 = vmax.f32 %v3627_v8, %v9150_v6  ;;  %v12972_v8 = vld [vmem:[#allocation16_spill] sm:$0xff] }
 0x2f9   : > { %v9034_v5 = vrot.slane %v2590_v10, 9  ;;  %v12070_v26 = vmax.f32 %v2589_v31, %v9032_v4  ;;  %v9161_v30 = vrot.slane %v3676_v2, 9  ;;  %v12072_v58 = vmax.f32 %v2588_v7, %v9033_v12  ;;  %v12974_v4 = vld [vmem:[#allocation8_spill] sm:$0xff] }
 0x2fa   : > { %v9162_v23 = vrot.slane %v3678_v18, 9  ;;  %v12074_v35 = vmax.f32 %v3669_v49, %v9159_v15  ;;  %v2540_v24 = vcombine.high %v1628_v46, %v1628_v46  ;;  %v12078_v53 = vmax.f32 %v3677_v27, %v9160_v42 }
 0x2fb   : > { %v12076_v50 = vmax.f32 %v2590_v10, %v9034_v5  ;;  %v2547_v17 = vrot.slane %v1628_v46, %v10610_v14  ;;  %v1564_v34 = vadd.f32 %v12034_v13, %v12971_v54  ;;  %v12083_v41 = vmax.f32 %v3676_v2, %v9161_v30  ;;  %v12095_v30 = vpop.f32.mrb[54].mxu1 }
 0x2fc   : > { %v2554_v44 = vrot.slane %v2540_v24, %v10610_v14  ;;  %v1505_v16 = vadd.f32 %v12034_v13, %v12972_v8  ;;  %v1569_v49 = vadd.f32 %v12034_v13, %v12973_v47  ;;  %v12090_v7 = vmax.f32 %v3678_v18, %v9162_v23  ;;  %12975 = vst [vmem:[#allocation25_spill] sm:$0xff] %v12095_v30 }
 0x2fd   : > { %v2555_v31 = vcombine.high %v2547_v17, %v2547_v17  ;;  %v9023_v59 = vrot.slane %v2547_v17, 9  ;;  %v1692_v6 = vmax.f32 %v1564_v34, 0.0  ;;  %v1503_v2 = vadd.f32 %v12034_v13, %v12974_v4 }
 0x2fe   : > { %v2556_v27 = vcombine.high %v2554_v44, %v2554_v44  ;;  %v9025_v46 = vrot.slane %v2554_v44, 9  ;;  %v1633_v10 = vmax.f32 %v1505_v16, 0.0  ;;  %v1697_v5 = vmax.f32 %v1569_v49, 0.0 }
 0x2ff   : > { %v9024_v12 = vrot.slane %v2555_v31, 9  ;;  %v3628_v15 = vcombine.high %v1692_v6, %v1692_v6  ;;  %v3635_v42 = vrot.slane %v1692_v6, %v10610_v14  ;;  %v12097_v54 = vmax.f32 %v2547_v17, %v9023_v59 }
 0x300   : > { %v9026_v24 = vrot.slane %v2556_v27, 9  ;;  %v2625_v18 = vcombine.high %v1633_v10, %v1633_v10  ;;  %v2632_v23 = vrot.slane %v1633_v10, %v10610_v14  ;;  %v12100_v34 = vmax.f32 %v2554_v44, %v9025_v46 }
 0x301   : > { %v3642_v8 = vrot.slane %v3628_v15, %v10610_v14  ;;  %v3643_v16 = vcombine.high %v3635_v42, %v3635_v42  ;;  %v9151_v47 = vrot.slane %v3635_v42, 9  ;;  %v12103_v4 = vmax.f32 %v2555_v31, %v9024_v12 }
 0x302   : > { %v2639_v25 = vrot.slane %v2625_v18, %v10610_v14  ;;  %v2640_v6 = vcombine.high %v2632_v23, %v2632_v23  ;;  %v9283_v49 = vrot.slane %v2632_v23, 9  ;;  %v12106_v22 = vmax.f32 %v2556_v27, %v9026_v24 }
 0x303   : > { %v12108_v30 = vcombine.high %v3642_v8, %v3642_v8  ;;  %v9152_v17 = vrot.slane %v3643_v16, 9  ;;  %v9153_v59 = vrot.slane %v3642_v8, 9  ;;  %v12111_v19 = vmax.f32 %v3635_v42, %v9151_v47 }
 0x304   : > { %v2641_v29 = vcombine.high %v2639_v25, %v2639_v25  ;;  %v9284_v10 = vrot.slane %v2640_v6, 9  ;;  %v9285_v44 = vrot.slane %v2639_v25, 9  ;;  %v6411_v46 = vmax.f32 %v2632_v23, %v9283_v49  ;;  %v12120_v23 = vpop.f32.mrb[55].mxu0 }
 0x305   : > { %v12113_v31 = vmax.f32 %v3643_v16, %v9152_v17  ;;  %v3713_v12 = vcombine.high %v1697_v5, %v1697_v5  ;;  %v12116_v24 = vmax.f32 %v3642_v8, %v9153_v59  ;;  %v3720_v57 = vrot.slane %v1697_v5, %v10610_v14  ;;  %12976 = vst [vmem:[#allocation10_spill] sm:$0xff] %v12120_v23 }
 0x306   : > { %v9286_v18 = vrot.slane %v2641_v29, 9  ;;  %v6412_v1 = vmax.f32 %v2640_v6, %v9284_v10  ;;  %v6413_v39 = vmax.f32 %v2639_v25, %v9285_v44  ;;  %v6667_v27 = vmax.f32 %v11998_v11, %v6411_v46 }
 0x307   : > { %v3727_v43 = vrot.slane %v3713_v12, %v10610_v14  ;;  %v1631_v52 = vmax.f32 %v1503_v2, 0.0  ;;  %v3728_v17 = vcombine.high %v3720_v57, %v3720_v57  ;;  %v9411_v25 = vrot.slane %v3720_v57, 9 }
 0x308   : > { %v6414_v49 = vmax.f32 %v2641_v29, %v9286_v18  ;;  %v6668_v42 = vmax.f32 %v12000_v38, %v6412_v1  ;;  %v6669_v16 = vmax.f32 %v12002_v20, %v6413_v39  ;;  %v9801_v47 = vpack.c.bf16 %v6667_v27, %v6667_v27 }
 0x309   : > { %v3729_v6 = vcombine.high %v3727_v43, %v3727_v43  ;;  %v9413_v10 = vrot.slane %v3727_v43, 9  ;;  %v9412_v44 = vrot.slane %v3728_v17, 9  ;;  %v6539_v2 = vmax.f32 %v3720_v57, %v9411_v25 }
 0x30a   : > { %v6670_v11 = vmax.f32 %v12017_v0, %v6414_v49  ;;  %v9802_v8 = vpack.c.bf16 %v6668_v42, %v6668_v42  ;;  %v9803_v59 = vpack.c.bf16 %v6669_v16, %v6669_v16  ;;  %v7947_v5 = vunpack.c.l.b16 %v9801_v47 }
 0x30b   : > { %v9414_v46 = vrot.slane %v3729_v6, 9  ;;  %v6541_v12 = vmax.f32 %v3727_v43, %v9413_v10  ;;  %v2591_v1 = vcombine.high %v1631_v52, %v1631_v52  ;;  %v6540_v38 = vmax.f32 %v3728_v17, %v9412_v44 }
 0x30c   : > { %v9804_v15 = vpack.c.bf16 %v6670_v11, %v6670_v11  ;;  %v7948_v29 = vunpack.c.l.b16 %v9802_v8  ;;  %v7949_v18 = vunpack.c.l.b16 %v9803_v59  ;;  %v6795_v20 = vmax.f32 %v12020_v40, %v6539_v2  ;;  %v12977_v2 = vld [vmem:[#allocation7_spill] sm:$0xff] }
 0x30d   : > { %v6542_v39 = vmax.f32 %v3729_v6, %v9414_v46  ;;  %v6797_v27 = vmax.f32 %v12027_v61, %v6541_v12  ;;  %v2598_v42 = vrot.slane %v1631_v52, %v10610_v14  ;;  %v6796_v16 = vmax.f32 %v12022_v55, %v6540_v38  ;;  %v12135_v61 = vpop.f32.mrb[55].mxu1 }
 0x30e   : > { %v12127_v23 = vunpack.c.l.b16 %v9804_v15  ;;  %v8276_v0 = vrot.slane %v7948_v29, 7  ;;  %v8278_v49 = vrot.slane %v7949_v18, 6  ;;  %v9929_v57 = vpack.c.bf16 %v6795_v20, %v6795_v20 }
 0x30f   : > { %v6798_v43 = vmax.f32 %v12029_v48, %v6542_v39  ;;  %v9931_v47 = vpack.c.bf16 %v6797_v27, %v6797_v27  ;;  %v2605_v40 = vrot.slane %v2591_v1, %v10610_v14  ;;  %v2606_v6 = vcombine.high %v2598_v42, %v2598_v42 }
 0x310   : > { %v8277_v25 = vsel %vm8116_vm3, %v8276_v0, %v7947_v5  ;;  %v8280_v17 = vrot.slane %v12127_v23, 5  ;;  %v9930_v10 = vpack.c.bf16 %v6796_v16, %v6796_v16  ;;  %v8075_v11 = vunpack.c.l.b16 %v9929_v57  ;;  %v12978_v57 = vld [vmem:[#allocation9_spill] sm:$0xff] }
 0x311   : > { %v12138_v15 = vsel %vm8119_vm4, %v8278_v49, %v8277_v25  ;;  %v9932_v52 = vpack.c.bf16 %v6798_v43, %v6798_v43  ;;  %v8077_v55 = vunpack.c.l.b16 %v9931_v47  ;;  %v2607_v8 = vcombine.high %v2605_v40, %v2605_v40 }
 0x312   : > { %v9275_v48 = vrot.slane %v2598_v42, 9  ;;  %v9276_v59 = vrot.slane %v2606_v6, 9  ;;  %v8076_v44 = vunpack.c.l.b16 %v9930_v10  ;;  %v9277_v5 = vrot.slane %v2605_v40, 9 }
 0x313   : > { %v12140_v46 = vunpack.c.l.b16 %v9932_v52  ;;  %v1567_v12 = vadd.f32 %v12034_v13, %v12977_v2  ;;  %v8502_v29 = vrot.slane %v8077_v55, 6  ;;  %v9278_v18 = vrot.slane %v2607_v8, 9 }
 0x314   : > { %v6403_v1 = vmax.f32 %v2598_v42, %v9275_v48  ;;  %v6404_v38 = vmax.f32 %v2606_v6, %v9276_v59  ;;  %v8500_v39 = vrot.slane %v8076_v44, 7  ;;  %v6405_v27 = vmax.f32 %v2605_v40, %v9277_v5 }
 0x315   : > { %v8504_v20 = vrot.slane %v12140_v46, 5  ;;  %v1695_v0 = vmax.f32 %v1567_v12, 0.0  ;;  %v6406_v49 = vmax.f32 %v2607_v8, %v9278_v18  ;;  %v1506_v47 = vadd.f32 %v12034_v13, %v12978_v57 }
 0x316   : > { %v6659_v16 = vmax.f32 %v12045_v60, %v6403_v1  ;;  %v6660_v43 = vmax.f32 %v12047_v63, %v6404_v38  ;;  %v8501_v25 = vsel %vm8116_vm3, %v8500_v39, %v8075_v11  ;;  %v6661_v10 = vmax.f32 %v12049_v45, %v6405_v27 }
 0x317   : > { %v3679_v52 = vcombine.high %v1695_v0, %v1695_v0  ;;  %v3686_v42 = vrot.slane %v1695_v0, %v10610_v14  ;;  %v12153_v6 = vsel %vm8119_vm4, %v8502_v29, %v8501_v25  ;;  %v6662_v40 = vmax.f32 %v12054_v33, %v6406_v49 }
 0x318   : > { %v9793_v55 = vpack.c.bf16 %v6659_v16, %v6659_v16  ;;  %v9794_v8 = vpack.c.bf16 %v6660_v43, %v6660_v43  ;;  %v9795_v60 = vpack.c.bf16 %v6661_v10, %v6661_v10  ;;  %v1634_v2 = vmax.f32 %v1506_v47, 0.0 }
 0x319   : > { %v3693_v63 = vrot.slane %v3679_v52, %v10610_v14  ;;  %v3694_v48 = vcombine.high %v3686_v42, %v3686_v42  ;;  %v9403_v59 = vrot.slane %v3686_v42, 9  ;;  %v9796_v44 = vpack.c.bf16 %v6662_v40, %v6662_v40 }
 0x31a   : > { %v7939_v5 = vunpack.c.l.b16 %v9793_v55  ;;  %v7940_v11 = vunpack.c.l.b16 %v9794_v8  ;;  %v7941_v45 = vunpack.c.l.b16 %v9795_v60  ;;  %v2642_v33 = vcombine.high %v1634_v2, %v1634_v2  ;;  %v12166_v55 = vpop.f32.mrb[56].mxu0 }
 0x31b   : > { %v3695_v12 = vcombine.high %v3693_v63, %v3693_v63  ;;  %v9404_v18 = vrot.slane %v3694_v48, 9  ;;  %v9405_v1 = vrot.slane %v3693_v63, 9  ;;  %v12157_v38 = vunpack.c.l.b16 %v9796_v44 }
 0x31c   : > { %v8262_v29 = vrot.slane %v7940_v11, 7  ;;  %v6531_v39 = vmax.f32 %v3686_v42, %v9403_v59  ;;  %v8264_v27 = vrot.slane %v7941_v45, 6  ;;  %v2649_v47 = vrot.slane %v1634_v2, %v10610_v14  ;;  %v12174_v45 = vpop.f32.mrb[56].mxu1 }
 0x31d   : > { %v9406_v0 = vrot.slane %v3695_v12, 9  ;;  %v6532_v49 = vmax.f32 %v3694_v48, %v9404_v18  ;;  %v6533_v16 = vmax.f32 %v3693_v63, %v9405_v1  ;;  %v8266_v57 = vrot.slane %v12157_v38, 5 }
 0x31e   : > { %v8263_v43 = vsel %vm8116_vm3, %v8262_v29, %v7939_v5  ;;  %v6787_v25 = vmax.f32 %v12060_v21, %v6531_v39  ;;  %v2656_v60 = vrot.slane %v2642_v33, %v10610_v14  ;;  %v2657_v63 = vcombine.high %v2649_v47, %v2649_v47  ;;  %v12979_v33 = vld [vmem:[#allocation22_spill] sm:$0xff] }
 0x31f   : > { %v8265_v10 = vsel %vm8119_vm4, %v8264_v27, %v8263_v43  ;;  %v6534_v52 = vmax.f32 %v3695_v12, %v9406_v0  ;;  %v6788_v40 = vmax.f32 %v12062_v36, %v6532_v49  ;;  %v6789_v42 = vmax.f32 %v12064_v3, %v6533_v16 }
 0x320   : > { %v9921_v8 = vpack.c.bf16 %v6787_v25, %v6787_v25  ;;  %v9287_v48 = vrot.slane %v2649_v47, 9  ;;  %v8281_v5 = vsel %vm8122_vm5, %v8280_v17, %v12138_v15  ;;  %v2658_v36 = vcombine.high %v2656_v60, %v2656_v60 }
 0x321   : > { %v6790_v59 = vmax.f32 %v12068_v56, %v6534_v52  ;;  %v9922_v44 = vpack.c.bf16 %v6788_v40, %v6788_v40  ;;  %v9923_v21 = vpack.c.bf16 %v6789_v42, %v6789_v42  ;;  %v9288_v2 = vrot.slane %v2657_v63, 9 }
 0x322   : > { %v8067_v11 = vunpack.c.l.b16 %v9921_v8  ;;  %v9289_v3 = vrot.slane %v2656_v60, 9  ;;  %v6415_v38 = vmax.f32 %v2649_v47, %v9287_v48  ;;  %v9290_v29 = vrot.slane %v2658_v36, 9 }
 0x323   : > { %v9924_v12 = vpack.c.bf16 %v6790_v59, %v6790_v59  ;;  %v8068_v18 = vunpack.c.l.b16 %v9922_v44  ;;  %v8069_v1 = vunpack.c.l.b16 %v9923_v21  ;;  %v6416_v39 = vmax.f32 %v2657_v63, %v9288_v2  ;;  %v12980_v59 = vld [vmem:[#allocation26_spill] sm:$0xff] }
 0x324   : > { %v6417_v56 = vmax.f32 %v2656_v60, %v9289_v3  ;;  %v1570_v27 = vadd.f32 %v12034_v13, %v12979_v33  ;;  %v6671_v15 = vmax.f32 %v12066_v32, %v6415_v38  ;;  %v6418_v49 = vmax.f32 %v2658_v36, %v9290_v29 }
 0x325   : > { %v12178_v0 = vunpack.c.l.b16 %v9924_v12  ;;  %v8486_v23 = vrot.slane %v8068_v18, 7  ;;  %v8488_v17 = vrot.slane %v8069_v1, 6  ;;  %v6672_v16 = vmax.f32 %v12070_v26, %v6416_v39 }
 0x326   : > { %v6673_v43 = vmax.f32 %v12072_v58, %v6417_v56  ;;  %v1698_v25 = vmax.f32 %v1570_v27, 0.0  ;;  %v9805_v40 = vpack.c.bf16 %v6671_v15, %v6671_v15  ;;  %v12189_v42 = vsel %vm8122_vm5, %v8504_v20, %v12153_v6  ;;  %v12201_v6 = vpop.f32.mrb[57].mxu0  ;;  %v12205_v27 = vpop.f32.mrb[57].mxu1 }
 0x327   : > { %v8487_v47 = vsel %vm8116_vm3, %v8486_v23, %v8067_v11  ;;  %v8490_v52 = vrot.slane %v12178_v0, 5  ;;  %v6674_v32 = vmax.f32 %v12076_v50, %v6418_v49  ;;  %v9806_v26 = vpack.c.bf16 %v6672_v16, %v6672_v16 }
 0x328   : > { %v12192_v8 = vsel %vm8119_vm4, %v8488_v17, %v8487_v47  ;;  %v9807_v60 = vpack.c.bf16 %v6673_v43, %v6673_v43  ;;  %v7951_v58 = vunpack.c.l.b16 %v9805_v40  ;;  %v3730_v63 = vcombine.high %v1698_v25, %v1698_v25 }
 0x329   : > { %v3737_v48 = vrot.slane %v1698_v25, %v10610_v14  ;;  %v1504_v44 = vadd.f32 %v12034_v13, %v12980_v59  ;;  %v9808_v21 = vpack.c.bf16 %v6674_v32, %v6674_v32  ;;  %v7952_v11 = vunpack.c.l.b16 %v9806_v26  ;;  %v12209_v25 = vpop.f32.mrb[58].mxu0 }
 0x32a   : > { %v7953_v46 = vunpack.c.l.b16 %v9807_v60  ;;  %v12199_v20 = vsel %vm8122_vm5, %v8266_v57, %v8265_v10  ;;  %v8282_v36 = vrot.slane %v7951_v58, 4  ;;  %v3744_v50 = vrot.slane %v3730_v63, %v10610_v14  ;;  %12981 = vst [vmem:[#allocation11_spill] sm:$0xff] %v12209_v25 }
 0x32b   : > { %v3745_v2 = vcombine.high %v3737_v48, %v3737_v48  ;;  %v9415_v3 = vrot.slane %v3737_v48, 9  ;;  %v7954_v12 = vunpack.c.l.b16 %v9808_v21  ;;  %v8284_v18 = vrot.slane %v7952_v11, 3 }
 0x32c   : > { %v8286_v1 = vrot.slane %v7953_v46, 2  ;;  %v1632_v38 = vmax.f32 %v1504_v44, 0.0  ;;  %v8283_v29 = vsel %vm8125_vm6, %v8282_v36, %v8281_v5  ;;  %v3746_v39 = vcombine.high %v3744_v50, %v3744_v50 }
 0x32d   : > { %v9416_v56 = vrot.slane %v3745_v2, 9  ;;  %v9417_v33 = vrot.slane %v3744_v50, 9  ;;  %v8285_v57 = vsel %vm8128_vm7, %v8284_v18, %v8283_v29  ;;  %v8288_v10 = vrot.slane %v7954_v12, 1  ;;  %v12220_v18 = vpop.f32.mrb[58].mxu1 }
 0x32e   : > { %v6543_v23 = vmax.f32 %v3737_v48, %v9415_v3  ;;  %v2608_v17 = vcombine.high %v1632_v38, %v1632_v38  ;;  %v8287_v15 = vsel %vm8131_vm8, %v8286_v1, %v8285_v57  ;;  %v9418_v49 = vrot.slane %v3746_v39, 9  ;;  %12982 = vst [vmem:[#allocation12_spill] sm:$0xff] %v12220_v18 }
 0x32f   : > { %v6544_v16 = vmax.f32 %v3745_v2, %v9416_v56  ;;  %v6545_v43 = vmax.f32 %v3744_v50, %v9417_v33  ;;  %v8289_v5 = vsel %vm8134_vm9, %v8288_v10, %v8287_v15  ;;  %v2615_v40 = vrot.slane %v1632_v38, %v10610_v14 }
 0x330   : > { %v6799_v47 = vmax.f32 %v12074_v35, %v6543_v23  ;;  %v2622_v32 = vrot.slane %v2608_v17, %v10610_v14  ;;  %v8581_v26 = vpack.c.b16 %v8289_v5, %v8289_v5  ;;  %v6546_v60 = vmax.f32 %v3746_v39, %v9418_v49 }
 0x331   : > { %v6800_v58 = vmax.f32 %v12078_v53, %v6544_v16  ;;  %v6801_v63 = vmax.f32 %v12083_v41, %v6545_v43  ;;  %v2623_v59 = vcombine.high %v2615_v40, %v2615_v40  ;;  %v9279_v21 = vrot.slane %v2615_v40, 9 }
 0x332   : > { %v9933_v48 = vpack.c.bf16 %v6799_v47, %v6799_v47  ;;  %v2624_v44 = vcombine.high %v2622_v32, %v2622_v32  ;;  %8646 = vst.msk [vmem:[%s10873_s18 + $0x2c] sm:$0xf] %vm8634_vm10, %v8581_v26  ;;  %v6802_v11 = vmax.f32 %v12090_v7, %v6546_v60  ;;  %v9281_v36 = vrot.slane %v2622_v32, 9  ;;  %v12232_v60 = vpop.f32.mrb[59].mxu0 }
 0x333   : > { %v9934_v46 = vpack.c.bf16 %v6800_v58, %v6800_v58  ;;  %v9935_v35 = vpack.c.bf16 %v6801_v63, %v6801_v63  ;;  %v9280_v2 = vrot.slane %v2623_v59, 9  ;;  %v6407_v12 = vmax.f32 %v2615_v40, %v9279_v21  ;;  %12983 = vst [vmem:[#allocation13_spill] sm:$0xff] %v12232_v60 }
 0x334   : > { %v8079_v50 = vunpack.c.l.b16 %v9933_v48  ;;  %v9282_v3 = vrot.slane %v2624_v44, 9  ;;  %v9936_v53 = vpack.c.bf16 %v6802_v11, %v6802_v11  ;;  %v6409_v38 = vmax.f32 %v2622_v32, %v9281_v36 }
 0x335   : > { %v8080_v1 = vunpack.c.l.b16 %v9934_v46  ;;  %v8081_v41 = vunpack.c.l.b16 %v9935_v35  ;;  %v6408_v39 = vmax.f32 %v2623_v59, %v9280_v2  ;;  %v6663_v33 = vmax.f32 %v12097_v54, %v6407_v12 }
 0x336   : > { %v8506_v29 = vrot.slane %v8079_v50, 4  ;;  %v6410_v56 = vmax.f32 %v2624_v44, %v9282_v3  ;;  %v8082_v57 = vunpack.c.l.b16 %v9936_v53  ;;  %v6665_v23 = vmax.f32 %v12100_v34, %v6409_v38 }
 0x337   : > { %v8508_v7 = vrot.slane %v8080_v1, 3  ;;  %v8510_v10 = vrot.slane %v8081_v41, 2  ;;  %v6664_v15 = vmax.f32 %v12103_v4, %v6408_v39  ;;  %v9797_v16 = vpack.c.bf16 %v6663_v33, %v6663_v33 }
 0x338   : > { %v8507_v17 = vsel %vm8125_vm6, %v8506_v29, %v12189_v42  ;;  %v6666_v49 = vmax.f32 %v12106_v22, %v6410_v56  ;;  %v8512_v5 = vrot.slane %v8082_v57, 1  ;;  %v9799_v47 = vpack.c.bf16 %v6665_v23, %v6665_v23  ;;  %v12234_v42 = vpop.f32.mrb[59].mxu1 }
 0x339   : > { %v8509_v43 = vsel %vm8128_vm7, %v8508_v7, %v8507_v17  ;;  %v1568_v54 = vadd.f32 %v12034_v13, %v11866_v62  ;;  %v9798_v32 = vpack.c.bf16 %v6664_v15, %v6664_v15  ;;  %v7943_v34 = vunpack.c.l.b16 %v9797_v16  ;;  %12984 = vst [vmem:[#allocation14_spill] sm:$0xff] %v12234_v42 }
 0x33a   : > { %v8511_v40 = vsel %vm8131_vm8, %v8510_v10, %v8509_v43  ;;  %v9800_v26 = vpack.c.bf16 %v6666_v49, %v6666_v49  ;;  %v7945_v4 = vunpack.c.l.b16 %v9799_v47  ;;  %v12241_v63 = vsel %vm8122_vm5, %v8490_v52, %v12192_v8  ;;  %v12264_v43 = vpop.f32.mrb[60].mxu0 }
 0x33b   : > { %v8513_v22 = vsel %vm8134_vm9, %v8512_v5, %v8511_v40  ;;  %v1696_v58 = vmax.f32 %v1568_v54, 0.0  ;;  %v7944_v48 = vunpack.c.l.b16 %v9798_v32  ;;  %v8268_v44 = vrot.slane %v7943_v34, 4  ;;  %12986 = vst [vmem:[#allocation15_spill] sm:$0xff] %v12264_v43  ;;  %v12266_v5 = vpop.f32.mrb[60].mxu1 }
 0x33c   : > { %v8597_v62 = vpack.c.b16 %v8513_v22, %v8513_v22  ;;  %v7946_v59 = vunpack.c.l.b16 %v9800_v26  ;;  %v12985_v21 = vrot.slane %v12108_v30, 9  ;;  %v1509_v36 = vadd.f32 %v12034_v13, %v11899_v51  ;;  %12987 = vst [vmem:[#allocation16_spill] sm:$0xff] %v12266_v5 }
 0x33d   : > { %v3696_v46 = vcombine.high %v1696_v58, %v1696_v58  ;;  %v3703_v35 = vrot.slane %v1696_v58, %v10610_v14  ;;  %v8269_v0 = vsel %vm8125_vm6, %v8268_v44, %v12199_v20  ;;  %v8270_v52 = vrot.slane %v7944_v48, 3 }
 0x33e   : > { %v5514_v11 = vmax.f32 %v12108_v30, %v12985_v21  ;;  %8662 = vst.msk [vmem:[%s10873_s18 + $0x6c] sm:$0xf] %vm8634_vm10, %v8597_v62  ;;  %v8272_v8 = vrot.slane %v7945_v4, 2  ;;  %v1573_v50 = vadd.f32 %v12034_v13, %v11901_v9  ;;  %v1637_v12 = vmax.f32 %v1509_v36, 0.0 }
 0x33f   : > { %v3710_v2 = vrot.slane %v3696_v46, %v10610_v14  ;;  %v3711_v3 = vcombine.high %v3703_v35, %v3703_v35  ;;  %v9407_v30 = vrot.slane %v3703_v35, 9  ;;  %v8271_v53 = vsel %vm8128_vm7, %v8270_v52, %v8269_v0 }
 0x340   : > { %v8274_v1 = vrot.slane %v7946_v59, 1  ;;  %v1701_v41 = vmax.f32 %v1573_v50, 0.0  ;;  %v1507_v51 = vadd.f32 %v12034_v13, %v11931_v28  ;;  %v8273_v38 = vsel %vm8131_vm8, %v8272_v8, %v8271_v53 }
 0x341   : > { %v3712_v20 = vcombine.high %v3710_v2, %v3710_v2  ;;  %v9408_v29 = vrot.slane %v3711_v3, 9  ;;  %v9409_v39 = vrot.slane %v3710_v2, 9  ;;  %v6535_v56 = vmax.f32 %v3703_v35, %v9407_v30 }
 0x342   : > { %v8275_v9 = vsel %vm8134_vm9, %v8274_v1, %v8273_v38  ;;  %v2693_v33 = vcombine.high %v1637_v12, %v1637_v12  ;;  %v2700_v57 = vrot.slane %v1637_v12, %v10610_v14  ;;  %v3781_v32 = vcombine.high %v1701_v41, %v1701_v41 }
 0x343   : > { %v8580_v7 = vpack.c.b16 %v8275_v9, %v8275_v9  ;;  %v9410_v10 = vrot.slane %v3712_v20, 9  ;;  %v6536_v23 = vmax.f32 %v3711_v3, %v9408_v29  ;;  %v6537_v17 = vmax.f32 %v3710_v2, %v9409_v39 }
 0x344   : > { %v6791_v15 = vmax.f32 %v12111_v19, %v6535_v56  ;;  %v2707_v28 = vrot.slane %v2693_v33, %v10610_v14  ;;  %v2708_v49 = vcombine.high %v2700_v57, %v2700_v57  ;;  %v9043_v16 = vrot.slane %v2700_v57, 9 }
 0x345   : > { %8645 = vst.msk [vmem:[%s10873_s18 + $0x28] sm:$0xf] %vm8634_vm10, %v8580_v7  ;;  %v6538_v47 = vmax.f32 %v3712_v20, %v9410_v10  ;;  %v6792_v54 = vmax.f32 %v12113_v31, %v6536_v23  ;;  %v6793_v40 = vmax.f32 %v12116_v24, %v6537_v17  ;;  %v1571_v48 = vadd.f32 %v12034_v13, %v11934_v37  ;;  %v12278_v31 = vpop.f32.mrb[61].mxu0 }
 0x346   : > { %v9925_v26 = vpack.c.bf16 %v6791_v15, %v6791_v15  ;;  %v2709_v34 = vcombine.high %v2707_v28, %v2707_v28  ;;  %v9044_v22 = vrot.slane %v2708_v49, 9  ;;  %v9045_v19 = vrot.slane %v2707_v28, 9  ;;  %12988 = vst [vmem:[#allocation21_spill] sm:$0xff] %v12278_v31 }
 0x347   : > { %v6794_v4 = vmax.f32 %v5514_v11, %v6538_v47  ;;  %v9926_v58 = vpack.c.bf16 %v6792_v54, %v6792_v54  ;;  %v9927_v62 = vpack.c.bf16 %v6793_v40, %v6793_v40  ;;  %v12274_v21 = vmax.f32 %v2700_v57, %v9043_v16 }
 0x348   : > { %v8071_v59 = vunpack.c.l.b16 %v9925_v26  ;;  %v9046_v44 = vrot.slane %v2709_v34, 9  ;;  %v12276_v46 = vmax.f32 %v2708_v49, %v9044_v22  ;;  %v3788_v0 = vrot.slane %v1701_v41, %v10610_v14  ;;  %v12990_v22 = vld [vmem:[#allocation17_spill] sm:$0xff] }
 0x349   : > { %v9928_v24 = vpack.c.bf16 %v6794_v4, %v6794_v4  ;;  %v8072_v35 = vunpack.c.l.b16 %v9926_v58  ;;  %v8073_v36 = vunpack.c.l.b16 %v9927_v62  ;;  %v12281_v11 = vmax.f32 %v2707_v28, %v9045_v19  ;;  %v12989_v28 = vld [vmem:[#allocation27_spill] sm:$0xff]  ;;  %v12306_v4 = vpop.f32.mrb[61].mxu1 }
 0x34a   : > { %v8492_v52 = vrot.slane %v8071_v59, 4  ;;  %v3795_v8 = vrot.slane %v3781_v32, %v10610_v14  ;;  %v1635_v50 = vmax.f32 %v1507_v51, 0.0  ;;  %v3796_v30 = vcombine.high %v3788_v0, %v3788_v0  ;;  %12991 = vst [vmem:[#allocation8_spill] sm:$0xff] %v12306_v4 }
 0x34b   : > { %v8074_v37 = vunpack.c.l.b16 %v9928_v24  ;;  %v8494_v2 = vrot.slane %v8072_v35, 3  ;;  %v8496_v3 = vrot.slane %v8073_v36, 2  ;;  %v9171_v1 = vrot.slane %v3788_v0, 9 }
 0x34c   : > { %v8493_v12 = vsel %vm8125_vm6, %v8492_v52, %v12241_v63  ;;  %v3797_v53 = vcombine.high %v3795_v8, %v3795_v8  ;;  %v9173_v38 = vrot.slane %v3795_v8, 9  ;;  %v9172_v41 = vrot.slane %v3796_v30, 9 }
 0x34d   : > { %v8495_v20 = vsel %vm8128_vm7, %v8494_v2, %v8493_v12  ;;  %v8498_v29 = vrot.slane %v8074_v37, 1  ;;  %v2659_v39 = vcombine.high %v1635_v50, %v1635_v50  ;;  %v12288_v56 = vmax.f32 %v2709_v34, %v9046_v44 }
 0x34e   : > { %v8497_v9 = vsel %vm8131_vm8, %v8496_v3, %v8495_v20  ;;  %v9174_v51 = vrot.slane %v3797_v53, 9  ;;  %v12290_v33 = vmax.f32 %v3788_v0, %v9171_v1  ;;  %v12293_v7 = vmax.f32 %v3795_v8, %v9173_v38 }
 0x34f   : > { %v8499_v57 = vsel %vm8134_vm9, %v8498_v29, %v8497_v9  ;;  %v2666_v63 = vrot.slane %v1635_v50, %v10610_v14  ;;  %v2673_v10 = vrot.slane %v2659_v39, %v10610_v14  ;;  %v12297_v17 = vmax.f32 %v3796_v30, %v9172_v41 }
 0x350   : > { %v8596_v23 = vpack.c.b16 %v8499_v57, %v8499_v57  ;;  %v1699_v15 = vmax.f32 %v1571_v48, 0.0  ;;  %v1510_v49 = vadd.f32 %v12034_v13, %v12989_v28  ;;  %v1574_v19 = vadd.f32 %v12034_v13, %v12990_v22 }
 0x351   : > { %v2674_v16 = vcombine.high %v2666_v63, %v2666_v63  ;;  %v2675_v47 = vcombine.high %v2673_v10, %v2673_v10  ;;  %v9035_v54 = vrot.slane %v2666_v63, 9  ;;  %v9037_v40 = vrot.slane %v2673_v10, 9 }
 0x352   : > { %8661 = vst.msk [vmem:[%s10873_s18 + $0x68] sm:$0xf] %vm8634_vm10, %v8596_v23  ;;  %v3747_v32 = vcombine.high %v1699_v15, %v1699_v15  ;;  %v3754_v26 = vrot.slane %v1699_v15, %v10610_v14  ;;  %v1638_v34 = vmax.f32 %v1510_v49, 0.0  ;;  %v12308_v58 = vmax.f32 %v3797_v53, %v9174_v51 }
 0x353   : > { %v9036_v62 = vrot.slane %v2674_v16, 9  ;;  %v9038_v48 = vrot.slane %v2675_v47, 9  ;;  %v12310_v59 = vmax.f32 %v2666_v63, %v9035_v54  ;;  %v12315_v52 = vmax.f32 %v2673_v10, %v9037_v40  ;;  %v12328_v10 = vpop.f32.mrb[62].mxu0  ;;  %v12993_v40 = vld [vmem:[#allocation18_spill] sm:$0xff] }
 0x354   : > { %v3761_v44 = vrot.slane %v3747_v32, %v10610_v14  ;;  %v3762_v24 = vcombine.high %v3754_v26, %v3754_v26  ;;  %v9163_v35 = vrot.slane %v3754_v26, 9  ;;  %v2710_v36 = vcombine.high %v1638_v34, %v1638_v34  ;;  %12992 = vst [vmem:[#allocation7_spill] sm:$0xff] %v12328_v10 }
 0x355   : > { %v12313_v0 = vmax.f32 %v2674_v16, %v9036_v62  ;;  %v2717_v8 = vrot.slane %v1638_v34, %v10610_v14  ;;  %v1702_v50 = vmax.f32 %v1574_v19, 0.0  ;;  %v12318_v37 = vmax.f32 %v2675_v47, %v9038_v48 }
 0x356   : > { %v3763_v2 = vcombine.high %v3761_v44, %v3761_v44  ;;  %v9164_v3 = vrot.slane %v3762_v24, 9  ;;  %v9165_v30 = vrot.slane %v3761_v44, 9  ;;  %v2724_v12 = vrot.slane %v2710_v36, %v10610_v14 }
 0x357   : > { %v2725_v53 = vcombine.high %v2717_v8, %v2717_v8  ;;  %v9047_v1 = vrot.slane %v2717_v8, 9  ;;  %v3798_v38 = vcombine.high %v1702_v50, %v1702_v50  ;;  %v12321_v29 = vmax.f32 %v3754_v26, %v9163_v35  ;;  %v12995_v35 = vld [vmem:[#allocation20_spill] sm:$0xff] }
 0x358   : > { %v9166_v20 = vrot.slane %v3763_v2, 9  ;;  %v12323_v41 = vmax.f32 %v3762_v24, %v9164_v3  ;;  %v3805_v39 = vrot.slane %v1702_v50, %v10610_v14  ;;  %v12326_v9 = vmax.f32 %v3761_v44, %v9165_v30  ;;  %v12994_v44 = vld [vmem:[#allocation19_spill] sm:$0xff]  ;;  %v12996_v3 = vld [vmem:[#allocation5_spill] sm:$0xff] }
 0x359   : > { %v2726_v51 = vcombine.high %v2724_v12, %v2724_v12  ;;  %v9048_v57 = vrot.slane %v2725_v53, 9  ;;  %v9049_v63 = vrot.slane %v2724_v12, 9  ;;  %v12330_v23 = vmax.f32 %v2717_v8, %v9047_v1 }
 0x35a   : > { %v3812_v15 = vrot.slane %v3798_v38, %v10610_v14  ;;  %v3813_v28 = vcombine.high %v3805_v39, %v3805_v39  ;;  %v9175_v49 = vrot.slane %v3805_v39, 9  ;;  %v12333_v16 = vmax.f32 %v3763_v2, %v9166_v20 }
 0x35b   : > { %v9050_v47 = vrot.slane %v2726_v51, 9  ;;  %v12335_v54 = vmax.f32 %v2725_v53, %v9048_v57  ;;  %v1508_v32 = vadd.f32 %v12034_v13, %v12993_v40  ;;  %v12339_v26 = vmax.f32 %v2724_v12, %v9049_v63  ;;  %v12997_v63 = vld [vmem:[#allocation6_spill] sm:$0xff] }
 0x35c   : > { %v3814_v34 = vcombine.high %v3812_v15, %v3812_v15  ;;  %v9176_v22 = vrot.slane %v3813_v28, 9  ;;  %v9177_v19 = vrot.slane %v3812_v15, 9  ;;  %v12341_v62 = vmax.f32 %v3805_v39, %v9175_v49 }
 0x35d   : > { %v1636_v48 = vmax.f32 %v1508_v32, 0.0  ;;  %v1572_v24 = vadd.f32 %v12034_v13, %v12994_v44  ;;  %v1513_v36 = vadd.f32 %v12034_v13, %v12995_v35  ;;  %v12347_v8 = vmax.f32 %v2726_v51, %v9050_v47  ;;  %v12361_v32 = vpop.f32.mrb[62].mxu1 }
 0x35e   : > { %v9178_v50 = vrot.slane %v3814_v34, 9  ;;  %v12349_v2 = vmax.f32 %v3813_v28, %v9176_v22  ;;  %v1577_v30 = vadd.f32 %v12034_v13, %v12996_v3  ;;  %v12354_v20 = vmax.f32 %v3812_v15, %v9177_v19  ;;  %12998 = vst [vmem:[#allocation9_spill] sm:$0xff] %v12361_v32  ;;  %v12999_v15 = vld [vmem:[#allocation24_spill] sm:$0xff] }
 0x35f   : > { %v2676_v12 = vcombine.high %v1636_v48, %v1636_v48  ;;  %v2683_v53 = vrot.slane %v1636_v48, %v10610_v14  ;;  %v1700_v1 = vmax.f32 %v1572_v24, 0.0  ;;  %v1641_v38 = vmax.f32 %v1513_v36, 0.0 }
 0x360   : > { %v12356_v39 = vmax.f32 %v3814_v34, %v9178_v50  ;;  %v1705_v57 = vmax.f32 %v1577_v30, 0.0  ;;  %v1511_v51 = vadd.f32 %v12034_v13, %v12997_v63  ;;  %v12367_v34 = vadd.f32 %v12034_v13, %v12999_v15 }
 0x361   : > { %v2690_v49 = vrot.slane %v2676_v12, %v10610_v14  ;;  %v2691_v28 = vcombine.high %v2683_v53, %v2683_v53  ;;  %v9039_v47 = vrot.slane %v2683_v53, 9  ;;  %v3764_v40 = vcombine.high %v1700_v1, %v1700_v1 }
 0x362   : > { %v3771_v22 = vrot.slane %v1700_v1, %v10610_v14  ;;  %v2761_v48 = vcombine.high %v1641_v38, %v1641_v38  ;;  %v2768_v44 = vrot.slane %v1641_v38, %v10610_v14  ;;  %v3849_v36 = vcombine.high %v1705_v57, %v1705_v57 }
 0x363   : > { %v2692_v19 = vcombine.high %v2690_v49, %v2690_v49  ;;  %v9040_v24 = vrot.slane %v2691_v28, 9  ;;  %v9041_v35 = vrot.slane %v2690_v49, 9  ;;  %v3778_v50 = vrot.slane %v3764_v40, %v10610_v14 }
 0x364   : > { %v3779_v3 = vcombine.high %v3771_v22, %v3771_v22  ;;  %v9167_v30 = vrot.slane %v3771_v22, 9  ;;  %v2775_v12 = vrot.slane %v2761_v48, %v10610_v14  ;;  %v12371_v32 = vmax.f32 %v2683_v53, %v9039_v47 }
 0x365   : > { %v9042_v63 = vrot.slane %v2692_v19, 9  ;;  %v12373_v1 = vmax.f32 %v2691_v28, %v9040_v24  ;;  %v2776_v38 = vcombine.high %v2768_v44, %v2768_v44  ;;  %v12375_v10 = vmax.f32 %v2690_v49, %v9041_v35 }
 0x366   : > { %v12377_v13 = vcombine.high %v3778_v50, %v3778_v50  ;;  %v9168_v15 = vrot.slane %v3779_v3, 9  ;;  %v9169_v4 = vrot.slane %v3778_v50, 9  ;;  %v12379_v31 = vmax.f32 %v3771_v22, %v9167_v30 }
 0x367   : > { %v2777_v5 = vcombine.high %v2775_v12, %v2775_v12  ;;  %v9299_v40 = vrot.slane %v2768_v44, 9  ;;  %v9300_v43 = vrot.slane %v2776_v38, 9  ;;  %v12381_v42 = vmax.f32 %v2692_v19, %v9042_v63 }
 0x368   : > { %v12384_v53 = vmax.f32 %v3779_v3, %v9168_v15  ;;  %v9301_v28 = vrot.slane %v2775_v12, 9  ;;  %v3856_v35 = vrot.slane %v1705_v57, %v10610_v14  ;;  %v12387_v60 = vmax.f32 %v3778_v50, %v9169_v4  ;;  %v12392_v3 = vpop.f32.mrb[63].mxu0 }
 0x369   : > { %v9302_v47 = vrot.slane %v2777_v5, 9  ;;  %v6427_v24 = vmax.f32 %v2768_v44, %v9299_v40  ;;  %v6428_v49 = vmax.f32 %v2776_v38, %v9300_v43  ;;  %v3863_v22 = vrot.slane %v3849_v36, %v10610_v14  ;;  %13000 = vst [vmem:[#allocation22_spill] sm:$0xff] %v12392_v3 }
 0x36a   : > { %v6429_v18 = vmax.f32 %v2775_v12, %v9301_v28  ;;  %v1639_v30 = vmax.f32 %v1511_v51, 0.0  ;;  %v3864_v48 = vcombine.high %v3856_v35, %v3856_v35  ;;  %v9427_v43 = vrot.slane %v3856_v35, 9 }
 0x36b   : > { %v6430_v25 = vmax.f32 %v2777_v5, %v9302_v47  ;;  %v6683_v19 = vmax.f32 %v12274_v21, %v6427_v24  ;;  %v6684_v63 = vmax.f32 %v12276_v46, %v6428_v49  ;;  %v3865_v44 = vcombine.high %v3863_v22, %v3863_v22 }
 0x36c   : > { %v6685_v15 = vmax.f32 %v12281_v11, %v6429_v18  ;;  %v9429_v38 = vrot.slane %v3863_v22, 9  ;;  %v9428_v12 = vrot.slane %v3864_v48, 9  ;;  %v6555_v5 = vmax.f32 %v3856_v35, %v9427_v43  ;;  %v12402_v43 = vpop.f32.mrb[63].mxu1 }
 0x36d   : > { %v6686_v4 = vmax.f32 %v12288_v56, %v6430_v25  ;;  %v9817_v57 = vpack.c.bf16 %v6683_v19, %v6683_v19  ;;  %v9818_v50 = vpack.c.bf16 %v6684_v63, %v6684_v63  ;;  %v9430_v51 = vrot.slane %v3865_v44, 9 }
 0x36e   : > { %v9819_v36 = vpack.c.bf16 %v6685_v15, %v6685_v15  ;;  %v6557_v40 = vmax.f32 %v3863_v22, %v9429_v38  ;;  %v6556_v47 = vmax.f32 %v3864_v48, %v9428_v12  ;;  %v6811_v18 = vmax.f32 %v12290_v33, %v6555_v5 }
 0x36f   : > { %v9820_v21 = vpack.c.bf16 %v6686_v4, %v6686_v4  ;;  %v7963_v28 = vunpack.c.l.b16 %v9817_v57  ;;  %v7964_v46 = vunpack.c.l.b16 %v9818_v50  ;;  %v6558_v49 = vmax.f32 %v3865_v44, %v9430_v51 }
 0x370   : > { %v7965_v24 = vunpack.c.l.b16 %v9819_v36  ;;  %v6813_v11 = vmax.f32 %v12293_v7, %v6557_v40  ;;  %v6812_v56 = vmax.f32 %v12297_v17, %v6556_v47  ;;  %v2727_v19 = vcombine.high %v1639_v30, %v1639_v30 }
 0x371   : > { %v12398_v3 = vunpack.c.l.b16 %v9820_v21  ;;  %v8304_v25 = vrot.slane %v7964_v46, 7  ;;  %v6814_v35 = vmax.f32 %v12308_v58, %v6558_v49  ;;  %v9945_v22 = vpack.c.bf16 %v6811_v18, %v6811_v18  ;;  %v13001_v21 = vld [vmem:[#allocation23_spill] sm:$0xff] }
 0x372   : > { %v8306_v63 = vrot.slane %v7965_v24, 6  ;;  %v9947_v15 = vpack.c.bf16 %v6813_v11, %v6813_v11  ;;  %v9946_v33 = vpack.c.bf16 %v6812_v56, %v6812_v56  ;;  %v2734_v7 = vrot.slane %v1639_v30, %v10610_v14  ;;  %v12417_v30 = vld [vmem:[%s12822_s2] ss:$0 sm:$0xff] }
 0x373   : > { %v8305_v48 = vsel %vm8116_vm3, %v8304_v25, %v7963_v28  ;;  %v8308_v44 = vrot.slane %v12398_v3, 5  ;;  %v9948_v4 = vpack.c.bf16 %v6814_v35, %v6814_v35  ;;  %v8091_v17 = vunpack.c.l.b16 %v9945_v22 }
 0x374   : > { %v12408_v38 = vsel %vm8119_vm4, %v8306_v63, %v8305_v48  ;;  %v8093_v57 = vunpack.c.l.b16 %v9947_v15  ;;  %v8092_v50 = vunpack.c.l.b16 %v9946_v33  ;;  %v2741_v58 = vrot.slane %v2727_v19, %v10610_v14 }
 0x375   : > { %v2742_v12 = vcombine.high %v2734_v7, %v2734_v7  ;;  %v9291_v36 = vrot.slane %v2734_v7, 9  ;;  %v12411_v51 = vunpack.c.l.b16 %v9948_v4  ;;  %v1703_v40 = vmax.f32 %v12367_v34, 0.0 }
 0x376   : > { %v8530_v5 = vrot.slane %v8093_v57, 6  ;;  %v1514_v28 = vadd.f32 %v12417_v30, %v13001_v21  ;;  %v8528_v46 = vrot.slane %v8092_v50, 7  ;;  %v2743_v47 = vcombine.high %v2741_v58, %v2741_v58 }
 0x377   : > { %v9292_v24 = vrot.slane %v2742_v12, 9  ;;  %v9293_v49 = vrot.slane %v2741_v58, 9  ;;  %v8532_v18 = vrot.slane %v12411_v51, 5  ;;  %v6419_v11 = vmax.f32 %v2734_v7, %v9291_v36 }
 0x378   : > { %v3815_v25 = vcombine.high %v1703_v40, %v1703_v40  ;;  %v3822_v56 = vrot.slane %v1703_v40, %v10610_v14  ;;  %v8529_v34 = vsel %vm8116_vm3, %v8528_v46, %v8091_v17  ;;  %v9294_v19 = vrot.slane %v2743_v47, 9 }
 0x379   : > { %v6420_v63 = vmax.f32 %v2742_v12, %v9292_v24  ;;  %v6421_v35 = vmax.f32 %v2741_v58, %v9293_v49  ;;  %v8531_v22 = vsel %vm8119_vm4, %v8530_v5, %v8529_v34  ;;  %v6675_v15 = vmax.f32 %v12310_v59, %v6419_v11 }
 0x37a   : > { %v3829_v48 = vrot.slane %v3815_v25, %v10610_v14  ;;  %v3830_v33 = vcombine.high %v3822_v56, %v3822_v56  ;;  %v6422_v4 = vmax.f32 %v2743_v47, %v9294_v19  ;;  %v9419_v50 = vrot.slane %v3822_v56, 9 }
 0x37b   : > { %v6676_v57 = vmax.f32 %v12313_v0, %v6420_v63  ;;  %v6677_v7 = vmax.f32 %v12315_v52, %v6421_v35  ;;  %v9809_v36 = vpack.c.bf16 %v6675_v15, %v6675_v15  ;;  %v1642_v35 = vmax.f32 %v1514_v28, 0.0 }
 0x37c   : > { %v3831_v40 = vcombine.high %v3829_v48, %v3829_v48  ;;  %v9420_v21 = vrot.slane %v3830_v33, 9  ;;  %v9421_v17 = vrot.slane %v3829_v48, 9  ;;  %v6678_v12 = vmax.f32 %v12318_v37, %v6422_v4 }
 0x37d   : > { %v9810_v58 = vpack.c.bf16 %v6676_v57, %v6676_v57  ;;  %v9811_v46 = vpack.c.bf16 %v6677_v7, %v6677_v7  ;;  %v6547_v5 = vmax.f32 %v3822_v56, %v9419_v50  ;;  %v7955_v24 = vunpack.c.l.b16 %v9809_v36 }
 0x37e   : > { %v9422_v59 = vrot.slane %v3831_v40, 9  ;;  %v6548_v49 = vmax.f32 %v3830_v33, %v9420_v21  ;;  %v6549_v11 = vmax.f32 %v3829_v48, %v9421_v17  ;;  %v9812_v25 = vpack.c.bf16 %v6678_v12, %v6678_v12 }
 0x37f   : > { %v7956_v47 = vunpack.c.l.b16 %v9810_v58  ;;  %v7957_v34 = vunpack.c.l.b16 %v9811_v46  ;;  %v6803_v0 = vmax.f32 %v12321_v29, %v6547_v5  ;;  %v2778_v48 = vcombine.high %v1642_v35, %v1642_v35 }
 0x380   : > { %v6550_v52 = vmax.f32 %v3831_v40, %v9422_v59  ;;  %v6804_v19 = vmax.f32 %v12323_v41, %v6548_v49  ;;  %v6805_v63 = vmax.f32 %v12326_v9, %v6549_v11  ;;  %v7958_v15 = vunpack.c.l.b16 %v9812_v25  ;;  %v13002_v59 = vld [vmem:[#allocation25_spill] sm:$0xff] }
 0x381   : > { %v8290_v37 = vrot.slane %v7956_v47, 7  ;;  %v8292_v4 = vrot.slane %v7957_v34, 6  ;;  %v9937_v57 = vpack.c.bf16 %v6803_v0, %v6803_v0  ;;  %v2785_v29 = vrot.slane %v1642_v35, %v10610_v14 }
 0x382   : > { %v6806_v56 = vmax.f32 %v12333_v16, %v6550_v52  ;;  %v9938_v7 = vpack.c.bf16 %v6804_v19, %v6804_v19  ;;  %v9939_v33 = vpack.c.bf16 %v6805_v63, %v6805_v63  ;;  %v8294_v36 = vrot.slane %v7958_v15, 5 }
 0x383   : > { %v8291_v50 = vsel %vm8116_vm3, %v8290_v37, %v7955_v24  ;;  %v8083_v21 = vunpack.c.l.b16 %v9937_v57  ;;  %v2792_v17 = vrot.slane %v2778_v48, %v10610_v14  ;;  %v2793_v12 = vcombine.high %v2785_v29, %v2785_v29  ;;  %v13003_v57 = vld [vmem:[#allocation10_spill] sm:$0xff] }
 0x384   : > { %v8293_v41 = vsel %vm8119_vm4, %v8292_v4, %v8291_v50  ;;  %v9940_v40 = vpack.c.bf16 %v6806_v56, %v6806_v56  ;;  %v8084_v9 = vunpack.c.l.b16 %v9938_v7  ;;  %v8085_v28 = vunpack.c.l.b16 %v9939_v33 }
 0x385   : > { %v9303_v58 = vrot.slane %v2785_v29, 9  ;;  %v8309_v16 = vsel %vm8122_vm5, %v8308_v44, %v12408_v38  ;;  %v1578_v49 = vadd.f32 %v12417_v30, %v13002_v59  ;;  %v2794_v11 = vcombine.high %v2792_v17, %v2792_v17 }
 0x386   : > { %v12442_v46 = vunpack.c.l.b16 %v9940_v40  ;;  %v8514_v5 = vrot.slane %v8084_v9, 7  ;;  %v8516_v24 = vrot.slane %v8085_v28, 6  ;;  %v9304_v25 = vrot.slane %v2793_v12, 9 }
 0x387   : > { %v9305_v47 = vrot.slane %v2792_v17, 9  ;;  %v6431_v34 = vmax.f32 %v2785_v29, %v9303_v58  ;;  %v1706_v19 = vmax.f32 %v1578_v49, 0.0  ;;  %v12451_v3 = vsel %vm8122_vm5, %v8532_v18, %v8531_v22 }
 0x388   : > { %v8515_v0 = vsel %vm8116_vm3, %v8514_v5, %v8083_v21  ;;  %v8518_v52 = vrot.slane %v12442_v46, 5  ;;  %v9306_v38 = vrot.slane %v2794_v11, 9  ;;  %v6432_v63 = vmax.f32 %v2793_v12, %v9304_v25 }
 0x389   : > { %v12454_v44 = vsel %vm8119_vm4, %v8516_v24, %v8515_v0  ;;  %v6433_v35 = vmax.f32 %v2792_v17, %v9305_v47  ;;  %v6687_v15 = vmax.f32 %v12330_v23, %v6431_v34  ;;  %v3866_v37 = vcombine.high %v1706_v19, %v1706_v19 }
 0x38a   : > { %v3873_v4 = vrot.slane %v1706_v19, %v10610_v14  ;;  %v1512_v56 = vadd.f32 %v12417_v30, %v13003_v57  ;;  %v6434_v7 = vmax.f32 %v2794_v11, %v9306_v38  ;;  %v6688_v51 = vmax.f32 %v12335_v54, %v6432_v63 }
 0x38b   : > { %v6689_v18 = vmax.f32 %v12339_v26, %v6433_v35  ;;  %v12463_v22 = vsel %vm8122_vm5, %v8294_v36, %v8293_v41  ;;  %v9821_v33 = vpack.c.bf16 %v6687_v15, %v6687_v15  ;;  %v3880_v48 = vrot.slane %v3866_v37, %v10610_v14 }
 0x38c   : > { %v3881_v50 = vcombine.high %v3873_v4, %v3873_v4  ;;  %v9431_v21 = vrot.slane %v3873_v4, 9  ;;  %v6690_v23 = vmax.f32 %v12347_v8, %v6434_v7  ;;  %v9822_v29 = vpack.c.bf16 %v6688_v51, %v6688_v51 }
 0x38d   : > { %v9823_v40 = vpack.c.bf16 %v6689_v18, %v6689_v18  ;;  %v1640_v9 = vmax.f32 %v1512_v56, 0.0  ;;  %v7967_v28 = vunpack.c.l.b16 %v9821_v33  ;;  %v3882_v17 = vcombine.high %v3880_v48, %v3880_v48 }
 0x38e   : > { %v9432_v12 = vrot.slane %v3881_v50, 9  ;;  %v9433_v58 = vrot.slane %v3880_v48, 9  ;;  %v9824_v54 = vpack.c.bf16 %v6690_v23, %v6690_v23  ;;  %v7968_v5 = vunpack.c.l.b16 %v9822_v29 }
 0x38f   : > { %v7969_v26 = vunpack.c.l.b16 %v9823_v40  ;;  %v6559_v24 = vmax.f32 %v3873_v4, %v9431_v21  ;;  %v8310_v36 = vrot.slane %v7967_v28, 4  ;;  %v9434_v41 = vrot.slane %v3882_v17, 9 }
 0x390   : > { %v6560_v59 = vmax.f32 %v3881_v50, %v9432_v12  ;;  %v6561_v49 = vmax.f32 %v3880_v48, %v9433_v58  ;;  %v7970_v11 = vunpack.c.l.b16 %v9824_v54  ;;  %v8312_v25 = vrot.slane %v7968_v5, 3 }
 0x391   : > { %v8314_v47 = vrot.slane %v7969_v26, 2  ;;  %v6815_v8 = vmax.f32 %v12341_v62, %v6559_v24  ;;  %v8311_v34 = vsel %vm8125_vm6, %v8310_v36, %v8309_v16  ;;  %v6562_v0 = vmax.f32 %v3882_v17, %v9434_v41 }
 0x392   : > { %v6816_v19 = vmax.f32 %v12349_v2, %v6560_v59  ;;  %v6817_v38 = vmax.f32 %v12354_v20, %v6561_v49  ;;  %v8313_v63 = vsel %vm8128_vm7, %v8312_v25, %v8311_v34  ;;  %v8316_v35 = vrot.slane %v7970_v11, 1 }
 0x393   : > { %v9949_v15 = vpack.c.bf16 %v6815_v8, %v6815_v8  ;;  %v2744_v37 = vcombine.high %v1640_v9, %v1640_v9  ;;  %v8315_v4 = vsel %vm8131_vm8, %v8314_v47, %v8313_v63  ;;  %v6818_v57 = vmax.f32 %v12356_v39, %v6562_v0 }
 0x394   : > { %v9950_v56 = vpack.c.bf16 %v6816_v19, %v6816_v19  ;;  %v9951_v7 = vpack.c.bf16 %v6817_v38, %v6817_v38  ;;  %v8317_v62 = vsel %vm8134_vm9, %v8316_v35, %v8315_v4  ;;  %v2751_v51 = vrot.slane %v1640_v9, %v10610_v14 }
 0x395   : > { %v8095_v16 = vunpack.c.l.b16 %v9949_v15  ;;  %v2758_v2 = vrot.slane %v2744_v37, %v10610_v14  ;;  %v8583_v20 = vpack.c.b16 %v8317_v62, %v8317_v62  ;;  %v9952_v18 = vpack.c.bf16 %v6818_v57, %v6818_v57 }
 0x396   : > { %v8096_v33 = vunpack.c.l.b16 %v9950_v56  ;;  %v8097_v48 = vunpack.c.l.b16 %v9951_v7  ;;  %v2759_v21 = vcombine.high %v2751_v51, %v2751_v51  ;;  %v9295_v29 = vrot.slane %v2751_v51, 9 }
 0x397   : > { %v8534_v50 = vrot.slane %v8095_v16, 4  ;;  %v2760_v23 = vcombine.high %v2758_v2, %v2758_v2  ;;  %8648 = vst.msk [vmem:[%s10873_s18 + $0x34] sm:$0xf] %vm8634_vm10, %v8583_v20  ;;  %v8098_v39 = vunpack.c.l.b16 %v9952_v18  ;;  %v9297_v17 = vrot.slane %v2758_v2, 9 }
 0x398   : > { %v8536_v40 = vrot.slane %v8096_v33, 3  ;;  %v8538_v28 = vrot.slane %v8097_v48, 2  ;;  %v9296_v9 = vrot.slane %v2759_v21, 9  ;;  %v6423_v54 = vmax.f32 %v2751_v51, %v9295_v29 }
 0x399   : > { %v8535_v12 = vsel %vm8125_vm6, %v8534_v50, %v12451_v3  ;;  %v9298_v58 = vrot.slane %v2760_v23, 9  ;;  %v8540_v26 = vrot.slane %v8098_v39, 1  ;;  %v6425_v24 = vmax.f32 %v2758_v2, %v9297_v17 }
 0x39a   : > { %v8537_v5 = vsel %vm8128_vm7, %v8536_v40, %v8535_v12  ;;  %v1576_v36 = vadd.f32 %v12417_v30, %v12135_v61  ;;  %v6424_v59 = vmax.f32 %v2759_v21, %v9296_v9  ;;  %v6679_v11 = vmax.f32 %v12371_v32, %v6423_v54 }
 0x39b   : > { %v8539_v41 = vsel %vm8131_vm8, %v8538_v28, %v8537_v5  ;;  %v6426_v49 = vmax.f32 %v2760_v23, %v9298_v58  ;;  %v6681_v3 = vmax.f32 %v12375_v10, %v6425_v24  ;;  %v12492_v8 = vsel %vm8122_vm5, %v8518_v52, %v12454_v44 }
 0x39c   : > { %v8541_v25 = vsel %vm8134_vm9, %v8540_v26, %v8539_v41  ;;  %v1704_v47 = vmax.f32 %v1576_v36, 0.0  ;;  %v6680_v61 = vmax.f32 %v12373_v1, %v6424_v59  ;;  %v9813_v19 = vpack.c.bf16 %v6679_v11, %v6679_v11 }
 0x39d   : > { %v8599_v34 = vpack.c.b16 %v8541_v25, %v8541_v25  ;;  %v6682_v0 = vmax.f32 %v12381_v42, %v6426_v49  ;;  %v9815_v38 = vpack.c.bf16 %v6681_v3, %v6681_v3  ;;  %v1517_v10 = vadd.f32 %v12417_v30, %v12166_v55 }
 0x39e   : > { %v3832_v63 = vcombine.high %v1704_v47, %v1704_v47  ;;  %v3839_v32 = vrot.slane %v1704_v47, %v10610_v14  ;;  %v13004_v35 = vrot.slane %v12377_v13, 9  ;;  %v9814_v52 = vpack.c.bf16 %v6680_v61, %v6680_v61 }
 0x39f   : > { %8664 = vst.msk [vmem:[%s10873_s18 + $0x74] sm:$0xf] %vm8634_vm10, %v8599_v34  ;;  %v9816_v44 = vpack.c.bf16 %v6682_v0, %v6682_v0  ;;  %v7959_v15 = vunpack.c.l.b16 %v9813_v19  ;;  %v7961_v1 = vunpack.c.l.b16 %v9815_v38  ;;  %v1645_v62 = vmax.f32 %v1517_v10, 0.0 }
 0x3a0   : > { %v5530_v46 = vmax.f32 %v12377_v13, %v13004_v35  ;;  %v3846_v42 = vrot.slane %v3832_v63, %v10610_v14  ;;  %v3847_v37 = vcombine.high %v3839_v32, %v3839_v32  ;;  %v9423_v4 = vrot.slane %v3839_v32, 9 }
 0x3a1   : > { %v7960_v57 = vunpack.c.l.b16 %v9814_v52  ;;  %v7962_v56 = vunpack.c.l.b16 %v9816_v44  ;;  %v8296_v7 = vrot.slane %v7959_v15, 4  ;;  %v1581_v13 = vadd.f32 %v12417_v30, %v12174_v45 }
 0x3a2   : > { %v3848_v16 = vcombine.high %v3846_v42, %v3846_v42  ;;  %v9424_v55 = vrot.slane %v3847_v37, 9  ;;  %v9425_v51 = vrot.slane %v3846_v42, 9  ;;  %v8300_v18 = vrot.slane %v7961_v1, 2 }
 0x3a3   : > { %v8297_v2 = vsel %vm8125_vm6, %v8296_v7, %v12463_v22  ;;  %v8298_v20 = vrot.slane %v7960_v57, 3  ;;  %v6551_v33 = vmax.f32 %v3839_v32, %v9423_v4  ;;  %v2829_v23 = vcombine.high %v1645_v62, %v1645_v62 }
 0x3a4   : > { %v9426_v48 = vrot.slane %v3848_v16, 9  ;;  %v6552_v50 = vmax.f32 %v3847_v37, %v9424_v55  ;;  %v6553_v21 = vmax.f32 %v3846_v42, %v9425_v51  ;;  %v8302_v39 = vrot.slane %v7962_v56, 1 }
 0x3a5   : > { %v8299_v29 = vsel %vm8128_vm7, %v8298_v20, %v8297_v2  ;;  %v6807_v40 = vmax.f32 %v12379_v31, %v6551_v33  ;;  %v2836_v28 = vrot.slane %v1645_v62, %v10610_v14  ;;  %v2843_v54 = vrot.slane %v2829_v23, %v10610_v14  ;;  %v13005_v62 = vld [vmem:[#allocation11_spill] sm:$0xff] }
 0x3a6   : > { %v8301_v45 = vsel %vm8131_vm8, %v8300_v18, %v8299_v29  ;;  %v6554_v17 = vmax.f32 %v3848_v16, %v9426_v48  ;;  %v6808_v22 = vmax.f32 %v12384_v53, %v6552_v50  ;;  %v6809_v12 = vmax.f32 %v12387_v60, %v6553_v21 }
 0x3a7   : > { %v8303_v9 = vsel %vm8134_vm9, %v8302_v39, %v8301_v45  ;;  %v9941_v58 = vpack.c.bf16 %v6807_v40, %v6807_v40  ;;  %v2844_v5 = vcombine.high %v2836_v28, %v2836_v28  ;;  %v1709_v59 = vmax.f32 %v1581_v13, 0.0 }
 0x3a8   : > { %v8582_v26 = vpack.c.b16 %v8303_v9, %v8303_v9  ;;  %v6810_v24 = vmax.f32 %v5530_v46, %v6554_v17  ;;  %v9942_v36 = vpack.c.bf16 %v6808_v22, %v6808_v22  ;;  %v9943_v31 = vpack.c.bf16 %v6809_v12, %v6809_v12 }
 0x3a9   : > { %v8087_v41 = vunpack.c.l.b16 %v9941_v58  ;;  %v2845_v3 = vcombine.high %v2843_v54, %v2843_v54  ;;  %v9059_v34 = vrot.slane %v2836_v28, 9  ;;  %v9060_v61 = vrot.slane %v2844_v5, 9 }
 0x3aa   : > { %8647 = vst.msk [vmem:[%s10873_s18 + $0x30] sm:$0xf] %vm8634_vm10, %v8582_v26  ;;  %v9944_v49 = vpack.c.bf16 %v6810_v24, %v6810_v24  ;;  %v8088_v11 = vunpack.c.l.b16 %v9942_v36  ;;  %v8089_v25 = vunpack.c.l.b16 %v9943_v31  ;;  %v3917_v38 = vcombine.high %v1709_v59, %v1709_v59 }
 0x3ab   : > { %v8520_v53 = vrot.slane %v8087_v41, 4  ;;  %v3924_v63 = vrot.slane %v1709_v59, %v10610_v14  ;;  %v1515_v35 = vadd.f32 %v12417_v30, %v12201_v6  ;;  %v1579_v46 = vadd.f32 %v12417_v30, %v12205_v27 }
 0x3ac   : > { %v8090_v60 = vunpack.c.l.b16 %v9944_v49  ;;  %v8522_v47 = vrot.slane %v8088_v11, 3  ;;  %v8524_v19 = vrot.slane %v8089_v25, 2  ;;  %v9061_v44 = vrot.slane %v2843_v54, 9  ;;  %v13006_v25 = vld [vmem:[#allocation12_spill] sm:$0xff] }
 0x3ad   : > { %v8521_v0 = vsel %vm8125_vm6, %v8520_v53, %v12492_v8  ;;  %v3931_v15 = vrot.slane %v3917_v38, %v10610_v14  ;;  %v3932_v8 = vcombine.high %v3924_v63, %v3924_v63  ;;  %v9062_v42 = vrot.slane %v2845_v3, 9 }
 0x3ae   : > { %v8523_v32 = vsel %vm8128_vm7, %v8522_v47, %v8521_v0  ;;  %v8526_v10 = vrot.slane %v8090_v60, 1  ;;  %v1643_v37 = vmax.f32 %v1515_v35, 0.0  ;;  %v1707_v4 = vmax.f32 %v1579_v46, 0.0  ;;  %v13008_v0 = vld [vmem:[#allocation14_spill] sm:$0xff] }
 0x3af   : > { %v8525_v52 = vsel %vm8131_vm8, %v8524_v19, %v8523_v32  ;;  %v3933_v56 = vcombine.high %v3931_v15, %v3931_v15  ;;  %v9187_v7 = vrot.slane %v3924_v63, 9  ;;  %v1518_v6 = vadd.f32 %v12417_v30, %v13005_v62 }
 0x3b0   : > { %v8527_v1 = vsel %vm8134_vm9, %v8526_v10, %v8525_v52  ;;  %v9188_v16 = vrot.slane %v3932_v8, 9  ;;  %v2795_v27 = vcombine.high %v1643_v37, %v1643_v37  ;;  %v2802_v55 = vrot.slane %v1643_v37, %v10610_v14 }
 0x3b1   : > { %v8598_v57 = vpack.c.b16 %v8527_v1, %v8527_v1  ;;  %v3883_v51 = vcombine.high %v1707_v4, %v1707_v4  ;;  %v12535_v13 = vmax.f32 %v2836_v28, %v9059_v34  ;;  %v9189_v2 = vrot.slane %v3931_v15, 9 }
 0x3b2   : > { %v3890_v20 = vrot.slane %v1707_v4, %v10610_v14  ;;  %v9190_v18 = vrot.slane %v3933_v56, 9  ;;  %v2809_v33 = vrot.slane %v2795_v27, %v10610_v14  ;;  %v2810_v48 = vcombine.high %v2802_v55, %v2802_v55 }
 0x3b3   : > { %8663 = vst.msk [vmem:[%s10873_s18 + $0x70] sm:$0xf] %vm8634_vm10, %v8598_v57  ;;  %v3897_v50 = vrot.slane %v3883_v51, %v10610_v14  ;;  %v12540_v21 = vmax.f32 %v2844_v5, %v9060_v61  ;;  %v12542_v23 = vmax.f32 %v2843_v54, %v9061_v44  ;;  %v1646_v39 = vmax.f32 %v1518_v6, 0.0 }
 0x3b4   : > { %v3898_v29 = vcombine.high %v3890_v20, %v3890_v20  ;;  %v12544_v40 = vmax.f32 %v2845_v3, %v9062_v42  ;;  %v12546_v45 = vmax.f32 %v3924_v63, %v9187_v7  ;;  %v12548_v28 = vmax.f32 %v3932_v8, %v9188_v16  ;;  %v13007_v3 = vld [vmem:[#allocation13_spill] sm:$0xff] }
 0x3b5   : > { %v2811_v17 = vcombine.high %v2809_v33, %v2809_v33  ;;  %v9051_v22 = vrot.slane %v2802_v55, 9  ;;  %v9052_v12 = vrot.slane %v2810_v48, 9  ;;  %v3899_v9 = vcombine.high %v3897_v50, %v3897_v50 }
 0x3b6   : > { %v9179_v58 = vrot.slane %v3890_v20, 9  ;;  %v12550_v26 = vmax.f32 %v3931_v15, %v9189_v2  ;;  %v12552_v24 = vmax.f32 %v3933_v56, %v9190_v18  ;;  %v9053_v5 = vrot.slane %v2809_v33, 9 }
 0x3b7   : > { %v2846_v54 = vcombine.high %v1646_v39, %v1646_v39  ;;  %v9054_v36 = vrot.slane %v2811_v17, 9  ;;  %v9180_v31 = vrot.slane %v3898_v29, 9  ;;  %v9181_v41 = vrot.slane %v3897_v50, 9 }
 0x3b8   : > { %v2853_v59 = vrot.slane %v1646_v39, %v10610_v14  ;;  %v9182_v49 = vrot.slane %v3899_v9, 9  ;;  %v1582_v53 = vadd.f32 %v12417_v30, %v13006_v25  ;;  %v1516_v60 = vadd.f32 %v12417_v30, %v13007_v3 }
 0x3b9   : > { %v2860_v11 = vrot.slane %v2846_v54, %v10610_v14  ;;  %v12560_v47 = vmax.f32 %v2802_v55, %v9051_v22  ;;  %v12562_v34 = vmax.f32 %v2810_v48, %v9052_v12  ;;  %v12564_v61 = vmax.f32 %v3890_v20, %v9179_v58 }
 0x3ba   : > { %v1580_v19 = vadd.f32 %v12417_v30, %v13008_v0  ;;  %v12568_v38 = vmax.f32 %v2809_v33, %v9053_v5  ;;  %v2861_v63 = vcombine.high %v2853_v59, %v2853_v59  ;;  %v1710_v32 = vmax.f32 %v1582_v53, 0.0 }
 0x3bb   : > { %v1644_v10 = vmax.f32 %v1516_v60, 0.0  ;;  %v12570_v35 = vmax.f32 %v3898_v29, %v9180_v31  ;;  %v12572_v46 = vmax.f32 %v3897_v50, %v9181_v41  ;;  %v2862_v52 = vcombine.high %v2860_v11, %v2860_v11 }
 0x3bc   : > { %v1708_v44 = vmax.f32 %v1580_v19, 0.0  ;;  %v12574_v15 = vmax.f32 %v2811_v17, %v9054_v36  ;;  %v12576_v8 = vmax.f32 %v3899_v9, %v9182_v49  ;;  %v3934_v1 = vcombine.high %v1710_v32, %v1710_v32  ;;  %v13009_v17 = vld [vmem:[#allocation15_spill] sm:$0xff]  ;;  %v13011_v19 = vld [vmem:[#allocation16_spill] sm:$0xff] }
 0x3bd   : > { %v3941_v42 = vrot.slane %v1710_v32, %v10610_v14  ;;  %v9063_v37 = vrot.slane %v2853_v59, 9  ;;  %v9065_v4 = vrot.slane %v2860_v11, 9  ;;  %v2812_v57 = vcombine.high %v1644_v10, %v1644_v10 }
 0x3be   : > { %v2819_v56 = vrot.slane %v1644_v10, %v10610_v14  ;;  %v9064_v7 = vrot.slane %v2861_v63, 9  ;;  %v3948_v62 = vrot.slane %v3934_v1, %v10610_v14  ;;  %v3900_v16 = vcombine.high %v1708_v44, %v1708_v44 }
 0x3bf   : > { %v3949_v6 = vcombine.high %v3941_v42, %v3941_v42  ;;  %v9066_v27 = vrot.slane %v2862_v52, 9  ;;  %v9191_v55 = vrot.slane %v3941_v42, 9  ;;  %v2826_v51 = vrot.slane %v2812_v57, %v10610_v14 }
 0x3c0   : > { %v2827_v2 = vcombine.high %v2819_v56, %v2819_v56  ;;  %v3950_v20 = vcombine.high %v3948_v62, %v3948_v62  ;;  %v9193_v33 = vrot.slane %v3948_v62, 9  ;;  %v9055_v48 = vrot.slane %v2819_v56, 9 }
 0x3c1   : > { %v9192_v18 = vrot.slane %v3949_v6, 9  ;;  %v2828_v50 = vcombine.high %v2826_v51, %v2826_v51  ;;  %v9057_v39 = vrot.slane %v2826_v51, 9  ;;  %v1521_v22 = vadd.f32 %v12417_v30, %v13009_v17 }
 0x3c2   : > { %v9056_v29 = vrot.slane %v2827_v2, 9  ;;  %v12584_v12 = vmax.f32 %v2853_v59, %v9063_v37  ;;  %v9194_v9 = vrot.slane %v3950_v20, 9  ;;  %v12587_v58 = vrot.slane %v1708_v44, %v10610_v14 }
 0x3c3   : > { %v12590_v5 = vrot.slane %v3900_v16, %v10610_v14  ;;  %v12592_v54 = vmax.f32 %v2861_v63, %v9064_v7  ;;  %v12594_v36 = vmax.f32 %v2860_v11, %v9065_v4  ;;  %v12596_v31 = vmax.f32 %v2862_v52, %v9066_v27  ;;  %v13012_v52 = vld [vmem:[#allocation21_spill] sm:$0xff]  ;;  %v13013_v7 = vld [vmem:[#allocation8_spill] sm:$0xff] }
 0x3c4   : > { %13010 = vst [vmem:[#allocation26_spill] sm:$0xff] %v12587_v58  ;;  %v12598_v41 = vmax.f32 %v3941_v42, %v9191_v55  ;;  %v12600_v49 = vmax.f32 %v3949_v6, %v9192_v18  ;;  %v12602_v25 = vmax.f32 %v3948_v62, %v9193_v33  ;;  %v9058_v59 = vrot.slane %v2828_v50, 9  ;;  %v13014_v6 = vld [vmem:[#allocation7_spill] sm:$0xff] }
 0x3c5   : > { %v12604_v53 = vmax.f32 %v2819_v56, %v9055_v48  ;;  %v12606_v3 = vmax.f32 %v2827_v2, %v9056_v29  ;;  %v12608_v60 = vmax.f32 %v2826_v51, %v9057_v39  ;;  %v1649_v0 = vmax.f32 %v1521_v22, 0.0 }
 0x3c6   : > { %v1585_v11 = vadd.f32 %v12417_v30, %v13011_v19  ;;  %v12612_v63 = vmax.f32 %v3950_v20, %v9194_v9  ;;  %v12616_v32 = vcombine.high %v12587_v58, %v12587_v58  ;;  %v12620_v10 = vcombine.high %v12590_v5, %v12590_v5 }
 0x3c7   : > { %v1519_v44 = vadd.f32 %v12417_v30, %v13012_v52  ;;  %v2897_v42 = vcombine.high %v1649_v0, %v1649_v0  ;;  %v2904_v37 = vrot.slane %v1649_v0, %v10610_v14  ;;  %v12626_v57 = vmax.f32 %v2828_v50, %v9058_v59 }
 0x3c8   : > { %v1713_v4 = vmax.f32 %v1585_v11, 0.0  ;;  %v1583_v62 = vadd.f32 %v12417_v30, %v13013_v7  ;;  %v12632_v16 = vadd.f32 %v12417_v30, %v13014_v6 }
 0x3c9   : > { %v1647_v56 = vmax.f32 %v1519_v44, 0.0  ;;  %v2911_v27 = vrot.slane %v2897_v42, %v10610_v14  ;;  %v2912_v55 = vcombine.high %v2904_v37, %v2904_v37  ;;  %v9315_v51 = vrot.slane %v2904_v37, 9 }
 0x3ca   : > { %v3985_v2 = vcombine.high %v1713_v4, %v1713_v4  ;;  %v3992_v20 = vrot.slane %v1713_v4, %v10610_v14  ;;  %v12637_v48 = vmax.f32 %v1583_v62, 0.0 }
 0x3cb   : > { %v2863_v18 = vcombine.high %v1647_v56, %v1647_v56  ;;  %v2870_v33 = vrot.slane %v1647_v56, %v10610_v14  ;;  %v2913_v50 = vcombine.high %v2911_v27, %v2911_v27  ;;  %v9316_v29 = vrot.slane %v2912_v55, 9 }
 0x3cc   : > { %v9317_v39 = vrot.slane %v2911_v27, 9  ;;  %v6443_v17 = vmax.f32 %v2904_v37, %v9315_v51  ;;  %v3999_v22 = vrot.slane %v3985_v2, %v10610_v14  ;;  %v4000_v9 = vcombine.high %v3992_v20, %v3992_v20 }
 0x3cd   : > { %v9443_v59 = vrot.slane %v3992_v20, 9  ;;  %v2877_v0 = vrot.slane %v2863_v18, %v10610_v14  ;;  %v9318_v19 = vrot.slane %v2913_v50, 9  ;;  %v6444_v11 = vmax.f32 %v2912_v55, %v9316_v29 }
 0x3ce   : > { %v6445_v52 = vmax.f32 %v2911_v27, %v9317_v39  ;;  %v6699_v44 = vmax.f32 %v12535_v13, %v6443_v17  ;;  %v4001_v42 = vcombine.high %v3999_v22, %v3999_v22  ;;  %v9444_v4 = vrot.slane %v4000_v9, 9 }
 0x3cf   : > { %v9445_v56 = vrot.slane %v3999_v22, 9  ;;  %v6571_v7 = vmax.f32 %v3992_v20, %v9443_v59  ;;  %v6446_v62 = vmax.f32 %v2913_v50, %v9318_v19  ;;  %v6700_v6 = vmax.f32 %v12540_v21, %v6444_v11 }
 0x3d0   : > { %v6701_v37 = vmax.f32 %v12542_v23, %v6445_v52  ;;  %v9833_v51 = vpack.c.bf16 %v6699_v44, %v6699_v44  ;;  %v9446_v2 = vrot.slane %v4001_v42, 9  ;;  %v6572_v1 = vmax.f32 %v4000_v9, %v9444_v4 }
 0x3d1   : > { %v6573_v58 = vmax.f32 %v3999_v22, %v9445_v56  ;;  %v6827_v18 = vmax.f32 %v12546_v45, %v6571_v7  ;;  %v6702_v55 = vmax.f32 %v12544_v40, %v6446_v62  ;;  %v9834_v27 = vpack.c.bf16 %v6700_v6, %v6700_v6 }
 0x3d2   : > { %v9835_v29 = vpack.c.bf16 %v6701_v37, %v6701_v37  ;;  %v7979_v13 = vunpack.c.l.b16 %v9833_v51  ;;  %v6574_v39 = vmax.f32 %v4001_v42, %v9446_v2  ;;  %v6828_v17 = vmax.f32 %v12548_v28, %v6572_v1 }
 0x3d3   : > { %v6829_v20 = vmax.f32 %v12550_v26, %v6573_v58  ;;  %v9961_v50 = vpack.c.bf16 %v6827_v18, %v6827_v18  ;;  %v9836_v21 = vpack.c.bf16 %v6702_v55, %v6702_v55  ;;  %v7980_v59 = vunpack.c.l.b16 %v9834_v27 }
 0x3d4   : > { %v7981_v23 = vunpack.c.l.b16 %v9835_v29  ;;  %v2878_v19 = vcombine.high %v2870_v33, %v2870_v33  ;;  %v6830_v9 = vmax.f32 %v12552_v24, %v6574_v39  ;;  %v9962_v22 = vpack.c.bf16 %v6828_v17, %v6828_v17 }
 0x3d5   : > { %v9963_v11 = vpack.c.bf16 %v6829_v20, %v6829_v20  ;;  %v8107_v45 = vunpack.c.l.b16 %v9961_v50  ;;  %v12649_v52 = vunpack.c.l.b16 %v9836_v21  ;;  %v8332_v40 = vrot.slane %v7980_v59, 7 }
 0x3d6   : > { %v8334_v44 = vrot.slane %v7981_v23, 6  ;;  %v2879_v4 = vcombine.high %v2877_v0, %v2877_v0  ;;  %v9964_v42 = vpack.c.bf16 %v6830_v9, %v6830_v9  ;;  %v8108_v56 = vunpack.c.l.b16 %v9962_v22 }
 0x3d7   : > { %v8109_v28 = vunpack.c.l.b16 %v9963_v11  ;;  %v9307_v1 = vrot.slane %v2870_v33, 9  ;;  %v8333_v26 = vsel %vm8116_vm3, %v8332_v40, %v7979_v13  ;;  %v8336_v58 = vrot.slane %v12649_v52, 5 }
 0x3d8   : > { %v9308_v7 = vrot.slane %v2878_v19, 9  ;;  %v9309_v62 = vrot.slane %v2877_v0, 9  ;;  %v8335_v24 = vsel %vm8119_vm4, %v8334_v44, %v8333_v26  ;;  %v12654_v6 = vunpack.c.l.b16 %v9964_v42 }
 0x3d9   : > { %v8556_v37 = vrot.slane %v8108_v56, 7  ;;  %v8558_v51 = vrot.slane %v8109_v28, 6  ;;  %v9310_v2 = vrot.slane %v2879_v4, 9  ;;  %v6435_v18 = vmax.f32 %v2870_v33, %v9307_v1 }
 0x3da   : > { %v6436_v55 = vmax.f32 %v2878_v19, %v9308_v7  ;;  %v6437_v27 = vmax.f32 %v2877_v0, %v9309_v62  ;;  %v8560_v39 = vrot.slane %v12654_v6, 5  ;;  %v3951_v13 = vcombine.high %v12637_v48, %v12637_v48 }
 0x3db   : > { %v8557_v29 = vsel %vm8116_vm3, %v8556_v37, %v8107_v45  ;;  %v3958_v17 = vrot.slane %v12637_v48, %v10610_v14  ;;  %v6438_v50 = vmax.f32 %v2879_v4, %v9310_v2  ;;  %v6691_v21 = vmax.f32 %v12560_v47, %v6435_v18 }
 0x3dc   : > { %v12663_v20 = vsel %vm8119_vm4, %v8558_v51, %v8557_v29  ;;  %v6692_v33 = vmax.f32 %v12562_v34, %v6436_v55  ;;  %v6693_v0 = vmax.f32 %v12568_v38, %v6437_v27  ;;  %v3965_v59 = vrot.slane %v3951_v13, %v10610_v14 }
 0x3dd   : > { %v3966_v23 = vcombine.high %v3958_v17, %v3958_v17  ;;  %v9435_v19 = vrot.slane %v3958_v17, 9  ;;  %v6694_v9 = vmax.f32 %v12574_v15, %v6438_v50  ;;  %v9825_v22 = vpack.c.bf16 %v6691_v21, %v6691_v21 }
 0x3de   : > { %v9826_v11 = vpack.c.bf16 %v6692_v33, %v6692_v33  ;;  %v1650_v48 = vmax.f32 %v12632_v16, 0.0  ;;  %v9827_v45 = vpack.c.bf16 %v6693_v0, %v6693_v0  ;;  %v3967_v40 = vcombine.high %v3965_v59, %v3965_v59 }
 0x3df   : > { %v9436_v44 = vrot.slane %v3966_v23, 9  ;;  %v9437_v4 = vrot.slane %v3965_v59, 9  ;;  %v9828_v42 = vpack.c.bf16 %v6694_v9, %v6694_v9  ;;  %v7971_v47 = vunpack.c.l.b16 %v9825_v22 }
 0x3e0   : > { %v7972_v56 = vunpack.c.l.b16 %v9826_v11  ;;  %v6563_v34 = vmax.f32 %v3958_v17, %v9435_v19  ;;  %v7973_v28 = vunpack.c.l.b16 %v9827_v45  ;;  %v9438_v38 = vrot.slane %v3967_v40, 9 }
 0x3e1   : > { %v6564_v1 = vmax.f32 %v3966_v23, %v9436_v44  ;;  %v6565_v26 = vmax.f32 %v3965_v59, %v9437_v4  ;;  %v7974_v7 = vunpack.c.l.b16 %v9828_v42  ;;  %v2914_v37 = vcombine.high %v1650_v48, %v1650_v48  ;;  %v13015_v4 = vld [vmem:[#allocation9_spill] sm:$0xff] }
 0x3e2   : > { %v8318_v62 = vrot.slane %v7972_v56, 7  ;;  %v6819_v15 = vmax.f32 %v12564_v61, %v6563_v34  ;;  %v8320_v51 = vrot.slane %v7973_v28, 6  ;;  %v6566_v2 = vmax.f32 %v3967_v40, %v9438_v38 }
 0x3e3   : > { %v6820_v16 = vmax.f32 %v12570_v35, %v6564_v1  ;;  %v6821_v18 = vmax.f32 %v12572_v46, %v6565_v26  ;;  %v8322_v27 = vrot.slane %v7974_v7, 5  ;;  %v2921_v13 = vrot.slane %v1650_v48, %v10610_v14 }
 0x3e4   : > { %v8319_v55 = vsel %vm8116_vm3, %v8318_v62, %v7971_v47  ;;  %v9953_v29 = vpack.c.bf16 %v6819_v15, %v6819_v15  ;;  %v6822_v50 = vmax.f32 %v12576_v8, %v6566_v2  ;;  %v2928_v0 = vrot.slane %v2914_v37, %v10610_v14 }
 0x3e5   : > { %v8321_v17 = vsel %vm8119_vm4, %v8320_v51, %v8319_v55  ;;  %v9954_v21 = vpack.c.bf16 %v6820_v16, %v6820_v16  ;;  %v9955_v33 = vpack.c.bf16 %v6821_v18, %v6821_v18  ;;  %v2929_v59 = vcombine.high %v2921_v13, %v2921_v13  ;;  %v13016_v51 = vld [vmem:[#allocation22_spill] sm:$0xff] }
 0x3e6   : > { %v8099_v61 = vunpack.c.l.b16 %v9953_v29  ;;  %v9319_v23 = vrot.slane %v2921_v13, 9  ;;  %v9956_v35 = vpack.c.bf16 %v6822_v50, %v6822_v50  ;;  %v8337_v9 = vsel %vm8122_vm5, %v8336_v58, %v8335_v24 }
 0x3e7   : > { %v8100_v19 = vunpack.c.l.b16 %v9954_v21  ;;  %v8101_v46 = vunpack.c.l.b16 %v9955_v33  ;;  %v2930_v22 = vcombine.high %v2928_v0, %v2928_v0  ;;  %v9320_v11 = vrot.slane %v2929_v59, 9 }
 0x3e8   : > { %v9321_v48 = vrot.slane %v2928_v0, 9  ;;  %v6447_v45 = vmax.f32 %v2921_v13, %v9319_v23  ;;  %v12682_v40 = vunpack.c.l.b16 %v9956_v35  ;;  %v1586_v42 = vadd.f32 %v12417_v30, %v13015_v4 }
 0x3e9   : > { %v8542_v8 = vrot.slane %v8100_v19, 7  ;;  %v8544_v44 = vrot.slane %v8101_v46, 6  ;;  %v9322_v47 = vrot.slane %v2930_v22, 9  ;;  %v6448_v56 = vmax.f32 %v2929_v59, %v9320_v11 }
 0x3ea   : > { %v6449_v34 = vmax.f32 %v2928_v0, %v9321_v48  ;;  %v6703_v28 = vmax.f32 %v12584_v12, %v6447_v45  ;;  %v8546_v58 = vrot.slane %v12682_v40, 5  ;;  %v1714_v24 = vmax.f32 %v1586_v42, 0.0 }
 0x3eb   : > { %v8543_v52 = vsel %vm8116_vm3, %v8542_v8, %v8099_v61  ;;  %v12693_v38 = vsel %vm8122_vm5, %v8560_v39, %v12663_v20  ;;  %v6450_v26 = vmax.f32 %v2930_v22, %v9322_v47  ;;  %v6704_v7 = vmax.f32 %v12592_v54, %v6448_v56 }
 0x3ec   : > { %v12696_v1 = vsel %vm8119_vm4, %v8544_v44, %v8543_v52  ;;  %v6705_v62 = vmax.f32 %v12594_v36, %v6449_v34  ;;  %v9837_v12 = vpack.c.bf16 %v6703_v28, %v6703_v28  ;;  %v4002_v15 = vcombine.high %v1714_v24, %v1714_v24 }
 0x3ed   : > { %v4009_v37 = vrot.slane %v1714_v24, %v10610_v14  ;;  %v1520_v2 = vadd.f32 %v12417_v30, %v13016_v51  ;;  %v6706_v6 = vmax.f32 %v12596_v31, %v6450_v26  ;;  %v9838_v16 = vpack.c.bf16 %v6704_v7, %v6704_v7 }
 0x3ee   : > { %v9839_v39 = vpack.c.bf16 %v6705_v62, %v6705_v62  ;;  %v12705_v20 = vsel %vm8122_vm5, %v8322_v27, %v8321_v17  ;;  %v7983_v18 = vunpack.c.l.b16 %v9837_v12  ;;  %v4016_v55 = vrot.slane %v4002_v15, %v10610_v14 }
 0x3ef   : > { %v4017_v54 = vcombine.high %v4009_v37, %v4009_v37  ;;  %v9447_v29 = vrot.slane %v4009_v37, 9  ;;  %v9840_v36 = vpack.c.bf16 %v6706_v6, %v6706_v6  ;;  %v7984_v13 = vunpack.c.l.b16 %v9838_v16 }
 0x3f0   : > { %v7985_v50 = vunpack.c.l.b16 %v9839_v39  ;;  %v1648_v21 = vmax.f32 %v1520_v2, 0.0  ;;  %v8338_v33 = vrot.slane %v7983_v18, 4  ;;  %v4018_v61 = vcombine.high %v4016_v55, %v4016_v55 }
 0x3f1   : > { %v9448_v0 = vrot.slane %v4017_v54, 9  ;;  %v9449_v30 = vrot.slane %v4016_v55, 9  ;;  %v7986_v59 = vunpack.c.l.b16 %v9840_v36  ;;  %v8340_v31 = vrot.slane %v7984_v13, 3 }
 0x3f2   : > { %v8342_v23 = vrot.slane %v7985_v50, 2  ;;  %v6575_v35 = vmax.f32 %v4009_v37, %v9447_v29  ;;  %v8339_v27 = vsel %vm8125_vm6, %v8338_v33, %v8337_v9  ;;  %v9450_v17 = vrot.slane %v4018_v61, 9 }
 0x3f3   : > { %v6576_v19 = vmax.f32 %v4017_v54, %v9448_v0  ;;  %v6577_v46 = vmax.f32 %v4016_v55, %v9449_v30  ;;  %v8341_v22 = vsel %vm8128_vm7, %v8340_v31, %v8339_v27  ;;  %v8344_v11 = vrot.slane %v7986_v59, 1 }
 0x3f4   : > { %v6831_v48 = vmax.f32 %v12598_v41, %v6575_v35  ;;  %v2880_v45 = vcombine.high %v1648_v21, %v1648_v21  ;;  %v8343_v8 = vsel %vm8131_vm8, %v8342_v23, %v8341_v22  ;;  %v6578_v44 = vmax.f32 %v4018_v61, %v9450_v17  ;;  %v10302_v61 = vld [vmem:[%s12822_s2] ss:$0 sm:$0xff] }
 0x3f5   : > { %v6832_v4 = vmax.f32 %v12600_v49, %v6576_v19  ;;  %v6833_v42 = vmax.f32 %v12602_v25, %v6577_v46  ;;  %v8345_v47 = vsel %vm8134_vm9, %v8344_v11, %v8343_v8  ;;  %v2887_v56 = vrot.slane %v1648_v21, %v10610_v14 }
 0x3f6   : > { %v9965_v9 = vpack.c.bf16 %v6831_v48, %v6831_v48  ;;  %v2894_v34 = vrot.slane %v2880_v45, %v10610_v14  ;;  %v8585_v28 = vpack.c.b16 %v8345_v47, %v8345_v47  ;;  %v6834_v52 = vmax.f32 %v12612_v63, %v6578_v44 }
 0x3f7   : > { %v9966_v41 = vpack.c.bf16 %v6832_v4, %v6832_v4  ;;  %v9967_v24 = vpack.c.bf16 %v6833_v42, %v6833_v42  ;;  %v2895_v7 = vcombine.high %v2887_v56, %v2887_v56  ;;  %v9311_v12 = vrot.slane %v2887_v56, 9  ;;  %v13017_v4 = vld [vmem:[#allocation26_spill] sm:$0xff] }
 0x3f8   : > { %v8111_v26 = vunpack.c.l.b16 %v9965_v9  ;;  %v2896_v62 = vcombine.high %v2894_v34, %v2894_v34  ;;  %8650 = vst.msk [vmem:[%s10873_s18 + $0x3c] sm:$0xf] %vm8634_vm10, %v8585_v28  ;;  %v9968_v49 = vpack.c.bf16 %v6834_v52, %v6834_v52  ;;  %v9313_v37 = vrot.slane %v2894_v34, 9 }
 0x3f9   : > { %v8112_v25 = vunpack.c.l.b16 %v9966_v41  ;;  %v8113_v15 = vunpack.c.l.b16 %v9967_v24  ;;  %v9312_v2 = vrot.slane %v2895_v7, 9  ;;  %v6439_v16 = vmax.f32 %v2887_v56, %v9311_v12 }
 0x3fa   : > { %v8562_v51 = vrot.slane %v8111_v26, 4  ;;  %v9314_v6 = vrot.slane %v2896_v62, 9  ;;  %v8114_v39 = vunpack.c.l.b16 %v9968_v49  ;;  %v6441_v63 = vmax.f32 %v2894_v34, %v9313_v37 }
 0x3fb   : > { %v8564_v18 = vrot.slane %v8112_v25, 3  ;;  %v8566_v55 = vrot.slane %v8113_v15, 2  ;;  %v6440_v29 = vmax.f32 %v2895_v7, %v9312_v2  ;;  %v6695_v13 = vmax.f32 %v12604_v53, %v6439_v16 }
 0x3fc   : > { %v8563_v54 = vsel %vm8125_vm6, %v8562_v51, %v12693_v38  ;;  %v6442_v36 = vmax.f32 %v2896_v62, %v9314_v6  ;;  %v8568_v21 = vrot.slane %v8114_v39, 1  ;;  %v6697_v33 = vmax.f32 %v12608_v60, %v6441_v63 }
 0x3fd   : > { %v8565_v50 = vsel %vm8128_vm7, %v8564_v18, %v8563_v54  ;;  %v1584_v0 = vadd.f32 %v10302_v61, %v12402_v43  ;;  %v6696_v59 = vmax.f32 %v12606_v3, %v6440_v29  ;;  %v9829_v31 = vpack.c.bf16 %v6695_v13, %v6695_v13 }
 0x3fe   : > { %v8567_v30 = vsel %vm8131_vm8, %v8566_v55, %v8565_v50  ;;  %v6698_v38 = vmax.f32 %v12626_v57, %v6442_v36  ;;  %v9831_v23 = vpack.c.bf16 %v6697_v33, %v6697_v33  ;;  %v8547_v60 = vsel %vm8122_vm5, %v8546_v58, %v12696_v1 }
 0x3ff   : > { %v8569_v53 = vsel %vm8134_vm9, %v8568_v21, %v8567_v30  ;;  %v1712_v35 = vmax.f32 %v1584_v0, 0.0  ;;  %v9830_v17 = vpack.c.bf16 %v6696_v59, %v6696_v59  ;;  %v7975_v19 = vunpack.c.l.b16 %v9829_v31 }
 0x400   : > { %v8601_v27 = vpack.c.b16 %v8569_v53, %v8569_v53  ;;  %v9832_v43 = vpack.c.bf16 %v6698_v38, %v6698_v38  ;;  %v9185_v46 = vrot.slane %v12590_v5, 9  ;;  %v7977_v3 = vunpack.c.l.b16 %v9831_v23 }
 0x401   : > { %v3968_v22 = vcombine.high %v1712_v35, %v1712_v35  ;;  %v3975_v57 = vrot.slane %v1712_v35, %v10610_v14  ;;  %v9184_v11 = vrot.slane %v12616_v32, 9  ;;  %v7976_v48 = vunpack.c.l.b16 %v9830_v17 }
 0x402   : > { %8666 = vst.msk [vmem:[%s10873_s18 + $0x7c] sm:$0xf] %vm8634_vm10, %v8601_v27  ;;  %v7978_v45 = vunpack.c.l.b16 %v9832_v43  ;;  %v8324_v8 = vrot.slane %v7975_v19, 4  ;;  %v9186_v40 = vrot.slane %v12620_v10, 9  ;;  %v13018_v42 = vrot.slane %v13017_v4, 9 }
 0x403   : > { %v3982_v58 = vrot.slane %v3968_v22, %v10610_v14  ;;  %v3983_v1 = vcombine.high %v3975_v57, %v3975_v57  ;;  %v9439_v44 = vrot.slane %v3975_v57, 9  ;;  %v8326_v56 = vrot.slane %v7976_v48, 3 }
 0x404   : > { %v5543_v47 = vmax.f32 %v13017_v4, %v13018_v42  ;;  %v8325_v9 = vsel %vm8125_vm6, %v8324_v8, %v12705_v20  ;;  %v8328_v34 = vrot.slane %v7977_v3, 2  ;;  %v5544_v26 = vmax.f32 %v12616_v32, %v9184_v11 }
 0x405   : > { %v3984_v28 = vcombine.high %v3982_v58, %v3982_v58  ;;  %v9440_v52 = vrot.slane %v3983_v1, 9  ;;  %v9441_v41 = vrot.slane %v3982_v58, 9  ;;  %v6567_v24 = vmax.f32 %v3975_v57, %v9439_v44 }
 0x406   : > { %v5545_v14 = vmax.f32 %v12590_v5, %v9185_v46  ;;  %v8327_v7 = vsel %vm8128_vm7, %v8326_v56, %v8325_v9  ;;  %v8330_v62 = vrot.slane %v7978_v45, 1  ;;  %v5546_v20 = vmax.f32 %v12620_v10, %v9186_v40 }
 0x407   : > { %v8329_v12 = vsel %vm8131_vm8, %v8328_v34, %v8327_v7  ;;  %v9442_v49 = vrot.slane %v3984_v28, 9  ;;  %v6568_v25 = vmax.f32 %v3983_v1, %v9440_v52  ;;  %v6569_v15 = vmax.f32 %v3982_v58, %v9441_v41 }
 0x408   : > { %v8331_v37 = vsel %vm8134_vm9, %v8330_v62, %v8329_v12  ;;  %v6823_v51 = vmax.f32 %v5543_v47, %v6567_v24 }
 0x409   : > { %v8584_v2 = vpack.c.b16 %v8331_v37, %v8331_v37  ;;  %v6570_v6 = vmax.f32 %v3984_v28, %v9442_v49  ;;  %v6824_v16 = vmax.f32 %v5544_v26, %v6568_v25  ;;  %v6825_v32 = vmax.f32 %v5545_v14, %v6569_v15 }
 0x40a   : > { %v9957_v5 = vpack.c.bf16 %v6823_v51, %v6823_v51 }
 0x40b   : > { %8649 = vst.msk [vmem:[%s10873_s18 + $0x38] sm:$0xf] %vm8634_vm10, %v8584_v2  ;;  %v6826_v39 = vmax.f32 %v5546_v20, %v6570_v6  ;;  %v9958_v18 = vpack.c.bf16 %v6824_v16, %v6824_v16  ;;  %v9959_v55 = vpack.c.bf16 %v6825_v32, %v6825_v32 }
 0x40c   : > { %v8103_v63 = vunpack.c.l.b16 %v9957_v5 }
 0x40d   : > { %v9960_v54 = vpack.c.bf16 %v6826_v39, %v6826_v39  ;;  %v8104_v29 = vunpack.c.l.b16 %v9958_v18  ;;  %v8105_v10 = vunpack.c.l.b16 %v9959_v55 }
 0x40e   : > { %v8548_v36 = vrot.slane %v8103_v63, 4 }
 0x40f   : > { %v8106_v13 = vunpack.c.l.b16 %v9960_v54  ;;  %v8550_v50 = vrot.slane %v8104_v29, 3  ;;  %v8552_v33 = vrot.slane %v8105_v10, 2 }
 0x410   : > { %v8549_v21 = vsel %vm8125_vm6, %v8548_v36, %v8547_v60 }
 0x411   : > { %v8551_v61 = vsel %vm8128_vm7, %v8550_v50, %v8549_v21  ;;  %v8554_v0 = vrot.slane %v8106_v13, 1 }
 0x412   : > { %v8553_v30 = vsel %vm8131_vm8, %v8552_v33, %v8551_v61 }
 0x413   : > { %v8555_v59 = vsel %vm8134_vm9, %v8554_v0, %v8553_v30 }
 0x414   : > { %v8600_v38 = vpack.c.b16 %v8555_v59, %v8555_v59 }
 0x416   : > { %8665 = vst.msk [vmem:[%s10873_s18 + $0x78] sm:$0xf] %vm8634_vm10, %v8600_v38 }
 0x417   : > { %10316 = shalt.err (!%p10313_p5)
}
 0x418   : > { %s10317_s10 = scalar_lea.hbm %s12766_s21, 2048  ;;  %s10321_s30 = scalar_lea.hbm %s12823_s3, 4096 }
 0x419   : > { %p10318_p6 = scmp.ne.s32.totalorder %s12766_s21, %s10317_s10  ;;  %p10322_p10 = scmp.lt.u32.totalorder %s12766_s21, %s12823_s3 }
 0x41a   : > { %p10323_p11 = scmp.lt.u32.totalorder %s10321_s30, %s10317_s10  ;;  %p10325_p13 = scmp.lt.u32.totalorder %s10317_s10, %s12766_s21 }
 0x41b   : > { %p10319_p7 = pnand %p10318_p6, %p10448_p4 }
 0x41c   : > { %p10324_p12 = por %p10323_p11, %p10322_p10 }
 0x41d   : > { %p10320_p9 = pneg %p10319_p7 }
 0x41e   : > { %p10326_p0 = por %p10325_p13, %p10324_p12 }
 0x420   : > { %p10327_p1 = pnand %p10326_p0, %p10320_p9 }
 0x422   : > { %10330 = shalt.err (!%p10327_p1)
}
 0x423   : > { %s10386_s6 = smov 64   ;;  %s10387_s7 = smov 4  }
 0x424   : > { %10172 = dma.vmem_to_hbm [thread:$0]  (%p10448_p4), %s12768_s9, 2048, %s12766_s21, %s12774_s15, %s10386_s6, %s10386_s6, %s10387_s7  }
 0x425 PF: > { %p10178_p2 = scmp.ge.s32.totalorder %s10381_s17, 2  ;;  %s8700_s8 = sand.u32 1, %s10361_s12  }
 0x426   : > { %s8701_s11 = scalar_lea.sflag [#allocation3], %s8700_s8 }
 0x427   : > { %p10175_p3 = pnand %p10178_p2, %p10455_p8 }
 0x429   : > { %10356 = dma.done.wait (!%p10175_p3), %s8701_s11, 2048  }
 0x42a   : > { %10358 = vsyncadd (!%p10175_p3), %s8701_s11, 4294965248  ;;  %s16_s17 = sadd.s32 1, %s10381_s17   ;;  %s13019_s12 = smov %s10365_s13 }
 0x42b   : > { %p13_p5 = scmp.ge.s32.totalorder %s16_s17, 4   ;;  %s13020_s13 = smov %s10369_s14 }
 0x42c   : > { %s13021_s14 = smov %s10461_s25  ;;  %s13022_s15 = smov %s10377_s16 }
 0x42d   : > { %s13023_s16 = smov %s13025_s20  ;;  %15 = sbr.rel (!%p13_p5) target bundleno = 4 (0x4), region = 73 }
 0x434   :  { %8706 = vsyncpa [#allocation3], 1 }
 0x435   :  { %8708 = vsyncpa [#allocation3 + $0x1], 1 }

</bundles_post_ra>
